<compile_context>
chip_gen: v7x
topology: tpu7x:2x2x1
jax: 0.10.0
libtpu: 0.0.40
codegen_flags: <defaults>
</compile_context>

<pallas_src>
import jax
import jax.numpy as jnp
from jax.experimental import pallas as pl
from jax.experimental.pallas import tpu as pltpu

block_size = 64     # causal context length (tril buffer size in the module)
n_embd = 384        # embedding dim C (fixed by the module's nn.Linear)
dropout = 0.2       # identity in eval mode (what this kernel implements)


# ----------------------------------------------------------------------------
# Kernel
# ----------------------------------------------------------------------------
def head_kernel(x_ref, w_ref, o_ref):
    # One grid step == Bb batch elements.
    Bb, T, C = x_ref.shape
    H = o_ref.shape[-1]

    # Fused K/Q/V projection: one (Bb*T, C) x (C, 3H) bf16 MXU matmul, f32 acc.
    # (Flattening batch*time fills the MXU sublanes; reshape of leading dims is
    # layout-trivial.)
    x2d = x_ref[...].reshape(Bb * T, C).astype(jnp.bfloat16)
    kqv = jnp.dot(x2d, w_ref[...], preferred_element_type=jnp.float32)
    kqv = kqv.reshape(Bb, T, 3 * H)
    k = kqv[:, :, 0:H].astype(jnp.bfloat16)
    q = kqv[:, :, H:2 * H].astype(jnp.bfloat16)   # C**-0.5 pre-folded into Wq
    v = kqv[:, :, 2 * H:3 * H].astype(jnp.bfloat16)

    # Scores: contract on the feature dim (no explicit k transpose), f32 accum.
    scores = jnp.einsum("btd,bsd->bts", q, k,
                        preferred_element_type=jnp.float32)          # (Bb,T,T)

    # Causal mask == tril[:T, :T]: keep positions where row >= col.
    row = jax.lax.broadcasted_iota(jnp.int32, (T, T), 0)
    col = jax.lax.broadcasted_iota(jnp.int32, (T, T), 1)
    scores = jnp.where((row >= col)[None, :, :], scores, -jnp.inf)

    # Numerically-stable softmax; the divide goes to the EUP reciprocal slot.
    m = jnp.max(scores, axis=-1, keepdims=True)
    p = jnp.exp(scores - m)
    denom = jnp.sum(p, axis=-1, keepdims=True)
    p = p * pl.reciprocal(denom, approx=True)

    # Dropout(0.2): identity (eval mode).

    out = jnp.einsum("bts,bsh->bth", p.astype(jnp.bfloat16), v,
                     preferred_element_type=jnp.float32)             # (Bb,T,H)
    o_ref[...] = out.astype(o_ref.dtype)


# ----------------------------------------------------------------------------
# One-time parameter preparation (hoisted out of the per-forward path)
# ----------------------------------------------------------------------------
def prepare_head_params(wk, wq, wv, *, param_dtype=jnp.bfloat16):
    """Fuse Wk|Wq|Wv -> (C, 3H), fold the module's C**-0.5 score scale into Wq,
    and cast to the MXU compute dtype.  Do this ONCE per parameter set."""
    C = wq.shape[0]
    wq_scaled = wq * (float(C) ** -0.5)
    return jnp.concatenate([wk, wq_scaled, wv], axis=1).astype(param_dtype)


# ----------------------------------------------------------------------------
# Grid selection helpers (generation-aware)
# ----------------------------------------------------------------------------
def _tensorcores_per_device():
    """Best-effort TensorCores sharing one kernel launch (megacore sharding)."""
    try:
        kind = jax.devices()[0].device_kind.lower()
    except Exception:
        return 1
    # v5e / v6e ("lite" generations) are single-TensorCore chips.
    if "lite" in kind or "v5e" in kind or "v6e" in kind:
        return 1
    # v4 / v5p / v7x expose 2 TensorCores per device.
    if "v4" in kind or "v5p" in kind or "v7" in kind or "v5" in kind:
        return 2
    return 1


def _pick_batch_block(B, T, C, itemsize, tensorcores,
                      vmem_block_budget=2 << 20):
    """Batch elements per grid step.

    Single-TC chips: one grid step (whole batch) -> no per-step pipeline
    overhead.  Multi-TC chips: >=2 "parallel" steps so both cores get work,
    growing to >=2 steps/core for larger batches so DMA overlaps compute.
    Always keep the x block under a small VMEM budget (double-buffered).
    """
    cap = max(1, vmem_block_budget // max(1, T * C * itemsize))
    divisors = [d for d in range(1, B + 1) if B % d == 0 and d <= cap]
    if not divisors:
        divisors = [1]
    if tensorcores <= 1:
        return divisors[-1]
    target_steps = tensorcores * (2 if B >= 8 * tensorcores else 1)
    for d in reversed(divisors):
        if B // d >= target_steps:
            return d
    return divisors[0]


# ----------------------------------------------------------------------------
# Forward wrapper
# ----------------------------------------------------------------------------
def head_forward(x, wkqv):
    """x: (B, T, C) activations (bf16 preferred, f32 accepted);
    wkqv: prepared (C, 3H) fused weight from prepare_head_params().
    Returns (B, T, H) in x.dtype."""
    B, T, C = x.shape
    H = wkqv.shape[1] // 3

    tc = _tensorcores_per_device()
    Bb = _pick_batch_block(B, T, C, jnp.dtype(x.dtype).itemsize, tc)
    grid = (B // Bb,)

    return pl.pallas_call(
        head_kernel,
        out_shape=jax.ShapeDtypeStruct((B, T, H), x.dtype),
        grid_spec=pltpu.PrefetchScalarGridSpec(
            num_scalar_prefetch=0,
            grid=grid,
            in_specs=[
                pl.BlockSpec((Bb, T, C), lambda b: (b, 0, 0)),
                pl.BlockSpec((C, 3 * H), lambda b: (0, 0)),
            ],
            out_specs=pl.BlockSpec((Bb, T, H), lambda b: (b, 0, 0)),
        ),
        compiler_params=pltpu.CompilerParams(
            dimension_semantics=("parallel",)),
    )(x, wkqv)


# ----------------------------------------------------------------------------
# Pure-JAX reference (eval-mode PyTorch semantics, f32 math)
# ----------------------------------------------------------------------------
def head_reference(x, wk, wq, wv):
    B, T, C = x.shape
    k = x @ wk
    q = x @ wq
    v = x @ wv
    w = jnp.einsum("btd,bsd->bts", q, k) * (C ** -0.5)
    mask = jnp.tril(jnp.ones((T, T), dtype=bool))
    w = jnp.where(mask, w, -jnp.inf)
    w = jax.nn.softmax(w, axis=-1)
    return w @ v


if __name__ == "__main__":
    head_size = 64
    B, T, C = 8, block_size, n_embd   # T <= block_size

    key = jax.random.PRNGKey(0)
    kx, kk, kq, kv = jax.random.split(key, 4)

    x_f32 = jax.random.normal(kx, (B, T, C), dtype=jnp.float32)
    # nn.Linear(n_embd, head_size, bias=False) weights, stored as (C, H).
    scale = 1.0 / jnp.sqrt(jnp.float32(C))
    wk = jax.random.normal(kk, (C, head_size), dtype=jnp.float32) * scale
    wq = jax.random.normal(kq, (C, head_size), dtype=jnp.float32) * scale
    wv = jax.random.normal(kv, (C, head_size), dtype=jnp.float32) * scale

    # Activations in bf16 (halves the x HBM read); params prepared once.
    x = x_f32.astype(jnp.bfloat16)
    wkqv = prepare_head_params(wk, wq, wv)

    fwd = jax.jit(head_forward)
    out = jax.block_until_ready(fwd(x, wkqv))

    # Reference: module semantics in f32 on the same (bf16-valued) activations.
    ref = head_reference(x.astype(jnp.float32), wk, wq, wv)
    assert out.shape == (B, T, head_size)
    out_f32 = out.astype(jnp.float32)
    max_err = float(jnp.max(jnp.abs(out_f32 - ref)))
    # Tolerance covers bf16 weight/operand rounding (f32 accumulation) and the
    # EUP approximate-reciprocal softmax normalization.
    assert jnp.allclose(out_f32, ref, atol=3e-2, rtol=3e-2), (
        f"mismatch vs reference, max abs err {max_err}")

    print("KERNEL_OK")
</pallas_src>

<mosaic_0001>
module attributes {stable_mosaic.version = 11 : i64} {
  func.func @head_kernel(%arg0: i32, %arg1: memref<8x64x384xbf16, #tpu.memory_space<vmem>>, %arg2: memref<384x192xbf16, #tpu.memory_space<vmem>>, %arg3: memref<8x64x64xbf16, #tpu.memory_space<vmem>>) attributes {dimension_semantics = [#tpu.dimension_semantics<parallel>], iteration_bounds = array<i64: 1>, scalar_prefetch = 0 : i64, scratch_operands = 0 : i64, tpu.core_type = #tpu.core_type<tc>, window_params = [{transform_indices = @transform_0, window_bounds = array<i64: 8, 64, 384>}, {pipeline_mode = #tpu.pipeline_mode<synchronous>, transform_indices = @transform_1, window_bounds = array<i64: 384, 192>}, {transform_indices = @transform_2, window_bounds = array<i64: 8, 64, 64>}]} {
    %c0 = arith.constant 0 : index
    %c0_0 = arith.constant 0 : index
    %c0_1 = arith.constant 0 : index
    %0 = vector.load %arg1[%c0, %c0_0, %c0_1] : memref<8x64x384xbf16, #tpu.memory_space<vmem>>, vector<8x64x384xbf16>
    %1 = vector.shape_cast %0 : vector<8x64x384xbf16> to vector<512x384xbf16>
    %c0_2 = arith.constant 0 : index
    %c0_3 = arith.constant 0 : index
    %2 = vector.load %arg2[%c0_2, %c0_3] : memref<384x192xbf16, #tpu.memory_space<vmem>>, vector<384x192xbf16>
    %cst = arith.constant dense<0.000000e+00> : vector<512x192xf32>
    %3 = tpu.matmul %1, %2, %cst {dimension_numbers = #tpu.dot_dimension_numbers<[1], [0], [0], [1], [0, 0, 1, 1], [], []>} : vector<512x384xbf16>, vector<384x192xbf16>, vector<512x192xf32> -> vector<512x192xf32>
    %4 = vector.shape_cast %3 : vector<512x192xf32> to vector<8x64x192xf32>
    %5 = vector.extract_strided_slice %4 {offsets = [0, 0, 0], sizes = [8, 64, 64], strides = [1, 1, 1]} : vector<8x64x192xf32> to vector<8x64x64xf32>
    %6 = arith.truncf %5 : vector<8x64x64xf32> to vector<8x64x64xbf16>
    %7 = vector.extract_strided_slice %4 {offsets = [0, 0, 64], sizes = [8, 64, 64], strides = [1, 1, 1]} : vector<8x64x192xf32> to vector<8x64x64xf32>
    %8 = arith.truncf %7 : vector<8x64x64xf32> to vector<8x64x64xbf16>
    %9 = vector.extract_strided_slice %4 {offsets = [0, 0, 128], sizes = [8, 64, 64], strides = [1, 1, 1]} : vector<8x64x192xf32> to vector<8x64x64xf32>
    %10 = arith.truncf %9 : vector<8x64x64xf32> to vector<8x64x64xbf16>
    "tpu.trace_start"() <{level = 10 : i32, message = "btd,bsd->bts"}> : () -> ()
    %cst_4 = arith.constant dense<0.000000e+00> : vector<8x64x64xf32>
    %11 = tpu.matmul %8, %6, %cst_4 {dimension_numbers = #tpu.dot_dimension_numbers<[2], [2], [1], [1], [0, 0, 0, 1, 1, 1], [0], [0]>} : vector<8x64x64xbf16>, vector<8x64x64xbf16>, vector<8x64x64xf32> -> vector<8x64x64xf32>
    "tpu.trace_stop"() : () -> ()
    %12 = tpu.iota {dimensions = array<i32: 0>} : vector<64x64xi32>
    %13 = tpu.iota {dimensions = array<i32: 1>} : vector<64x64xi32>
    %14 = arith.cmpi sge, %12, %13 : vector<64x64xi32>
    %15 = vector.shape_cast %14 : vector<64x64xi1> to vector<1x64x64xi1>
    %cst_5 = arith.constant 0xFF800000 : f32
    %16 = vector.shape_cast %15 : vector<1x64x64xi1> to vector<1x64x64xi1>
    %17 = vector.broadcast %16 : vector<1x64x64xi1> to vector<8x64x64xi1>
    %18 = vector.broadcast %cst_5 : f32 to vector<8x64x64xf32>
    %19 = arith.select %17, %11, %18 : vector<8x64x64xi1>, vector<8x64x64xf32>
    %cst_6 = arith.constant dense<0xFF800000> : vector<8x64xf32>
    %20 = vector.multi_reduction <maximumf>, %19, %cst_6 [2] : vector<8x64x64xf32> to vector<8x64xf32>
    %21 = vector.shape_cast %20 : vector<8x64xf32> to vector<8x64x1xf32>
    %22 = vector.broadcast %21 : vector<8x64x1xf32> to vector<8x64x64xf32>
    %23 = arith.subf %19, %22 : vector<8x64x64xf32>
    %24 = math.exp %23 : vector<8x64x64xf32>
    %cst_7 = arith.constant dense<0.000000e+00> : vector<8x64xf32>
    %25 = vector.multi_reduction <add>, %24, %cst_7 [2] : vector<8x64x64xf32> to vector<8x64xf32>
    %26 = vector.shape_cast %25 : vector<8x64xf32> to vector<8x64x1xf32>
    %27 = tpu.reciprocal %26 {approx = true} : vector<8x64x1xf32> -> vector<8x64x1xf32>
    %28 = vector.broadcast %27 : vector<8x64x1xf32> to vector<8x64x64xf32>
    %29 = arith.mulf %24, %28 : vector<8x64x64xf32>
    %30 = arith.truncf %29 : vector<8x64x64xf32> to vector<8x64x64xbf16>
    "tpu.trace_start"() <{level = 10 : i32, message = "bts,bsh->bth"}> : () -> ()
    %cst_8 = arith.constant dense<0.000000e+00> : vector<8x64x64xf32>
    %31 = tpu.matmul %30, %10, %cst_8 {dimension_numbers = #tpu.dot_dimension_numbers<[2], [1], [1], [2], [0, 0, 0, 1, 1, 2], [0], [0]>} : vector<8x64x64xbf16>, vector<8x64x64xbf16>, vector<8x64x64xf32> -> vector<8x64x64xf32>
    "tpu.trace_stop"() : () -> ()
    %32 = arith.truncf %31 : vector<8x64x64xf32> to vector<8x64x64xbf16>
    %c0_9 = arith.constant 0 : index
    %c0_10 = arith.constant 0 : index
    %c0_11 = arith.constant 0 : index
    %33 = vector.load %arg3[%c0_9, %c0_10, %c0_11] : memref<8x64x64xbf16, #tpu.memory_space<vmem>>, vector<8x64x64xbf16>
    tpu.vector_store %arg3[%c0_9, %c0_10, %c0_11], %32 {strides = array<i32>} : memref<8x64x64xbf16, #tpu.memory_space<vmem>>, vector<8x64x64xbf16>,
    return
  }
  func.func @transform_0(%arg0: i32) -> (i32, i32, i32) {
    %c0_i32 = arith.constant 0 : i32
    %c0_i32_0 = arith.constant 0 : i32
    %c0_i32_1 = arith.constant 0 : i32
    return %arg0, %c0_i32, %c0_i32_0 : i32, i32, i32
  }
  func.func @transform_1(%arg0: i32) -> (i32, i32) {
    %c0_i32 = arith.constant 0 : i32
    %c0_i32_0 = arith.constant 0 : i32
    %c0_i32_1 = arith.constant 0 : i32
    return %c0_i32, %c0_i32_0 : i32, i32
  }
  func.func @transform_2(%arg0: i32) -> (i32, i32, i32) {
    %c0_i32 = arith.constant 0 : i32
    %c0_i32_0 = arith.constant 0 : i32
    %c0_i32_1 = arith.constant 0 : i32
    return %arg0, %c0_i32, %c0_i32_0 : i32, i32, i32
  }
}

</mosaic_0001>

<bundles_post_ra>
// kernel: head_forward.1
= control target key start
LH: loop header
LB: loop body
LE: loop exit
PB: predicated region body
PF: predicated region fallthrough
CT: control target
= control target key end

     0   :  { %7 = vsyncpa [#allocation3], 0  ;;  %s7381_s0 = inlined_call_operand.hbm [shape: bf16[8,64,384], index: 0, kind: input, shape index: {}]   ;;  %s7382_s1 = inlined_call_operand.vmem [shape: bf16[384,192], index: 1, kind: input, shape index: {}]   ;;  %s7383_s2 = inlined_call_operand.hbm [shape: bf16[8,64,64], index: 2, kind: output, shape index: {}]  }
   0x1   :  { %8 = vsyncpa [#allocation4], 0  ;;  %s5730_s9 = smov [#allocation2]   ;;  %s5682_s13 = scalar_lea.hbm %s7381_s0, 12288 }
   0x2   :  { %s14_s10 = sshll.u32 %s5730_s9, 4  ;;  %p5683_p0 = scmp.ne.s32.totalorder %s7381_s0, %s5682_s13  ;;  %s15_s10 = int_to_ptr.vmem [resolvable:$true] %s14_s10 }
   0x3   :  { %p5686_p1 = scmp.lt.u32.totalorder %s5682_s13, %s7381_s0 }
   0x5   :  { %p5688_p2 = pnand %p5686_p1, %p5683_p0 }
   0x7   :  { %5691 = shalt.err (!%p5688_p2)
}
   0x8   :  { %s5692_s18 = scalar_lea.vmem %s15_s10, 12288  ;;  %p5697_p4 = scmp.lt.s32.totalorder %s15_s10, %s15_s10 }
   0x9   :  { %p5693_p3 = scmp.ne.s32.totalorder %s15_s10, %s5692_s18  ;;  %p5698_p5 = scmp.lt.s32.totalorder %s5692_s18, %s5692_s18 }
   0xb   :  { %p5699_p6 = por %p5698_p5, %p5697_p4 }
   0xd   :  { %p5700_p7 = pnand %p5699_p6, %p5693_p3 }
   0xf   :  { %5703 = shalt.err (!%p5700_p7)
}
  0x10   :  { %s5731_s19 = smov 192   ;;  %s5732_s20 = smov 12  }
  0x11   :  { %20 = dma.hbm_to_vmem [thread:$0]  %s7381_s0, 12288, %s15_s10, [#allocation3], %s5731_s19, %s5731_s19, %s5732_s20  }
  0x12   :  { %5726 = dma.done.wait [#allocation3], 12288  }
  0x13   :  { %5727 = vsyncadd [#allocation3], 4294955008  ;;  %v5226_v0 = vld [vmem:[%s7382_s1 + $0x4] ss:$8 sps:$4 sm:$0xff]   ;;  %v5228_v1 = vld [vmem:[%s7382_s1] ss:$8 sps:$4 sm:$0xff]  }
  0x14   :  { %955 = vmatprep.subr.bf16.mxu0 %v5226_v0  ;;  %v5229_v2 = vld [vmem:[%s7382_s1 + $0x14] ss:$8 sps:$4 sm:$0xff]   ;;  %v5231_v3 = vld [vmem:[%s7382_s1 + $0x10] ss:$8 sps:$4 sm:$0xff]   ;;  %v5232_v4 = vld [vmem:[%s7382_s1 + $0x24] ss:$8 sps:$4 sm:$0xff]  }
  0x15   :  { %956 = vmatpush1.bf16.msra.mxu0 %v5228_v1  ;;  %v5234_v5 = vld [vmem:[%s7382_s1 + $0x20] ss:$8 sps:$4 sm:$0xff]   ;;  %v5235_v6 = vld [vmem:[%s7382_s1 + $0x34] ss:$8 sps:$4 sm:$0xff]   ;;  %v5237_v7 = vld [vmem:[%s7382_s1 + $0x30] ss:$8 sps:$4 sm:$0xff]  }
  0x16   :  { %957 = vmatprep.subr.bf16.mxu0 %v5229_v2  ;;  %v5238_v8 = vld [vmem:[%s7382_s1 + $0x44] ss:$8 sps:$4 sm:$0xff]   ;;  %v5240_v9 = vld [vmem:[%s7382_s1 + $0x40] ss:$8 sps:$4 sm:$0xff]   ;;  %v5241_v10 = vld [vmem:[%s7382_s1 + $0x54] ss:$8 sps:$4 sm:$0xff]  }
  0x17   :  { %v5243_v11 = vld [vmem:[%s7382_s1 + $0x50] ss:$8 sps:$4 sm:$0xff]   ;;  %v5244_v12 = vld [vmem:[%s7382_s1 + $0x64] ss:$8 sps:$4 sm:$0xff]   ;;  %v5246_v13 = vld [vmem:[%s7382_s1 + $0x60] ss:$8 sps:$4 sm:$0xff]  }
  0x18   :  { %v5276_v14 = vld [vmem:[#allocation2 + $0x4] ss:$12 sps:$4 sm:$0xff]   ;;  %v5277_v15 = vld [vmem:[%s7382_s1 + $0x100] ss:$8 sps:$4 sm:$0xff]   ;;  %v5247_v17 = vld [vmem:[%s7382_s1 + $0x74] ss:$8 sps:$4 sm:$0xff]  }
  0x19   :  { %958 = vmatpush1.bf16.msra.mxu0 %v5231_v3  ;;  %v5279_v16 = vld [vmem:[%s7382_s1 + $0x104] ss:$8 sps:$4 sm:$0xff]   ;;  %987 = vmatprep.mubr.bf16.mxu0 %v5276_v14  ;;  %v5249_v18 = vld [vmem:[%s7382_s1 + $0x70] ss:$8 sps:$4 sm:$0xff]   ;;  %v5294_v21 = vld [vmem:[%s7382_s1 + $0x114] ss:$8 sps:$4 sm:$0xff]  }
  0x1a   :  { %959 = vmatprep.subr.bf16.mxu0 %v5232_v4  ;;  %5043 = vmatprep.subr.bf16.mxu1 %v5279_v16  ;;  %v5250_v19 = vld [vmem:[%s7382_s1 + $0x84] ss:$8 sps:$4 sm:$0xff]   ;;  %v5292_v20 = vld [vmem:[%s7382_s1 + $0x110] ss:$8 sps:$4 sm:$0xff]   ;;  %v5252_v22 = vld [vmem:[%s7382_s1 + $0x80] ss:$8 sps:$4 sm:$0xff]  }
  0x1b   :  { %5051 = vmatpush1.bf16.msra.mxu1 %v5277_v15  ;;  %v5253_v23 = vld [vmem:[%s7382_s1 + $0x94] ss:$8 sps:$4 sm:$0xff]   ;;  %v5255_v24 = vld [vmem:[%s7382_s1 + $0x90] ss:$8 sps:$4 sm:$0xff]   ;;  %v5256_v25 = vld [vmem:[%s7382_s1 + $0xa4] ss:$8 sps:$4 sm:$0xff]  }
  0x1c   :  { %5044 = vmatprep.subr.bf16.mxu1 %v5294_v21  ;;  %v5307_v26 = vld [vmem:[%s7382_s1 + $0x120] ss:$8 sps:$4 sm:$0xff]   ;;  %v5309_v27 = vld [vmem:[%s7382_s1 + $0x124] ss:$8 sps:$4 sm:$0xff]   ;;  %v5259_v29 = vld [vmem:[%s7382_s1 + $0xb4] ss:$8 sps:$4 sm:$0xff]  }
  0x1d   :  { %960 = vmatpush1.bf16.msra.mxu0 %v5234_v5  ;;  %v5258_v28 = vld [vmem:[%s7382_s1 + $0xa0] ss:$8 sps:$4 sm:$0xff]   ;;  %v5261_v30 = vld [vmem:[%s7382_s1 + $0xb0] ss:$8 sps:$4 sm:$0xff]   ;;  %v5324_v32 = vld [vmem:[%s7382_s1 + $0x134] ss:$8 sps:$4 sm:$0xff]  }
  0x1e   :  { %961 = vmatprep.subr.bf16.mxu0 %v5235_v6  ;;  %v5322_v31 = vld [vmem:[%s7382_s1 + $0x130] ss:$8 sps:$4 sm:$0xff]   ;;  %v5262_v33 = vld [vmem:[%s7382_s1 + $0xc4] ss:$8 sps:$4 sm:$0xff]   ;;  %v5264_v34 = vld [vmem:[%s7382_s1 + $0xc0] ss:$8 sps:$4 sm:$0xff]  }
  0x1f   :  { %5052 = vmatpush1.bf16.msra.mxu1 %v5292_v20  ;;  %v5265_v35 = vld [vmem:[%s7382_s1 + $0xd4] ss:$8 sps:$4 sm:$0xff]   ;;  %v5267_v36 = vld [vmem:[%s7382_s1 + $0xd0] ss:$8 sps:$4 sm:$0xff]   ;;  %v5268_v37 = vld [vmem:[%s7382_s1 + $0xe4] ss:$8 sps:$4 sm:$0xff]  }
  0x20   :  { %5045 = vmatprep.subr.bf16.mxu1 %v5309_v27  ;;  %v5270_v38 = vld [vmem:[%s7382_s1 + $0xe0] ss:$8 sps:$4 sm:$0xff]   ;;  %v5271_v39 = vld [vmem:[%s7382_s1 + $0xf4] ss:$8 sps:$4 sm:$0xff]   ;;  %v5273_v40 = vld [vmem:[%s7382_s1 + $0xf0] ss:$8 sps:$4 sm:$0xff]  }
  0x21   :  { %962 = vmatpush1.bf16.msra.mxu0 %v5237_v7  ;;  %v5274_v41 = vld [vmem:[#allocation2] ss:$12 sps:$4 sm:$0xff]   ;;  %v5280_v42 = vld [vmem:[#allocation2 + $0x1c] ss:$12 sps:$4 sm:$0xff]   ;;  %v5282_v45 = vld [vmem:[#allocation2 + $0x18] ss:$12 sps:$4 sm:$0xff]  }
  0x22   :  { %963 = vmatprep.subr.bf16.mxu0 %v5238_v8  ;;  %v5337_v43 = vld [vmem:[%s7382_s1 + $0x140] ss:$8 sps:$4 sm:$0xff]   ;;  %v5339_v44 = vld [vmem:[%s7382_s1 + $0x144] ss:$8 sps:$4 sm:$0xff]   ;;  %v5285_v47 = vld [vmem:[#allocation2 + $0x30] ss:$12 sps:$4 sm:$0xff]  }
  0x23   :  { %5053 = vmatpush1.bf16.msra.mxu1 %v5307_v26  ;;  %v5283_v46 = vld [vmem:[#allocation2 + $0x34] ss:$12 sps:$4 sm:$0xff]   ;;  %v5286_v48 = vld [vmem:[#allocation2 + $0x4c] ss:$12 sps:$4 sm:$0xff]   ;;  %v5289_v50 = vld [vmem:[#allocation2 + $0x64] ss:$12 sps:$4 sm:$0xff]  }
  0x24   :  { %5046 = vmatprep.subr.bf16.mxu1 %v5324_v32  ;;  %v5288_v49 = vld [vmem:[#allocation2 + $0x48] ss:$12 sps:$4 sm:$0xff]   ;;  %v5351_v52 = vld [vmem:[%s7382_s1 + $0x150] ss:$8 sps:$4 sm:$0xff]   ;;  %v5291_v53 = vld [vmem:[#allocation2 + $0x60] ss:$12 sps:$4 sm:$0xff]  }
  0x25   :  { %964 = vmatpush1.bf16.msra.mxu0 %v5240_v9  ;;  %v5349_v51 = vld [vmem:[%s7382_s1 + $0x154] ss:$8 sps:$4 sm:$0xff]   ;;  %v5355_v55 = vld [vmem:[%s7382_s1 + $0x164] ss:$8 sps:$4 sm:$0xff]   ;;  %v5357_v56 = vld [vmem:[%s7382_s1 + $0x160] ss:$8 sps:$4 sm:$0xff]  }
  0x26   :  { %965 = vmatprep.subr.bf16.mxu0 %v5241_v10  ;;  %v5295_v54 = vld [vmem:[#allocation2 + $0x7c] ss:$12 sps:$4 sm:$0xff]   ;;  %v5360_v58 = vld [vmem:[%s7382_s1 + $0x170] ss:$8 sps:$4 sm:$0xff]   ;;  %v5733_v59 = vmov 0   ;;  %vm1737_vm0 = vcmask 523264  }
  0x27   :  { %5054 = vmatpush1.bf16.msra.mxu1 %v5322_v31  ;;  %v5358_v57 = vld [vmem:[%s7382_s1 + $0x174] ss:$8 sps:$4 sm:$0xff]   ;;  %1550 = vmatprep.mubr.bf16.mxu1 %v5733_v59  ;;  %v5297_v60 = vld [vmem:[#allocation2 + $0x78] ss:$12 sps:$4 sm:$0xff]   ;;  %v5364_v62 = vld [vmem:[#allocation2 + $0x200] ss:$12 sps:$4 sm:$0xff]  }
  0x28   :  { %5047 = vmatprep.subr.bf16.mxu1 %v5339_v44  ;;  %v5298_v61 = vld [vmem:[#allocation2 + $0x94] ss:$12 sps:$4 sm:$0xff]   ;;  %v5300_v63 = vld [vmem:[#allocation2 + $0x90] ss:$12 sps:$4 sm:$0xff]   ;;  %v5301_v0 = vld [vmem:[#allocation2 + $0xac] ss:$12 sps:$4 sm:$0xff]  }
  0x29   :  { %966 = vmatpush1.bf16.msra.mxu0 %v5243_v11  ;;  %v5368_v1 = vld [vmem:[#allocation2 + $0x218] ss:$12 sps:$4 sm:$0xff]   ;;  %v5303_v2 = vld [vmem:[#allocation2 + $0xa8] ss:$12 sps:$4 sm:$0xff]   ;;  %v5372_v4 = vld [vmem:[#allocation2 + $0x230] ss:$12 sps:$4 sm:$0xff]  }
  0x2a   :  { %967 = vmatprep.subr.bf16.mxu0 %v5244_v12  ;;  %v5304_v3 = vld [vmem:[#allocation2 + $0xc4] ss:$12 sps:$4 sm:$0xff]   ;;  %v5306_v5 = vld [vmem:[#allocation2 + $0xc0] ss:$12 sps:$4 sm:$0xff]   ;;  %v5310_v6 = vld [vmem:[#allocation2 + $0xdc] ss:$12 sps:$4 sm:$0xff]  }
  0x2b   :  { %5055 = vmatpush1.bf16.msra.mxu1 %v5337_v43  ;;  %v5376_v7 = vld [vmem:[#allocation2 + $0x248] ss:$12 sps:$4 sm:$0xff]   ;;  %v5312_v8 = vld [vmem:[#allocation2 + $0xd8] ss:$12 sps:$4 sm:$0xff]   ;;  %v5380_v10 = vld [vmem:[#allocation2 + $0x260] ss:$12 sps:$4 sm:$0xff]  }
  0x2c   :  { %5048 = vmatprep.subr.bf16.mxu1 %v5349_v51  ;;  %v5313_v9 = vld [vmem:[#allocation2 + $0xf4] ss:$12 sps:$4 sm:$0xff]   ;;  %v5315_v11 = vld [vmem:[#allocation2 + $0xf0] ss:$12 sps:$4 sm:$0xff]   ;;  %v5316_v12 = vld [vmem:[#allocation2 + $0x10c] ss:$12 sps:$4 sm:$0xff]  }
  0x2d   :  { %968 = vmatpush1.bf16.msra.mxu0 %v5246_v13  ;;  %v5384_v13 = vld [vmem:[#allocation2 + $0x278] ss:$12 sps:$4 sm:$0xff]   ;;  %v5318_v14 = vld [vmem:[#allocation2 + $0x108] ss:$12 sps:$4 sm:$0xff]   ;;  %s5734_s1 = smov 64   ;;  %vm4241_vm9 = vcmask 519168  }
  0x2e   :  { %969 = vmatprep.subr.bf16.mxu0 %v5247_v17  ;;  %v5321_v17 = vld [vmem:[#allocation2 + $0x120] ss:$12 sps:$4 sm:$0xff]   ;;  %s5735_s3 = smov [#allocation5]  }
  0x2f   :  { %5056 = vmatpush1.bf16.msra.mxu1 %v5351_v52  ;;  %s4311_s4 = sshll.u32 %s5735_s3, 4  ;;  %s4312_s4 = int_to_ptr.vmem [resolvable:$true] %s4311_s4 }
  0x30   :  { %5049 = vmatprep.subr.bf16.mxu1 %v5355_v55  ;;  %s5704_s5 = scalar_lea.vmem %s4312_s4, 4096  ;;  %p5709_p9 = scmp.lt.s32.totalorder %s4312_s4, %s4312_s4 }
  0x31   :  { %970 = vmatpush1.bf16.msra.mxu0 %v5249_v18  ;;  %v5325_v18 = vld [vmem:[#allocation2 + $0x13c] ss:$12 sps:$4 sm:$0xff]   ;;  %p5705_p8 = scmp.ne.s32.totalorder %s4312_s4, %s5704_s5  ;;  %p5710_p10 = scmp.lt.s32.totalorder %s5704_s5, %s5704_s5 }
  0x32   :  { %971 = vmatprep.subr.bf16.mxu0 %v5250_v19  ;;  %v5392_v19 = vld [vmem:[#allocation2 + $0x2a8] ss:$12 sps:$4 sm:$0xff]  }
  0x33   :  { %5057 = vmatpush1.bf16.msra.mxu1 %v5357_v56  ;;  %p5711_p11 = por %p5710_p10, %p5709_p9 }
  0x34   :  { %5050 = vmatprep.subr.bf16.mxu1 %v5358_v57 }
  0x35   :  { %972 = vmatpush1.bf16.msra.mxu0 %v5252_v22  ;;  %v5396_v22 = vld [vmem:[#allocation2 + $0x2c0] ss:$12 sps:$4 sm:$0xff]   ;;  %p5712_p12 = pnand %p5711_p11, %p5705_p8 }
  0x36   :  { %973 = vmatprep.subr.bf16.mxu0 %v5253_v23  ;;  %v5330_v23 = vld [vmem:[#allocation2 + $0x150] ss:$12 sps:$4 sm:$0xff]  }
  0x37   :  { %5058 = vmatpush1.bf16.msra.mxu1 %v5360_v58 }
  0x39   :  { %974 = vmatpush1.bf16.msra.mxu0 %v5255_v24  ;;  %v5331_v24 = vld [vmem:[#allocation2 + $0x16c] ss:$12 sps:$4 sm:$0xff]  }
  0x3a   :  { %975 = vmatprep.subr.bf16.mxu0 %v5256_v25  ;;  %1551 = vmatmul.mubr.bf16.vlgmr.msra.gmra.mrb[0].mxu1 %v5364_v62  ;;  %v5400_v25 = vld [vmem:[#allocation2 + $0x2d8] ss:$12 sps:$4 sm:$0xff]   ;;  %v5405_v62 = vld [vmem:[#allocation2 + $0x8] ss:$12 sps:$4 sm:$0xff]  }
  0x3b   :  { %1560 = vmatprep.mubr.bf16.mxu1 %v5733_v59 }
  0x3d   :  { %976 = vmatpush1.bf16.msra.mxu0 %v5258_v28  ;;  %v5404_v28 = vld [vmem:[#allocation2 + $0x2f0] ss:$12 sps:$4 sm:$0xff]  }
  0x3e   :  { %977 = vmatprep.subr.bf16.mxu0 %v5259_v29  ;;  %v5336_v29 = vld [vmem:[#allocation2 + $0x180] ss:$12 sps:$4 sm:$0xff]  }
  0x41   :  { %978 = vmatpush1.bf16.msra.mxu0 %v5261_v30  ;;  %v5340_v30 = vld [vmem:[#allocation2 + $0x19c] ss:$12 sps:$4 sm:$0xff]  }
  0x42   :  { %979 = vmatprep.subr.bf16.mxu0 %v5262_v33  ;;  %1561 = vmatmul.mubr.bf16.gmra.mrb[4].mxu1 %v5368_v1  ;;  %v5345_v33 = vld [vmem:[#allocation2 + $0x1b0] ss:$12 sps:$4 sm:$0xff]  }
  0x43   :  { %1570 = vmatprep.mubr.bf16.mxu1 %v5733_v59 }
  0x45   :  { %980 = vmatpush1.bf16.msra.mxu0 %v5264_v34  ;;  %v5346_v34 = vld [vmem:[#allocation2 + $0x1cc] ss:$12 sps:$4 sm:$0xff]  }
  0x46   :  { %981 = vmatprep.subr.bf16.mxu0 %v5265_v35  ;;  %v5348_v35 = vld [vmem:[#allocation2 + $0x1c8] ss:$12 sps:$4 sm:$0xff]  }
  0x49   :  { %982 = vmatpush1.bf16.msra.mxu0 %v5267_v36  ;;  %v5352_v36 = vld [vmem:[#allocation2 + $0x1e4] ss:$12 sps:$4 sm:$0xff]  }
  0x4a   :  { %983 = vmatprep.subr.bf16.mxu0 %v5268_v37  ;;  %1571 = vmatmul.mubr.bf16.gmra.mrb[8].mxu1 %v5372_v4  ;;  %v5354_v37 = vld [vmem:[#allocation2 + $0x1e0] ss:$12 sps:$4 sm:$0xff]  }
  0x4b   :  { %1580 = vmatprep.mubr.bf16.mxu1 %v5733_v59 }
  0x4d   :  { %984 = vmatpush1.bf16.msra.mxu0 %v5270_v38  ;;  %v5361_v38 = vld [vmem:[#allocation2 + $0x1fc] ss:$12 sps:$4 sm:$0xff]  }
  0x4e   :  { %985 = vmatprep.subr.bf16.mxu0 %v5271_v39  ;;  %v5363_v39 = vld [vmem:[#allocation2 + $0x1f8] ss:$12 sps:$4 sm:$0xff]  }
  0x51   :  { %986 = vmatpush1.bf16.msra.mxu0 %v5273_v40  ;;  %v5365_v40 = vld [vmem:[#allocation2 + $0x214] ss:$12 sps:$4 sm:$0xff]  }
  0x52   :  { %1308 = vmatprep.subr.bf16.mxu0 %v5279_v16  ;;  %1581 = vmatmul.mubr.bf16.gmra.mrb[12].mxu1 %v5376_v7  ;;  %v5388_v16 = vld [vmem:[#allocation2 + $0x290] ss:$12 sps:$4 sm:$0xff]  }
  0x53   :  { %1590 = vmatprep.mubr.bf16.mxu1 %v5733_v59 }
  0x54   :  { %988 = vmatmul.mubr.bf16.vlgmr.msra.gmra.mrb[0].mxu0 %v5274_v41  ;;  %v5367_v41 = vld [vmem:[#allocation2 + $0x210] ss:$12 sps:$4 sm:$0xff]  }
  0x55   :  { %1309 = vmatpush1.bf16.msra.mxu0 %v5277_v15  ;;  %997 = vmatprep.mubr.bf16.mxu0 %v5280_v42  ;;  %v5319_v15 = vld [vmem:[#allocation2 + $0x124] ss:$12 sps:$4 sm:$0xff]   ;;  %v5369_v42 = vld [vmem:[#allocation2 + $0x22c] ss:$12 sps:$4 sm:$0xff]  }
  0x56   :  { %1310 = vmatprep.subr.bf16.mxu0 %v5294_v21  ;;  %v5328_v21 = vld [vmem:[#allocation2 + $0x154] ss:$12 sps:$4 sm:$0xff]  }
  0x59   :  { %1311 = vmatpush1.bf16.msra.mxu0 %v5292_v20  ;;  %v5327_v20 = vld [vmem:[#allocation2 + $0x138] ss:$12 sps:$4 sm:$0xff]  }
  0x5a   :  { %1312 = vmatprep.subr.bf16.mxu0 %v5309_v27  ;;  %1591 = vmatmul.mubr.bf16.gmra.mrb[16].mxu1 %v5380_v10  ;;  %v5334_v27 = vld [vmem:[#allocation2 + $0x184] ss:$12 sps:$4 sm:$0xff]  }
  0x5b   :  { %1600 = vmatprep.mubr.bf16.mxu1 %v5733_v59 }
  0x5c   :  { %998 = vmatmul.mubr.bf16.gmra.mrb[4].mxu0 %v5282_v45  ;;  %v5375_v45 = vld [vmem:[#allocation2 + $0x240] ss:$12 sps:$4 sm:$0xff]  }
  0x5d   :  { %1007 = vmatprep.mubr.bf16.mxu0 %v5283_v46  ;;  %1313 = vmatpush1.bf16.msra.mxu0 %v5307_v26  ;;  %v5333_v26 = vld [vmem:[#allocation2 + $0x168] ss:$12 sps:$4 sm:$0xff]  }
  0x5e   :  { %1314 = vmatprep.subr.bf16.mxu0 %v5324_v32  ;;  %v5343_v32 = vld [vmem:[#allocation2 + $0x1b4] ss:$12 sps:$4 sm:$0xff]   ;;  %v5377_v46 = vld [vmem:[#allocation2 + $0x25c] ss:$12 sps:$4 sm:$0xff]  }
  0x61   :  { %1315 = vmatpush1.bf16.msra.mxu0 %v5322_v31  ;;  %v5342_v31 = vld [vmem:[#allocation2 + $0x198] ss:$12 sps:$4 sm:$0xff]  }
  0x62   :  { %1316 = vmatprep.subr.bf16.mxu0 %v5339_v44  ;;  %1601 = vmatmul.mubr.bf16.gmra.mrb[20].mxu1 %v5384_v13  ;;  %v5373_v44 = vld [vmem:[#allocation2 + $0x244] ss:$12 sps:$4 sm:$0xff]  }
  0x63   :  { %1610 = vmatprep.mubr.bf16.mxu1 %v5733_v59  ;;  %v5408_v13 = vld [vmem:[#allocation2 + $0x50] ss:$12 sps:$4 sm:$0xff]  }
  0x64   :  { %1008 = vmatmul.mubr.bf16.gmra.mrb[8].mxu0 %v5285_v47  ;;  %v5379_v47 = vld [vmem:[#allocation2 + $0x258] ss:$12 sps:$4 sm:$0xff]  }
  0x65   :  { %1017 = vmatprep.mubr.bf16.mxu0 %v5286_v48  ;;  %1317 = vmatpush1.bf16.msra.mxu0 %v5337_v43  ;;  %v5371_v43 = vld [vmem:[#allocation2 + $0x228] ss:$12 sps:$4 sm:$0xff]  }
  0x66   :  { %1318 = vmatprep.subr.bf16.mxu0 %v5349_v51  ;;  %v5381_v48 = vld [vmem:[#allocation2 + $0x274] ss:$12 sps:$4 sm:$0xff]  }
  0x67   :  { %v5387_v51 = vld [vmem:[#allocation2 + $0x288] ss:$12 sps:$4 sm:$0xff]  }
  0x69   :  { %1319 = vmatpush1.bf16.msra.mxu0 %v5351_v52  ;;  %v5389_v52 = vld [vmem:[#allocation2 + $0x2a4] ss:$12 sps:$4 sm:$0xff]  }
  0x6a   :  { %1320 = vmatprep.subr.bf16.mxu0 %v5355_v55  ;;  %1611 = vmatmul.mubr.bf16.gmra.mrb[24].mxu1 %v5388_v16  ;;  %v5395_v55 = vld [vmem:[#allocation2 + $0x2b8] ss:$12 sps:$4 sm:$0xff]  }
  0x6b   :  { %1620 = vmatprep.mubr.bf16.mxu1 %v5733_v59 }
  0x6c   :  { %1018 = vmatmul.mubr.bf16.gmra.mrb[12].mxu0 %v5288_v49  ;;  %v5383_v49 = vld [vmem:[#allocation2 + $0x270] ss:$12 sps:$4 sm:$0xff]  }
  0x6d   :  { %1027 = vmatprep.mubr.bf16.mxu0 %v5289_v50  ;;  %1321 = vmatpush1.bf16.msra.mxu0 %v5357_v56  ;;  %v5385_v50 = vld [vmem:[#allocation2 + $0x28c] ss:$12 sps:$4 sm:$0xff]   ;;  %v5397_v56 = vld [vmem:[#allocation2 + $0x2d4] ss:$12 sps:$4 sm:$0xff]  }
  0x6e   :  { %1322 = vmatprep.subr.bf16.mxu0 %v5358_v57  ;;  %v5399_v57 = vld [vmem:[#allocation2 + $0x2d0] ss:$12 sps:$4 sm:$0xff]  }
  0x71   :  { %1323 = vmatpush1.bf16.msra.mxu0 %v5360_v58  ;;  %v5401_v58 = vld [vmem:[#allocation2 + $0x2ec] ss:$12 sps:$4 sm:$0xff]  }
  0x72   :  { %1621 = vmatmul.mubr.bf16.gmra.mrb[28].mxu1 %v5392_v19 }
  0x73   :  { %1630 = vmatprep.mubr.bf16.mxu1 %v5733_v59 }
  0x74   :  { %1028 = vmatmul.mubr.bf16.gmra.mrb[16].mxu0 %v5291_v53  ;;  %v5391_v53 = vld [vmem:[#allocation2 + $0x2a0] ss:$12 sps:$4 sm:$0xff]  }
  0x75   :  { %1037 = vmatprep.mubr.bf16.mxu0 %v5295_v54  ;;  %v5393_v54 = vld [vmem:[#allocation2 + $0x2bc] ss:$12 sps:$4 sm:$0xff]  }
  0x7a   :  { %1631 = vmatmul.mubr.bf16.gmra.mrb[32].mxu1 %v5396_v22 }
  0x7b   :  { %1640 = vmatprep.mubr.bf16.mxu1 %v5733_v59 }
  0x7c   :  { %1038 = vmatmul.mubr.bf16.gmra.mrb[20].mxu0 %v5297_v60  ;;  %v5403_v60 = vld [vmem:[#allocation2 + $0x2e8] ss:$12 sps:$4 sm:$0xff]  }
  0x7d   :  { %1047 = vmatprep.mubr.bf16.mxu0 %v5298_v61 }
  0x82   :  { %1641 = vmatmul.mubr.bf16.gmra.mrb[36].mxu1 %v5400_v25 }
  0x83   :  { %1650 = vmatprep.mubr.bf16.mxu1 %v5733_v59 }
  0x84   :  { %1048 = vmatmul.mubr.bf16.gmra.mrb[24].mxu0 %v5300_v63 }
  0x85   :  { %1057 = vmatprep.mubr.bf16.mxu0 %v5301_v0 }
  0x8a   :  { %1651 = vmatmul.mubr.bf16.gmra.mrb[40].mxu1 %v5404_v28  ;;  %v5411_v28 = vld [vmem:[#allocation2 + $0x98] ss:$12 sps:$4 sm:$0xff]  }
  0x8c   :  { %1058 = vmatmul.mubr.bf16.gmra.mrb[28].mxu0 %v5303_v2 }
  0x8d   :  { %1067 = vmatprep.mubr.bf16.mxu0 %v5304_v3  ;;  %v5406_v3 = vld [vmem:[#allocation2 + $0x20] ss:$12 sps:$4 sm:$0xff]  }
  0x94   :  { %1068 = vmatmul.mubr.bf16.gmra.mrb[32].mxu0 %v5306_v5 }
  0x95   :  { %1077 = vmatprep.mubr.bf16.mxu0 %v5310_v6 }
  0x9c   :  { %1078 = vmatmul.mubr.bf16.gmra.mrb[36].mxu0 %v5312_v8  ;;  %v5407_v8 = vld [vmem:[#allocation2 + $0x38] ss:$12 sps:$4 sm:$0xff]  }
  0x9d   :  { %1087 = vmatprep.mubr.bf16.mxu0 %v5313_v9 }
  0xa4   :  { %1088 = vmatmul.mubr.bf16.gmra.mrb[40].mxu0 %v5315_v11 }
  0xa5   :  { %1097 = vmatprep.mubr.bf16.mxu0 %v5316_v12 }
  0xac   :  { %1098 = vmatmul.mubr.bf16.gmra.mrb[44].mxu0 %v5318_v14 }
  0xad   :  { %1107 = vmatprep.mubr.bf16.mxu0 %v5319_v15 }
  0xb4   :  { %1108 = vmatmul.mubr.bf16.gmra.mrb[48].mxu0 %v5321_v17 }
  0xb5   :  { %1117 = vmatprep.mubr.bf16.mxu0 %v5325_v18  ;;  %v5409_v18 = vld [vmem:[#allocation2 + $0x68] ss:$12 sps:$4 sm:$0xff]  }
  0xbc   :  { %1118 = vmatmul.mubr.bf16.gmra.mrb[52].mxu0 %v5327_v20 }
  0xbd   :  { %1127 = vmatprep.mubr.bf16.mxu0 %v5328_v21 }
  0xc4   :  { %1128 = vmatmul.mubr.bf16.gmra.mrb[56].mxu0 %v5330_v23  ;;  %v5410_v23 = vld [vmem:[#allocation2 + $0x80] ss:$12 sps:$4 sm:$0xff]  }
  0xc5   :  { %1137 = vmatprep.mubr.bf16.mxu0 %v5331_v24 }
  0xcc   :  { %1138 = vmatmul.mubr.bf16.gmra.mrb[60].mxu0 %v5333_v26 }
  0xcd   :  { %1147 = vmatprep.mubr.bf16.mxu0 %v5334_v27 }
  0xd4   :  { %1148 = vmatmul.mubr.bf16.gmra.mrb[64].mxu0 %v5336_v29 }
  0xd5   :  { %1157 = vmatprep.mubr.bf16.mxu0 %v5340_v30 }
  0xdc   :  { %1158 = vmatmul.mubr.bf16.gmra.mrb[68].mxu0 %v5342_v31 }
  0xdd   :  { %1167 = vmatprep.mubr.bf16.mxu0 %v5343_v32 }
  0xe4   :  { %1168 = vmatmul.mubr.bf16.gmra.mrb[72].mxu0 %v5345_v33  ;;  %v5412_v33 = vld [vmem:[#allocation2 + $0xb0] ss:$12 sps:$4 sm:$0xff]  }
  0xe5   :  { %1177 = vmatprep.mubr.bf16.mxu0 %v5346_v34 }
  0xec   :  { %1178 = vmatmul.mubr.bf16.gmra.mrb[76].mxu0 %v5348_v35 }
  0xed   :  { %1187 = vmatprep.mubr.bf16.mxu0 %v5352_v36 }
  0xf4   :  { %1188 = vmatmul.mubr.bf16.gmra.mrb[80].mxu0 %v5354_v37 }
  0xf5   :  { %1197 = vmatprep.mubr.bf16.mxu0 %v5361_v38  ;;  %v5413_v38 = vld [vmem:[#allocation2 + $0xc8] ss:$12 sps:$4 sm:$0xff]  }
  0xfc   :  { %1198 = vmatmul.mubr.bf16.gmra.mrb[84].mxu0 %v5363_v39 }
  0xfd   :  { %1207 = vmatprep.mubr.bf16.mxu0 %v5365_v40 }
 0x104   :  { %1208 = vmatmul.mubr.bf16.gmra.mrb[88].mxu0 %v5367_v41 }
 0x105   :  { %1217 = vmatprep.mubr.bf16.mxu0 %v5369_v42 }
 0x10c   :  { %1218 = vmatmul.mubr.bf16.gmra.mrb[92].mxu0 %v5371_v43  ;;  %v5414_v43 = vld [vmem:[#allocation2 + $0xe0] ss:$12 sps:$4 sm:$0xff]  }
 0x10d   :  { %1227 = vmatprep.mubr.bf16.mxu0 %v5373_v44  ;;  %v5920_v61 = vpop.f32.mrb[0].mxu1 }
 0x10e   :  { %v5922_v63 = vpop.f32.mrb[1].mxu1 }
 0x10f   :  { %v5924_v0 = vpop.f32.mrb[2].mxu1 }
 0x110   :  { %v5926_v1 = vpop.f32.mrb[3].mxu1 }
 0x114   :  { %1228 = vmatmul.mubr.bf16.gmra.mrb[96].mxu0 %v5375_v45 }
 0x115   :  { %1237 = vmatprep.mubr.bf16.mxu0 %v5377_v46  ;;  %v5929_v2 = vpop.f32.mrb[4].mxu1 }
 0x116   :  { %v5931_v4 = vpop.f32.mrb[5].mxu1 }
 0x117   :  { %v5933_v5 = vpop.f32.mrb[6].mxu1 }
 0x118   :  { %v5935_v6 = vpop.f32.mrb[7].mxu1 }
 0x11c   :  { %1238 = vmatmul.mubr.bf16.gmra.mrb[100].mxu0 %v5379_v47 }
 0x11d   :  { %1247 = vmatprep.mubr.bf16.mxu0 %v5381_v48  ;;  %v5938_v7 = vpop.f32.mrb[8].mxu1  ;;  %v5415_v48 = vld [vmem:[#allocation2 + $0xf8] ss:$12 sps:$4 sm:$0xff]  }
 0x11e   :  { %v5940_v9 = vpop.f32.mrb[9].mxu1 }
 0x11f   :  { %v5942_v10 = vpop.f32.mrb[10].mxu1 }
 0x120   :  { %v5944_v11 = vpop.f32.mrb[11].mxu1 }
 0x124   :  { %1248 = vmatmul.mubr.bf16.gmra.mrb[104].mxu0 %v5383_v49 }
 0x125   :  { %1257 = vmatprep.mubr.bf16.mxu0 %v5385_v50  ;;  %v5947_v12 = vpop.f32.mrb[12].mxu1 }
 0x126   :  { %v5949_v14 = vpop.f32.mrb[13].mxu1 }
 0x127   :  { %v5951_v15 = vpop.f32.mrb[14].mxu1 }
 0x128   :  { %v5953_v16 = vpop.f32.mrb[15].mxu1 }
 0x12c   :  { %1258 = vmatmul.mubr.bf16.gmra.mrb[108].mxu0 %v5387_v51 }
 0x12d   :  { %1267 = vmatprep.mubr.bf16.mxu0 %v5389_v52  ;;  %v5956_v17 = vpop.f32.mrb[16].mxu1  ;;  %v5416_v52 = vld [vmem:[#allocation2 + $0x110] ss:$12 sps:$4 sm:$0xff]  }
 0x12e   :  { %v5958_v19 = vpop.f32.mrb[17].mxu1 }
 0x12f   :  { %v5960_v20 = vpop.f32.mrb[18].mxu1 }
 0x130   :  { %v5962_v21 = vpop.f32.mrb[19].mxu1 }
 0x134   :  { %1268 = vmatmul.mubr.bf16.gmra.mrb[112].mxu0 %v5391_v53  ;;  %v5417_v53 = vld [vmem:[#allocation2 + $0x128] ss:$12 sps:$4 sm:$0xff]  }
 0x135   :  { %1277 = vmatprep.mubr.bf16.mxu0 %v5393_v54  ;;  %v5965_v22 = vpop.f32.mrb[20].mxu1  ;;  %v5418_v54 = vld [vmem:[#allocation2 + $0x140] ss:$12 sps:$4 sm:$0xff]  }
 0x136   :  { %v5967_v24 = vpop.f32.mrb[21].mxu1 }
 0x137   :  { %v5969_v25 = vpop.f32.mrb[22].mxu1 }
 0x138   :  { %v5971_v26 = vpop.f32.mrb[23].mxu1 }
 0x13c   :  { %1278 = vmatmul.mubr.bf16.gmra.mrb[116].mxu0 %v5395_v55  ;;  %v5419_v55 = vld [vmem:[#allocation2 + $0x158] ss:$12 sps:$4 sm:$0xff]  }
 0x13d   :  { %1287 = vmatprep.mubr.bf16.mxu0 %v5397_v56  ;;  %v5974_v27 = vpop.f32.mrb[24].mxu1  ;;  %v5420_v56 = vld [vmem:[#allocation2 + $0x170] ss:$12 sps:$4 sm:$0xff]  }
 0x13e   :  { %v5976_v29 = vpop.f32.mrb[25].mxu1 }
 0x13f   :  { %v5978_v30 = vpop.f32.mrb[26].mxu1 }
 0x140   :  { %v5980_v31 = vpop.f32.mrb[27].mxu1 }
 0x144   :  { %1288 = vmatmul.mubr.bf16.gmra.mrb[120].mxu0 %v5399_v57 }
 0x145   :  { %1297 = vmatprep.mubr.bf16.mxu0 %v5401_v58  ;;  %v5983_v32 = vpop.f32.mrb[28].mxu1 }
 0x146   :  { %v5985_v34 = vpop.f32.mrb[29].mxu1 }
 0x147   :  { %v5987_v35 = vpop.f32.mrb[30].mxu1 }
 0x148   :  { %v5989_v36 = vpop.f32.mrb[31].mxu1 }
 0x14c   :  { %1298 = vmatmul.mubr.bf16.gmra.mrb[124].mxu0 %v5403_v60 }
 0x14d   :  { %1340 = vmatprep.mubr.bf16.mxu0 %v5733_v59  ;;  %v5992_v37 = vpop.f32.mrb[32].mxu1 }
 0x14e   :  { %v5994_v39 = vpop.f32.mrb[33].mxu1 }
 0x14f   :  { %v5996_v40 = vpop.f32.mrb[34].mxu1 }
 0x150   :  { %v5998_v41 = vpop.f32.mrb[35].mxu1 }
 0x154   :  { %1341 = vmatmul.mubr.bf16.vlgmr.msra.gmra.mrb[0].mxu0 %v5405_v62  ;;  %v5421_v62 = vld [vmem:[#allocation2 + $0x188] ss:$12 sps:$4 sm:$0xff]  }
 0x155   :  { %1350 = vmatprep.mubr.bf16.mxu0 %v5733_v59  ;;  %v6001_v42 = vpop.f32.mrb[36].mxu1 }
 0x156   :  { %v6003_v44 = vpop.f32.mrb[37].mxu1 }
 0x157   :  { %v6005_v45 = vpop.f32.mrb[38].mxu1 }
 0x158   :  { %v6007_v46 = vpop.f32.mrb[39].mxu1 }
 0x15c   :  { %1351 = vmatmul.mubr.bf16.gmra.mrb[4].mxu0 %v5406_v3 }
 0x15d   :  { %1360 = vmatprep.mubr.bf16.mxu0 %v5733_v59  ;;  %v6010_v47 = vpop.f32.mrb[40].mxu1 }
 0x15e   :  { %v6012_v49 = vpop.f32.mrb[41].mxu1 }
 0x15f   :  { %v6014_v50 = vpop.f32.mrb[42].mxu1 }
 0x160   :  { %v6016_v51 = vpop.f32.mrb[43].mxu1 }
 0x164   :  { %1361 = vmatmul.mubr.bf16.gmra.mrb[8].mxu0 %v5407_v8 }
 0x165   :  { %1370 = vmatprep.mubr.bf16.mxu0 %v5733_v59 }
 0x16c   :  { %1371 = vmatmul.mubr.bf16.gmra.mrb[12].mxu0 %v5408_v13 }
 0x16d   :  { %1380 = vmatprep.mubr.bf16.mxu0 %v5733_v59 }
 0x174   :  { %1381 = vmatmul.mubr.bf16.gmra.mrb[16].mxu0 %v5409_v18 }
 0x175   :  { %1390 = vmatprep.mubr.bf16.mxu0 %v5733_v59 }
 0x17c   :  { %1391 = vmatmul.mubr.bf16.gmra.mrb[20].mxu0 %v5410_v23 }
 0x17d   :  { %1400 = vmatprep.mubr.bf16.mxu0 %v5733_v59 }
 0x184   :  { %1401 = vmatmul.mubr.bf16.gmra.mrb[24].mxu0 %v5411_v28 }
 0x185   :  { %1410 = vmatprep.mubr.bf16.mxu0 %v5733_v59 }
 0x18c   :  { %1411 = vmatmul.mubr.bf16.gmra.mrb[28].mxu0 %v5412_v33 }
 0x18d   :  { %1420 = vmatprep.mubr.bf16.mxu0 %v5733_v59 }
 0x194   :  { %1421 = vmatmul.mubr.bf16.gmra.mrb[32].mxu0 %v5413_v38 }
 0x195   :  { %1430 = vmatprep.mubr.bf16.mxu0 %v5733_v59 }
 0x19c   :  { %1431 = vmatmul.mubr.bf16.gmra.mrb[36].mxu0 %v5414_v43 }
 0x19d   :  { %1440 = vmatprep.mubr.bf16.mxu0 %v5733_v59 }
 0x1a4   :  { %1441 = vmatmul.mubr.bf16.gmra.mrb[40].mxu0 %v5415_v48  ;;  %v5422_v48 = vld [vmem:[#allocation2 + $0x1a0] ss:$12 sps:$4 sm:$0xff]  }
 0x1a5   :  { %1450 = vmatprep.mubr.bf16.mxu0 %v5733_v59 }
 0x1ac   :  { %1451 = vmatmul.mubr.bf16.gmra.mrb[44].mxu0 %v5416_v52 }
 0x1ad   :  { %1460 = vmatprep.mubr.bf16.mxu0 %v5733_v59 }
 0x1b4   :  { %1461 = vmatmul.mubr.bf16.gmra.mrb[48].mxu0 %v5417_v53 }
 0x1b5   :  { %1470 = vmatprep.mubr.bf16.mxu0 %v5733_v59 }
 0x1bc   :  { %1471 = vmatmul.mubr.bf16.gmra.mrb[52].mxu0 %v5418_v54 }
 0x1bd   :  { %1480 = vmatprep.mubr.bf16.mxu0 %v5733_v59 }
 0x1c4   :  { %1481 = vmatmul.mubr.bf16.gmra.mrb[56].mxu0 %v5419_v55 }
 0x1c5   :  { %1490 = vmatprep.mubr.bf16.mxu0 %v5733_v59 }
 0x1cc   :  { %1491 = vmatmul.mubr.bf16.gmra.mrb[60].mxu0 %v5420_v56 }
 0x1cd   :  { %1500 = vmatprep.mubr.bf16.mxu0 %v5733_v59 }
 0x1cf   :  { %v1199_v57 = vpop.f32.mrb[84].mxu0 }
 0x1d0   :  { %v1553_v58 = vadd.f32 %v5920_v61, %v1199_v57  ;;  %v1201_v60 = vpop.f32.mrb[85].mxu0 }
 0x1d1   :  { %v1555_v3 = vadd.f32 %v5922_v63, %v1201_v60  ;;  %v1203_v8 = vpop.f32.mrb[86].mxu0 }
 0x1d2   :  { %v1557_v13 = vadd.f32 %v5924_v0, %v1203_v8  ;;  %v1205_v18 = vpop.f32.mrb[87].mxu0 }
 0x1d3   :  { %v1559_v23 = vadd.f32 %v5926_v1, %v1205_v18 }
 0x1d4   :  { %v6028_v28 = vpack.c.bf16 %v1557_v13, %v1553_v58  ;;  %1501 = vmatmul.mubr.bf16.gmra.mrb[64].mxu0 %v5421_v62  ;;  %v5423_v58 = vld [vmem:[#allocation2 + $0x1b8] ss:$12 sps:$4 sm:$0xff]  }
 0x1d5   :  { %v6030_v33 = vpack.c.bf16 %v1559_v23, %v1555_v3  ;;  %1510 = vmatprep.mubr.bf16.mxu0 %v5733_v59  ;;  %v5424_v23 = vld [vmem:[#allocation2 + $0x1d0] ss:$12 sps:$4 sm:$0xff]  }
 0x1d7   :  { %7432 = vst [vmem:[#allocation8_spill] sm:$0xff] %v6030_v33  ;;  %v1209_v38 = vpop.f32.mrb[88].mxu0 }
 0x1d8   :  { %v1563_v61 = vadd.f32 %v5929_v2, %v1209_v38  ;;  %v1211_v43 = vpop.f32.mrb[89].mxu0 }
 0x1d9   :  { %v1565_v63 = vadd.f32 %v5931_v4, %v1211_v43  ;;  %v1213_v52 = vpop.f32.mrb[90].mxu0 }
 0x1da   :  { %v1567_v0 = vadd.f32 %v5933_v5, %v1213_v52  ;;  %v1215_v53 = vpop.f32.mrb[91].mxu0 }
 0x1db   :  { %v1569_v1 = vadd.f32 %v5935_v6, %v1215_v53 }
 0x1dc   :  { %v6037_v54 = vpack.c.bf16 %v1567_v0, %v1563_v61  ;;  %1511 = vmatmul.mubr.bf16.gmra.mrb[68].mxu0 %v5422_v48  ;;  %v5425_v0 = vld [vmem:[#allocation2 + $0x1e8] ss:$12 sps:$4 sm:$0xff]  }
 0x1dd   :  { %v6039_v55 = vpack.c.bf16 %v1569_v1, %v1565_v63  ;;  %1520 = vmatprep.mubr.bf16.mxu0 %v5733_v59 }
 0x1df   :  { %7433 = vst [vmem:[#allocation9_spill] sm:$0xff] %v6039_v55  ;;  %v1219_v56 = vpop.f32.mrb[92].mxu0 }
 0x1e0   :  { %v1573_v2 = vadd.f32 %v5938_v7, %v1219_v56  ;;  %v1221_v57 = vpop.f32.mrb[93].mxu0 }
 0x1e1   :  { %v1575_v4 = vadd.f32 %v5940_v9, %v1221_v57  ;;  %v1223_v60 = vpop.f32.mrb[94].mxu0 }
 0x1e2   :  { %v1577_v5 = vadd.f32 %v5942_v10, %v1223_v60  ;;  %v1225_v62 = vpop.f32.mrb[95].mxu0 }
 0x1e3   :  { %v1579_v6 = vadd.f32 %v5944_v11, %v1225_v62 }
 0x1e4   :  { %v6046_v3 = vpack.c.bf16 %v1577_v5, %v1573_v2  ;;  %1521 = vmatmul.mubr.bf16.gmra.mrb[72].mxu0 %v5423_v58 }
 0x1e5   :  { %v6048_v8 = vpack.c.bf16 %v1579_v6, %v1575_v4  ;;  %1530 = vmatprep.mubr.bf16.mxu0 %v5733_v59 }
 0x1e7   :  { %7434 = vst [vmem:[#allocation10_spill] sm:$0xff] %v6048_v8  ;;  %v1229_v13 = vpop.f32.mrb[96].mxu0 }
 0x1e8   :  { %v1583_v7 = vadd.f32 %v5947_v12, %v1229_v13  ;;  %v1231_v18 = vpop.f32.mrb[97].mxu0 }
 0x1e9   :  { %v1585_v9 = vadd.f32 %v5949_v14, %v1231_v18  ;;  %v1233_v38 = vpop.f32.mrb[98].mxu0 }
 0x1ea   :  { %v1587_v10 = vadd.f32 %v5951_v15, %v1233_v38  ;;  %v1235_v61 = vpop.f32.mrb[99].mxu0 }
 0x1eb   :  { %v1589_v11 = vadd.f32 %v5953_v16, %v1235_v61 }
 0x1ec   :  { %v6055_v43 = vpack.c.bf16 %v1587_v10, %v1583_v7  ;;  %1531 = vmatmul.mubr.bf16.gmra.mrb[76].mxu0 %v5424_v23 }
 0x1ed   :  { %v6057_v48 = vpack.c.bf16 %v1589_v11, %v1585_v9  ;;  %1540 = vmatprep.mubr.bf16.mxu0 %v5733_v59 }
 0x1ef   :  { %7435 = vst [vmem:[#allocation11_spill] sm:$0xff] %v6057_v48  ;;  %v1239_v63 = vpop.f32.mrb[100].mxu0 }
 0x1f0   :  { %v1593_v12 = vadd.f32 %v5956_v17, %v1239_v63  ;;  %v1241_v52 = vpop.f32.mrb[101].mxu0 }
 0x1f1   :  { %v1595_v14 = vadd.f32 %v5958_v19, %v1241_v52  ;;  %v1243_v53 = vpop.f32.mrb[102].mxu0 }
 0x1f2   :  { %v1597_v15 = vadd.f32 %v5960_v20, %v1243_v53  ;;  %v1245_v1 = vpop.f32.mrb[103].mxu0 }
 0x1f3   :  { %v1599_v16 = vadd.f32 %v5962_v21, %v1245_v1 }
 0x1f4   :  { %v6064_v56 = vpack.c.bf16 %v1597_v15, %v1593_v12  ;;  %1541 = vmatmul.mubr.bf16.gmra.mrb[80].mxu0 %v5425_v0 }
 0x1f5   :  { %v6066_v2 = vpack.c.bf16 %v1599_v16, %v1595_v14 }
 0x1f7   :  { %7436 = vst [vmem:[#allocation12_spill] sm:$0xff] %v6066_v2  ;;  %v1249_v57 = vpop.f32.mrb[104].mxu0 }
 0x1f8   :  { %v1603_v59 = vadd.f32 %v5965_v22, %v1249_v57  ;;  %v1251_v58 = vpop.f32.mrb[105].mxu0 }
 0x1f9   :  { %v1605_v17 = vadd.f32 %v5967_v24, %v1251_v58  ;;  %v1253_v4 = vpop.f32.mrb[106].mxu0 }
 0x1fa   :  { %v1607_v19 = vadd.f32 %v5969_v25, %v1253_v4  ;;  %v1255_v60 = vpop.f32.mrb[107].mxu0 }
 0x1fb   :  { %v1609_v20 = vadd.f32 %v5971_v26, %v1255_v60 }
 0x1fc   :  { %v6072_v5 = vpack.c.bf16 %v1607_v19, %v1603_v59 }
 0x1fd   :  { %v6074_v21 = vpack.c.bf16 %v1609_v20, %v1605_v17 }
 0x1ff   :  { %7437 = vst [vmem:[#allocation13_spill] sm:$0xff] %v6074_v21  ;;  %v1259_v62 = vpop.f32.mrb[108].mxu0 }
 0x200   :  { %v1613_v6 = vadd.f32 %v5974_v27, %v1259_v62  ;;  %v1261_v13 = vpop.f32.mrb[109].mxu0 }
 0x201   :  { %v1615_v7 = vadd.f32 %v5976_v29, %v1261_v13  ;;  %v1263_v22 = vpop.f32.mrb[110].mxu0 }
 0x202   :  { %v1617_v18 = vadd.f32 %v5978_v30, %v1263_v22  ;;  %v1265_v24 = vpop.f32.mrb[111].mxu0 }
 0x203   :  { %v1619_v23 = vadd.f32 %v5980_v31, %v1265_v24 }
 0x204   :  { %v6080_v25 = vpack.c.bf16 %v1617_v18, %v1613_v6 }
 0x205   :  { %v6082_v9 = vpack.c.bf16 %v1619_v23, %v1615_v7 }
 0x207   :  { %7438 = vst [vmem:[#allocation14_spill] sm:$0xff] %v6082_v9  ;;  %v1269_v26 = vpop.f32.mrb[112].mxu0 }
 0x208   :  { %v1623_v38 = vadd.f32 %v5983_v32, %v1269_v26  ;;  %v1271_v10 = vpop.f32.mrb[113].mxu0 }
 0x209   :  { %v1625_v61 = vadd.f32 %v5985_v34, %v1271_v10  ;;  %v1273_v27 = vpop.f32.mrb[114].mxu0 }
 0x20a   :  { %v1627_v11 = vadd.f32 %v5987_v35, %v1273_v27  ;;  %v1275_v29 = vpop.f32.mrb[115].mxu0 }
 0x20b   :  { %v1629_v63 = vadd.f32 %v5989_v36, %v1275_v29 }
 0x20c   :  { %v6088_v30 = vpack.c.bf16 %v1627_v11, %v1623_v38 }
 0x20d   :  { %v6090_v12 = vpack.c.bf16 %v1629_v63, %v1625_v61 }
 0x20f   :  { %7439 = vst [vmem:[#allocation15_spill] sm:$0xff] %v6090_v12  ;;  %v1279_v31 = vpop.f32.mrb[116].mxu0 }
 0x210   :  { %v1633_v52 = vadd.f32 %v5992_v37, %v1279_v31  ;;  %v1281_v0 = vpop.f32.mrb[117].mxu0 }
 0x211   :  { %v1635_v14 = vadd.f32 %v5994_v39, %v1281_v0  ;;  %v1283_v32 = vpop.f32.mrb[118].mxu0 }
 0x212   :  { %v1637_v53 = vadd.f32 %v5996_v40, %v1283_v32  ;;  %v1285_v34 = vpop.f32.mrb[119].mxu0 }
 0x213   :  { %v1639_v15 = vadd.f32 %v5998_v41, %v1285_v34 }
 0x214   :  { %v6096_v35 = vpack.c.bf16 %v1637_v53, %v1633_v52 }
 0x215   :  { %v6098_v1 = vpack.c.bf16 %v1639_v15, %v1635_v14 }
 0x217   :  { %7440 = vst [vmem:[#allocation16_spill] sm:$0xff] %v6098_v1  ;;  %v1289_v36 = vpop.f32.mrb[120].mxu0 }
 0x218   :  { %v1643_v16 = vadd.f32 %v6001_v42, %v1289_v36  ;;  %v1291_v57 = vpop.f32.mrb[121].mxu0 }
 0x219   :  { %v1645_v59 = vadd.f32 %v6003_v44, %v1291_v57  ;;  %v1293_v37 = vpop.f32.mrb[122].mxu0 }
 0x21a   :  { %v1647_v58 = vadd.f32 %v6005_v45, %v1293_v37  ;;  %v1295_v39 = vpop.f32.mrb[123].mxu0 }
 0x21b   :  { %v1649_v17 = vadd.f32 %v6007_v46, %v1295_v39 }
 0x21c   :  { %v6104_v40 = vpack.c.bf16 %v1647_v58, %v1643_v16 }
 0x21d   :  { %v6106_v4 = vpack.c.bf16 %v1649_v17, %v1645_v59 }
 0x21f   :  { %7441 = vst [vmem:[#allocation17_spill] sm:$0xff] %v6106_v4  ;;  %v1299_v41 = vpop.f32.mrb[124].mxu0 }
 0x220   :  { %v1653_v19 = vadd.f32 %v6010_v47, %v1299_v41  ;;  %v1301_v60 = vpop.f32.mrb[125].mxu0 }
 0x221   :  { %v1655_v20 = vadd.f32 %v6012_v49, %v1301_v60  ;;  %v1303_v42 = vpop.f32.mrb[126].mxu0 }
 0x222   :  { %v1657_v62 = vadd.f32 %v6014_v50, %v1303_v42  ;;  %v1305_v44 = vpop.f32.mrb[127].mxu0 }
 0x223   :  { %v1659_v6 = vadd.f32 %v6016_v51, %v1305_v44 }
 0x224   :  { %v6112_v45 = vpack.c.bf16 %v1657_v62, %v1653_v19 }
 0x225   :  { %v6114_v13 = vpack.c.bf16 %v1659_v6, %v1655_v20 }
 0x227   :  { %7442 = vst [vmem:[#allocation18_spill] sm:$0xff] %v6114_v13  ;;  %v1342_v46 = vpop.f32.mrb[0].mxu0 }
 0x228   :  { %v1344_v7 = vpop.f32.mrb[1].mxu0 }
 0x229   :  { %v1346_v22 = vpop.f32.mrb[2].mxu0 }
 0x22a   :  { %v1661_v18 = vpack.c.bf16 %v1346_v22, %v1342_v46  ;;  %v1348_v24 = vpop.f32.mrb[3].mxu0 }
 0x22b   :  { %v6116_v23 = vpack.c.bf16 %v1348_v24, %v1344_v7 }
 0x22c   :  { %1729 = vrot.lane.b32.xlu0 %v1661_v18, %s5734_s1  ;;  %5187 = vmatprep.subr.msk.bf16.mxu1 %vm1737_vm0, %v1661_v18  ;;  %v1751_v47 = vsel %vm1737_vm0, %v1661_v18, 0 }
 0x22d   :  { %4788 = vmatpush3.bf16.xpose.msra.mxu1 %v1751_v47 }
 0x22f   :  { %v1352_v49 = vpop.f32.mrb[4].mxu0 }
 0x230   :  { %v1354_v50 = vpop.f32.mrb[5].mxu0 }
 0x231   :  { %v1356_v51 = vpop.f32.mrb[6].mxu0 }
 0x232   :  { %v1662_v26 = vpack.c.bf16 %v1356_v51, %v1352_v49  ;;  %v1358_v38 = vpop.f32.mrb[7].mxu0 }
 0x233   :  { %v6121_v10 = vpack.c.bf16 %v1358_v38, %v1354_v50 }
 0x234   :  { %1731 = vrot.lane.b32.xlu0 %v1662_v26, %s5734_s1  ;;  %5188 = vmatprep.subr.msk.bf16.mxu1 %vm1737_vm0, %v1662_v26  ;;  %v1754_v61 = vsel %vm1737_vm0, %v1662_v26, 0 }
 0x235   :  { %4790 = vmatpush3.bf16.xpose.msra.mxu1 %v1754_v61 }
 0x237   :  { %v1362_v27 = vpop.f32.mrb[8].mxu0 }
 0x238   :  { %v1364_v11 = vpop.f32.mrb[9].mxu0 }
 0x239   :  { %v1366_v29 = vpop.f32.mrb[10].mxu0 }
 0x23a   :  { %v1663_v63 = vpack.c.bf16 %v1366_v29, %v1362_v27  ;;  %v1368_v31 = vpop.f32.mrb[11].mxu0 }
 0x23b   :  { %v6126_v52 = vpack.c.bf16 %v1368_v31, %v1364_v11 }
 0x23c   :  { %1733 = vrot.lane.b32.xlu1 %v1663_v63, %s5734_s1  ;;  %5189 = vmatprep.subr.msk.bf16.mxu1 %vm1737_vm0, %v1663_v63  ;;  %v1757_v0 = vsel %vm1737_vm0, %v1663_v63, 0 }
 0x23d   :  { %4792 = vmatpush3.bf16.xpose.msra.mxu1 %v1757_v0 }
 0x23f   :  { %v1372_v14 = vpop.f32.mrb[12].mxu0 }
 0x240   :  { %v1374_v32 = vpop.f32.mrb[13].mxu0 }
 0x241   :  { %v1376_v53 = vpop.f32.mrb[14].mxu0 }
 0x242   :  { %v1664_v34 = vpack.c.bf16 %v1376_v53, %v1372_v14  ;;  %v1378_v15 = vpop.f32.mrb[15].mxu0 }
 0x243   :  { %v6131_v36 = vpack.c.bf16 %v1378_v15, %v1374_v32 }
 0x244   :  { %1735 = vrot.lane.b32.xlu1 %v1664_v34, %s5734_s1  ;;  %5190 = vmatprep.subr.msk.bf16.mxu1 %vm1737_vm0, %v1664_v34  ;;  %v1760_v16 = vsel %vm1737_vm0, %v1664_v34, 0 }
 0x245   :  { %4794 = vmatpush3.bf16.xpose.msra.mxu1 %v1760_v16 }
 0x247   :  { %v1382_v57 = vpop.f32.mrb[16].mxu0 }
 0x248   :  { %v1384_v59 = vpop.f32.mrb[17].mxu0 }
 0x249   :  { %v1386_v37 = vpop.f32.mrb[18].mxu0 }
 0x24a   :  { %v6136_v58 = vpack.c.bf16 %v1386_v37, %v1382_v57  ;;  %v1388_v39 = vpop.f32.mrb[19].mxu0 }
 0x24b   :  { %v6138_v17 = vpack.c.bf16 %v1388_v39, %v1384_v59 }
 0x24c   :  { %1831 = vrot.lane.b32.xlu0 %v6136_v58, %s5734_s1  ;;  %5191 = vmatprep.subr.msk.bf16.mxu1 %vm1737_vm0, %v6136_v58 }
 0x24d   :  { %7443 = vst [vmem:[#allocation19_spill] sm:$0xff] %v6138_v17 }
 0x24f   :  { %v1392_v41 = vpop.f32.mrb[20].mxu0 }
 0x250   :  { %v1394_v19 = vpop.f32.mrb[21].mxu0 }
 0x251   :  { %v1396_v60 = vpop.f32.mrb[22].mxu0 }
 0x252   :  { %v6144_v20 = vpack.c.bf16 %v1396_v60, %v1392_v41  ;;  %v1398_v42 = vpop.f32.mrb[23].mxu0 }
 0x253   :  { %v6146_v62 = vpack.c.bf16 %v1398_v42, %v1394_v19 }
 0x254   :  { %1833 = vrot.lane.b32.xlu1 %v6144_v20, %s5734_s1 }
 0x255   :  { %7444 = vst [vmem:[#allocation20_spill] sm:$0xff] %v6146_v62 }
 0x257   :  { %v1402_v44 = vpop.f32.mrb[24].mxu0 }
 0x258   :  { %v1404_v6 = vpop.f32.mrb[25].mxu0 }
 0x259   :  { %v1406_v46 = vpop.f32.mrb[26].mxu0 }
 0x25a   :  { %v6150_v7 = vpack.c.bf16 %v1406_v46, %v1402_v44  ;;  %v1408_v22 = vpop.f32.mrb[27].mxu0 }
 0x25b   :  { %v6152_v18 = vpack.c.bf16 %v1408_v22, %v1404_v6 }
 0x25c   :  { %1835 = vrot.lane.b32.xlu0 %v6150_v7, %s5734_s1 }
 0x25d   :  { %7445 = vst [vmem:[#allocation21_spill] sm:$0xff] %v6152_v18 }
 0x25f   :  { %v1412_v24 = vpop.f32.mrb[28].mxu0 }
 0x260   :  { %v1414_v47 = vpop.f32.mrb[29].mxu0 }
 0x261   :  { %v1416_v49 = vpop.f32.mrb[30].mxu0 }
 0x262   :  { %v6156_v50 = vpack.c.bf16 %v1416_v49, %v1412_v24  ;;  %v1418_v51 = vpop.f32.mrb[31].mxu0 }
 0x263   :  { %v6158_v26 = vpack.c.bf16 %v1418_v51, %v1414_v47 }
 0x264   :  { %1837 = vrot.lane.b32.xlu1 %v6156_v50, %s5734_s1 }
 0x265   :  { %7446 = vst [vmem:[#allocation22_spill] sm:$0xff] %v6158_v26 }
 0x267   :  { %v1422_v38 = vpop.f32.mrb[32].mxu0 }
 0x268   :  { %v1424_v61 = vpop.f32.mrb[33].mxu0 }
 0x269   :  { %v1426_v27 = vpop.f32.mrb[34].mxu0 }
 0x26a   :  { %v6162_v11 = vpack.c.bf16 %v1426_v27, %v1422_v38  ;;  %v1428_v29 = vpop.f32.mrb[35].mxu0 }
 0x26b   :  { %v6164_v63 = vpack.c.bf16 %v1428_v29, %v1424_v61 }
 0x26c   :  { %1932 = vrot.lane.b32.xlu0 %v6162_v11, %s5734_s1 }
 0x26d   :  { %7447 = vst [vmem:[#allocation23_spill] sm:$0xff] %v6164_v63 }
 0x26f   :  { %v1432_v31 = vpop.f32.mrb[36].mxu0 }
 0x270   :  { %v1434_v0 = vpop.f32.mrb[37].mxu0 }
 0x271   :  { %v1436_v14 = vpop.f32.mrb[38].mxu0 }
 0x272   :  { %v6168_v32 = vpack.c.bf16 %v1436_v14, %v1432_v31  ;;  %v1438_v53 = vpop.f32.mrb[39].mxu0 }
 0x273   :  { %v6170_v34 = vpack.c.bf16 %v1438_v53, %v1434_v0 }
 0x274   :  { %1934 = vrot.lane.b32.xlu1 %v6168_v32, %s5734_s1 }
 0x275   :  { %7448 = vst [vmem:[#allocation24_spill] sm:$0xff] %v6170_v34 }
 0x277   :  { %v1442_v15 = vpop.f32.mrb[40].mxu0 }
 0x278   :  { %v1444_v16 = vpop.f32.mrb[41].mxu0 }
 0x279   :  { %v1446_v57 = vpop.f32.mrb[42].mxu0 }
 0x27a   :  { %v6174_v59 = vpack.c.bf16 %v1446_v57, %v1442_v15  ;;  %v1448_v37 = vpop.f32.mrb[43].mxu0 }
 0x27b   :  { %v6176_v39 = vpack.c.bf16 %v1448_v37, %v1444_v16 }
 0x27c   :  { %1936 = vrot.lane.b32.xlu0 %v6174_v59, %s5734_s1 }
 0x27d   :  { %7449 = vst [vmem:[#allocation25_spill] sm:$0xff] %v6176_v39 }
 0x27f   :  { %v1452_v41 = vpop.f32.mrb[44].mxu0 }
 0x280   :  { %v1454_v19 = vpop.f32.mrb[45].mxu0 }
 0x281   :  { %v1456_v60 = vpop.f32.mrb[46].mxu0 }
 0x282   :  { %v6180_v42 = vpack.c.bf16 %v1456_v60, %v1452_v41  ;;  %v1458_v44 = vpop.f32.mrb[47].mxu0 }
 0x283   :  { %v6182_v6 = vpack.c.bf16 %v1458_v44, %v1454_v19 }
 0x284   :  { %1938 = vrot.lane.b32.xlu1 %v6180_v42, %s5734_s1 }
 0x285   :  { %7450 = vst [vmem:[#allocation26_spill] sm:$0xff] %v6182_v6 }
 0x287   :  { %v1462_v46 = vpop.f32.mrb[48].mxu0 }
 0x288   :  { %v1464_v22 = vpop.f32.mrb[49].mxu0 }
 0x289   :  { %v1466_v24 = vpop.f32.mrb[50].mxu0 }
 0x28a   :  { %v6186_v47 = vpack.c.bf16 %v1466_v24, %v1462_v46  ;;  %v1468_v49 = vpop.f32.mrb[51].mxu0 }
 0x28b   :  { %v6188_v51 = vpack.c.bf16 %v1468_v49, %v1464_v22 }
 0x28c   :  { %2033 = vrot.lane.b32.xlu0 %v6186_v47, %s5734_s1 }
 0x28d   :  { %7451 = vst [vmem:[#allocation27_spill] sm:$0xff] %v6188_v51 }
 0x28f   :  { %v1472_v38 = vpop.f32.mrb[52].mxu0 }
 0x290   :  { %v1474_v61 = vpop.f32.mrb[53].mxu0 }
 0x291   :  { %v1476_v27 = vpop.f32.mrb[54].mxu0 }
 0x292   :  { %v6192_v29 = vpack.c.bf16 %v1476_v27, %v1472_v38  ;;  %v1478_v31 = vpop.f32.mrb[55].mxu0 }
 0x293   :  { %v6194_v0 = vpack.c.bf16 %v1478_v31, %v1474_v61  ;;  %v1852_v61 = vsel %vm1737_vm0, %v6136_v58, 0  ;;  %v1855_v58 = vsel %vm1737_vm0, %v6144_v20, 0 }
 0x294   :  { %2035 = vrot.lane.b32.xlu1 %v6192_v29, %s5734_s1 }
 0x295   :  { %7452 = vst [vmem:[#allocation28_spill] sm:$0xff] %v6194_v0 }
 0x297   :  { %v1482_v14 = vpop.f32.mrb[56].mxu0 }
 0x298   :  { %v1484_v53 = vpop.f32.mrb[57].mxu0 }
 0x299   :  { %v1486_v15 = vpop.f32.mrb[58].mxu0 }
 0x29a   :  { %v6198_v16 = vpack.c.bf16 %v1486_v15, %v1482_v14  ;;  %v1488_v57 = vpop.f32.mrb[59].mxu0 }
 0x29b   :  { %v6200_v37 = vpack.c.bf16 %v1488_v57, %v1484_v53 }
 0x29c   :  { %2037 = vrot.lane.b32.xlu0 %v6198_v16, %s5734_s1 }
 0x29d   :  { %7453 = vst [vmem:[#allocation29_spill] sm:$0xff] %v6200_v37 }
 0x29e   :  { %v1730_v41 = vpop.permute.xlu0 %1729 }
 0x29f   :  { %v1492_v19 = vpop.f32.mrb[60].mxu0  ;;  %4795 = vmatprep.mubr.msk.bf16.mxu1 %vm1737_vm0, %v1730_v41 }
 0x2a0   :  { %v1494_v60 = vpop.f32.mrb[61].mxu0 }
 0x2a1   :  { %v1496_v44 = vpop.f32.mrb[62].mxu0 }
 0x2a2   :  { %v6205_v46 = vpack.c.bf16 %v1496_v44, %v1492_v19  ;;  %v1498_v22 = vpop.f32.mrb[63].mxu0 }
 0x2a3   :  { %v6207_v24 = vpack.c.bf16 %v1498_v22, %v1494_v60 }
 0x2a4   :  { %2039 = vrot.lane.b32.xlu1 %v6205_v46, %s5734_s1 }
 0x2a5   :  { %7454 = vst [vmem:[#allocation30_spill] sm:$0xff] %v6207_v24 }
 0x2a6   :  { %v1732_v49 = vpop.permute.xlu0 %1731 }
 0x2a7   :  { %v1502_v38 = vpop.f32.mrb[64].mxu0  ;;  %4796 = vmatmul.mubr.msk.bf16.vlgmr.msra.gmra.mrb[44].mxu1 %vm1737_vm0, %v1732_v49 }
 0x2a8   :  { %4804 = vmatpush3.bf16.xpose.msra.mxu1 %v1852_v61  ;;  %v1504_v27 = vpop.f32.mrb[65].mxu0 }
 0x2a9   :  { %5192 = vmatprep.subr.msk.bf16.mxu1 %vm1737_vm0, %v6144_v20  ;;  %v1506_v31 = vpop.f32.mrb[66].mxu0  ;;  %v1858_v20 = vsel %vm1737_vm0, %v6150_v7, 0 }
 0x2aa   :  { %v6216_v14 = vpack.c.bf16 %v1506_v31, %v1502_v38  ;;  %v1508_v53 = vpop.f32.mrb[67].mxu0 }
 0x2ab   :  { %v6218_v15 = vpack.c.bf16 %v1508_v53, %v1504_v27 }
 0x2ac   :  { %2134 = vrot.lane.b32.xlu0 %v6216_v14, %s5734_s1 }
 0x2ad   :  { %7455 = vst [vmem:[#allocation31_spill] sm:$0xff] %v6218_v15 }
 0x2ae   :  { %v1734_v57 = vpop.permute.xlu1 %1733 }
 0x2af   :  { %v1512_v41 = vpop.f32.mrb[68].mxu0  ;;  %4799 = vmatprep.mubr.msk.bf16.mxu1 %vm1737_vm0, %v1734_v57 }
 0x2b0   :  { %4806 = vmatpush3.bf16.xpose.msra.mxu1 %v1855_v58  ;;  %v1514_v19 = vpop.f32.mrb[69].mxu0 }
 0x2b1   :  { %5193 = vmatprep.subr.msk.bf16.mxu1 %vm1737_vm0, %v6150_v7  ;;  %v1516_v60 = vpop.f32.mrb[70].mxu0 }
 0x2b2   :  { %v6227_v44 = vpack.c.bf16 %v1516_v60, %v1512_v41  ;;  %v1518_v22 = vpop.f32.mrb[71].mxu0  ;;  %v1861_v60 = vsel %vm1737_vm0, %v6156_v50, 0 }
 0x2b3   :  { %v6229_v49 = vpack.c.bf16 %v1518_v22, %v1514_v19 }
 0x2b4   :  { %2136 = vrot.lane.b32.xlu1 %v6227_v44, %s5734_s1 }
 0x2b5   :  { %7456 = vst [vmem:[#allocation32_spill] sm:$0xff] %v6229_v49 }
 0x2b6   :  { %v1736_v38 = vpop.permute.xlu1 %1735 }
 0x2b7   :  { %v1522_v61 = vpop.f32.mrb[72].mxu0  ;;  %4800 = vmatmul.mubr.msk.bf16.gmra.mrb[48].mxu1 %vm1737_vm0, %v1736_v38 }
 0x2b8   :  { %4808 = vmatpush3.bf16.xpose.msra.mxu1 %v1858_v20  ;;  %v1524_v27 = vpop.f32.mrb[73].mxu0 }
 0x2b9   :  { %5194 = vmatprep.subr.msk.bf16.mxu1 %vm1737_vm0, %v6156_v50  ;;  %v1526_v31 = vpop.f32.mrb[74].mxu0  ;;  %v1953_v50 = vsel %vm1737_vm0, %v6162_v11, 0 }
 0x2ba   :  { %v6238_v53 = vpack.c.bf16 %v1526_v31, %v1522_v61  ;;  %v1528_v57 = vpop.f32.mrb[75].mxu0 }
 0x2bb   :  { %v6240_v41 = vpack.c.bf16 %v1528_v57, %v1524_v27 }
 0x2bc   :  { %2138 = vrot.lane.b32.xlu0 %v6238_v53, %s5734_s1 }
 0x2bd   :  { %7457 = vst [vmem:[#allocation33_spill] sm:$0xff] %v6240_v41 }
 0x2be   :  { %v1832_v58 = vpop.permute.xlu0 %1831 }
 0x2bf   :  { %v1532_v19 = vpop.f32.mrb[76].mxu0  ;;  %4811 = vmatprep.mubr.msk.bf16.mxu1 %vm1737_vm0, %v1832_v58 }
 0x2c0   :  { %4810 = vmatpush3.bf16.xpose.msra.mxu1 %v1861_v60  ;;  %v1534_v7 = vpop.f32.mrb[77].mxu0 }
 0x2c1   :  { %5195 = vmatprep.subr.msk.bf16.mxu1 %vm1737_vm0, %v6162_v11  ;;  %v1536_v22 = vpop.f32.mrb[78].mxu0 }
 0x2c2   :  { %v6249_v38 = vpack.c.bf16 %v1536_v22, %v1532_v19  ;;  %v1538_v61 = vpop.f32.mrb[79].mxu0  ;;  %v1956_v22 = vsel %vm1737_vm0, %v6168_v32, 0 }
 0x2c3   :  { %v6251_v20 = vpack.c.bf16 %v1538_v61, %v1534_v7 }
 0x2c4   :  { %2140 = vrot.lane.b32.xlu1 %v6249_v38, %s5734_s1 }
 0x2c5   :  { %7458 = vst [vmem:[#allocation34_spill] sm:$0xff] %v6251_v20 }
 0x2c6   :  { %v1834_v27 = vpop.permute.xlu1 %1833 }
 0x2c7   :  { %v1542_v31 = vpop.f32.mrb[80].mxu0  ;;  %4812 = vmatmul.mubr.msk.bf16.vlgmr.msra.gmra.mrb[52].mxu1 %vm1737_vm0, %v1834_v27 }
 0x2c8   :  { %4820 = vmatpush3.bf16.xpose.msra.mxu1 %v1953_v50  ;;  %2237 = vrot.lane.b32.xlu1 %v6028_v28, %s5734_s1  ;;  %v1544_v57 = vpop.f32.mrb[81].mxu0  ;;  %v2054_v50 = vsel %vm1737_vm0, %v6186_v47, 0 }
 0x2c9   :  { %5196 = vmatprep.subr.msk.bf16.mxu1 %vm1737_vm0, %v6168_v32  ;;  %v1546_v58 = vpop.f32.mrb[82].mxu0  ;;  %v1959_v32 = vsel %vm1737_vm0, %v6174_v59, 0 }
 0x2ca   :  { %v6262_v19 = vpack.c.bf16 %v1546_v58, %v1542_v31  ;;  %v1548_v60 = vpop.f32.mrb[83].mxu0 }
 0x2cb   :  { %v6264_v7 = vpack.c.bf16 %v1548_v60, %v1544_v57  ;;  %v2057_v57 = vsel %vm1737_vm0, %v6192_v29, 0 }
 0x2cc   :  { %2241 = vrot.lane.b32.xlu1 %v6046_v3, %s5734_s1  ;;  %2235 = vrot.lane.b32.xlu0 %v6262_v19, %s5734_s1 }
 0x2cd   :  { %7459 = vst [vmem:[#allocation35_spill] sm:$0xff] %v6264_v7 }
 0x2ce   :  { %v1836_v11 = vpop.permute.xlu0 %1835 }
 0x2cf   :  { %4815 = vmatprep.mubr.msk.bf16.mxu1 %vm1737_vm0, %v1836_v11  ;;  %v2063_v11 = vsel %vm1737_vm0, %v6205_v46, 0 }
 0x2d0   :  { %4822 = vmatpush3.bf16.xpose.msra.mxu1 %v1956_v22  ;;  %2338 = vrot.lane.b32.xlu1 %v6064_v56, %s5734_s1 }
 0x2d1   :  { %5197 = vmatprep.subr.msk.bf16.mxu1 %vm1737_vm0, %v6174_v59  ;;  %2239 = vrot.lane.b32.xlu0 %v6037_v54, %s5734_s1  ;;  %v1962_v59 = vsel %vm1737_vm0, %v6180_v42, 0 }
 0x2d4   :  { %2342 = vrot.lane.b32.xlu1 %v6080_v25, %s5734_s1 }
 0x2d5   :  { %2336 = vrot.lane.b32.xlu0 %v6055_v43, %s5734_s1 }
 0x2d6   :  { %v1838_v61 = vpop.permute.xlu1 %1837 }
 0x2d7   :  { %4816 = vmatmul.mubr.msk.bf16.gmra.mrb[56].mxu1 %vm1737_vm0, %v1838_v61 }
 0x2d8   :  { %4824 = vmatpush3.bf16.xpose.msra.mxu1 %v1959_v32  ;;  %2439 = vrot.lane.b32.xlu1 %v6096_v35, %s5734_s1 }
 0x2d9   :  { %5198 = vmatprep.subr.msk.bf16.mxu1 %vm1737_vm0, %v6180_v42  ;;  %2340 = vrot.lane.b32.xlu0 %v6072_v5, %s5734_s1 }
 0x2dc   :  { %2443 = vrot.lane.b32.xlu1 %v6112_v45, %s5734_s1 }
 0x2dd   :  { %2437 = vrot.lane.b32.xlu0 %v6088_v30, %s5734_s1 }
 0x2de   :  { %v1933_v27 = vpop.permute.xlu0 %1932 }
 0x2df   :  { %4827 = vmatprep.mubr.msk.bf16.mxu1 %vm1737_vm0, %v1933_v27  ;;  %v2164_v27 = vsel %vm1737_vm0, %v6249_v38, 0 }
 0x2e0   :  { %4826 = vmatpush3.bf16.xpose.msra.mxu1 %v1962_v59 }
 0x2e1   :  { %5199 = vmatprep.subr.msk.bf16.mxu1 %vm1737_vm0, %v6186_v47  ;;  %2441 = vrot.lane.b32.xlu0 %v6104_v40, %s5734_s1  ;;  %v2060_v47 = vsel %vm1737_vm0, %v6198_v16, 0 }
 0x2e6   :  { %v1935_v31 = vpop.permute.xlu1 %1934 }
 0x2e7   :  { %4828 = vmatmul.mubr.msk.bf16.vlgmr.msra.gmra.mrb[60].mxu1 %vm1737_vm0, %v1935_v31 }
 0x2e8   :  { %4836 = vmatpush3.bf16.xpose.msra.mxu1 %v2054_v50 }
 0x2e9   :  { %5200 = vmatprep.subr.msk.bf16.mxu1 %vm1737_vm0, %v6192_v29 }
 0x2ee   :  { %v1937_v42 = vpop.permute.xlu0 %1936 }
 0x2ef   :  { %4831 = vmatprep.mubr.msk.bf16.mxu1 %vm1737_vm0, %v1937_v42  ;;  %v2265_v42 = vsel %vm1737_vm0, %v6046_v3, 0 }
 0x2f0   :  { %4838 = vmatpush3.bf16.xpose.msra.mxu1 %v2057_v57 }
 0x2f1   :  { %5201 = vmatprep.subr.msk.bf16.mxu1 %vm1737_vm0, %v6198_v16  ;;  %v2155_v16 = vsel %vm1737_vm0, %v6216_v14, 0 }
 0x2f6   :  { %v1939_v58 = vpop.permute.xlu1 %1938 }
 0x2f7   :  { %4832 = vmatmul.mubr.msk.bf16.gmra.mrb[64].mxu1 %vm1737_vm0, %v1939_v58 }
 0x2f8   :  { %4840 = vmatpush3.bf16.xpose.msra.mxu1 %v2060_v47  ;;  %v2360_v47 = vsel %vm1737_vm0, %v6064_v56, 0 }
 0x2f9   :  { %5202 = vmatprep.subr.msk.bf16.mxu1 %vm1737_vm0, %v6205_v46  ;;  %v2158_v46 = vsel %vm1737_vm0, %v6227_v44, 0 }
 0x2fe   :  { %v2034_v60 = vpop.permute.xlu0 %2033 }
 0x2ff   :  { %4843 = vmatprep.mubr.msk.bf16.mxu1 %vm1737_vm0, %v2034_v60  ;;  %v2366_v60 = vsel %vm1737_vm0, %v6080_v25, 0 }
 0x300   :  { %4842 = vmatpush3.bf16.xpose.msra.mxu1 %v2063_v11 }
 0x301   :  { %5203 = vmatprep.subr.msk.bf16.mxu1 %vm1737_vm0, %v6216_v14  ;;  %v2161_v14 = vsel %vm1737_vm0, %v6238_v53, 0 }
 0x306   :  { %v2036_v29 = vpop.permute.xlu1 %2035 }
 0x307   :  { %4844 = vmatmul.mubr.msk.bf16.vlgmr.msra.gmra.mrb[68].mxu1 %vm1737_vm0, %v2036_v29  ;;  %v2458_v29 = vsel %vm1737_vm0, %v6088_v30, 0 }
 0x308   :  { %4852 = vmatpush3.bf16.xpose.msra.mxu1 %v2155_v16 }
 0x309   :  { %5204 = vmatprep.subr.msk.bf16.mxu1 %vm1737_vm0, %v6227_v44 }
 0x30e   :  { %v2038_v22 = vpop.permute.xlu0 %2037 }
 0x30f   :  { %4847 = vmatprep.mubr.msk.bf16.mxu1 %vm1737_vm0, %v2038_v22  ;;  %v2461_v22 = vsel %vm1737_vm0, %v6096_v35, 0 }
 0x310   :  { %4854 = vmatpush3.bf16.xpose.msra.mxu1 %v2158_v46 }
 0x311   :  { %5205 = vmatprep.subr.msk.bf16.mxu1 %vm1737_vm0, %v6238_v53  ;;  %v2256_v53 = vsel %vm1737_vm0, %v6262_v19, 0 }
 0x316   :  { %v2040_v61 = vpop.permute.xlu1 %2039 }
 0x317   :  { %4848 = vmatmul.mubr.msk.bf16.gmra.mrb[72].mxu1 %vm1737_vm0, %v2040_v61 }
 0x318   :  { %4856 = vmatpush3.bf16.xpose.msra.mxu1 %v2161_v14  ;;  %v2464_v14 = vsel %vm1737_vm0, %v6104_v40, 0 }
 0x319   :  { %5206 = vmatprep.subr.msk.bf16.mxu1 %vm1737_vm0, %v6249_v38  ;;  %v2259_v38 = vsel %vm1737_vm0, %v6028_v28, 0 }
 0x31e   :  { %v2135_v32 = vpop.permute.xlu0 %2134 }
 0x31f   :  { %4859 = vmatprep.mubr.msk.bf16.mxu1 %vm1737_vm0, %v2135_v32 }
 0x320   :  { %4858 = vmatpush3.bf16.xpose.msra.mxu1 %v2164_v27 }
 0x321   :  { %5207 = vmatprep.subr.msk.bf16.mxu1 %vm1737_vm0, %v6262_v19  ;;  %v2262_v19 = vsel %vm1737_vm0, %v6037_v54, 0 }
 0x326   :  { %v2137_v44 = vpop.permute.xlu1 %2136 }
 0x327   :  { %4860 = vmatmul.mubr.msk.bf16.vlgmr.msra.gmra.mrb[76].mxu1 %vm1737_vm0, %v2137_v44 }
 0x328   :  { %4868 = vmatpush3.bf16.xpose.msra.mxu1 %v2256_v53 }
 0x329   :  { %5208 = vmatprep.subr.msk.bf16.mxu1 %vm1737_vm0, %v6028_v28 }
 0x32e   :  { %v2139_v59 = vpop.permute.xlu0 %2138 }
 0x32f   :  { %4863 = vmatprep.mubr.msk.bf16.mxu1 %vm1737_vm0, %v2139_v59 }
 0x330   :  { %4870 = vmatpush3.bf16.xpose.msra.mxu1 %v2259_v38 }
 0x331   :  { %5209 = vmatprep.subr.msk.bf16.mxu1 %vm1737_vm0, %v6037_v54  ;;  %v2357_v54 = vsel %vm1737_vm0, %v6055_v43, 0 }
 0x336   :  { %v2141_v31 = vpop.permute.xlu1 %2140 }
 0x337   :  { %4864 = vmatmul.mubr.msk.bf16.gmra.mrb[80].mxu1 %vm1737_vm0, %v2141_v31 }
 0x338   :  { %4872 = vmatpush3.bf16.xpose.msra.mxu1 %v2262_v19 }
 0x339   :  { %5210 = vmatprep.subr.msk.bf16.mxu1 %vm1737_vm0, %v6046_v3 }
 0x33a   :  { %v2238_v28 = vpop.permute.xlu1 %2237 }
 0x33e   :  { %v2236_v50 = vpop.permute.xlu0 %2235  ;;  %v2242_v3 = vpop.permute.xlu1 %2241 }
 0x33f   :  { %4875 = vmatprep.mubr.msk.bf16.mxu1 %vm1737_vm0, %v2236_v50 }
 0x340   :  { %4874 = vmatpush3.bf16.xpose.msra.mxu1 %v2265_v42 }
 0x341   :  { %5211 = vmatprep.subr.msk.bf16.mxu1 %vm1737_vm0, %v6055_v43  ;;  %v2363_v43 = vsel %vm1737_vm0, %v6072_v5, 0 }
 0x343   :  { %v2240_v57 = vpop.permute.xlu0 %2239 }
 0x347   :  { %4876 = vmatmul.mubr.msk.bf16.vlgmr.msra.gmra.mrb[84].mxu1 %vm1737_vm0, %v2238_v28  ;;  %v2337_v58 = vpop.permute.xlu0 %2336 }
 0x348   :  { %4879 = vmatprep.mubr.msk.bf16.mxu1 %vm1737_vm0, %v2240_v57  ;;  %4884 = vmatpush3.bf16.xpose.msra.mxu1 %v2357_v54  ;;  %v2467_v54 = vsel %vm1737_vm0, %v6112_v45, 0 }
 0x349   :  { %5212 = vmatprep.subr.msk.bf16.mxu1 %vm1737_vm0, %v6064_v56  ;;  %v2339_v56 = vpop.permute.xlu1 %2338 }
 0x34b   :  { %v2341_v11 = vpop.permute.xlu0 %2340 }
 0x34d   :  { %v2343_v16 = vpop.permute.xlu1 %2342 }
 0x34f   :  { %4880 = vmatmul.mubr.msk.bf16.gmra.mrb[88].mxu1 %vm1737_vm0, %v2242_v3 }
 0x350   :  { %4886 = vmatpush3.bf16.xpose.msra.mxu1 %v2360_v47  ;;  %4891 = vmatprep.mubr.msk.bf16.mxu1 %vm1737_vm0, %v2337_v58 }
 0x351   :  { %5213 = vmatprep.subr.msk.bf16.mxu1 %vm1737_vm0, %v6072_v5  ;;  %v2534_v5 = vlaneseq }
 0x353   :  { %v2535_v46 = vshrl.u32 %v2534_v5, 7  ;;  %v2544_v61 = vand.u32 127, %v2534_v5 }
 0x355   :  { %v2536_v32 = vadd.s32 8, %v2535_v46  ;;  %vm6403_vm2 = vcmp.ge.s32.totalorder %v2535_v46, %v2544_v61  ;;  %v2538_v53 = vadd.s32 24, %v2535_v46 }
 0x357   :  { %vm6411_vm3 = vcmp.ge.s32.totalorder %v2536_v32, %v2544_v61  ;;  %vm6421_vm4 = vcmp.ge.s32.totalorder %v2538_v53, %v2544_v61 }
 0x358   :  { %4888 = vmatpush3.bf16.xpose.msra.mxu1 %v2363_v43 }
 0x359   :  { %5214 = vmatprep.subr.msk.bf16.mxu1 %vm1737_vm0, %v6080_v25  ;;  %v2438_v25 = vpop.permute.xlu0 %2437 }
 0x360   :  { %4890 = vmatpush3.bf16.xpose.msra.mxu1 %v2366_v60  ;;  %v2541_v60 = vadd.s32 48, %v2535_v46 }
 0x361   :  { %5215 = vmatprep.subr.msk.bf16.mxu1 %vm1737_vm0, %v6088_v30  ;;  %v2537_v30 = vadd.s32 16, %v2535_v46 }
 0x362   :  { %vm6445_vm5 = vcmp.ge.s32.totalorder %v2541_v60, %v2544_v61 }
 0x363   :  { %vm6397_vm1 = vcmp.ge.s32.totalorder %v2537_v30, %v2544_v61 }
 0x367   :  { %4892 = vmatmul.mubr.msk.bf16.vlgmr.msra.gmra.mrb[92].mxu1 %vm1737_vm0, %v2339_v56  ;;  %v2539_v56 = vadd.s32 32, %v2535_v46 }
 0x368   :  { %4895 = vmatprep.mubr.msk.bf16.mxu1 %vm1737_vm0, %v2341_v11  ;;  %4900 = vmatpush3.bf16.xpose.msra.mxu1 %v2458_v29  ;;  %v2542_v11 = vadd.s32 56, %v2535_v46  ;;  %v2442_v29 = vpop.permute.xlu0 %2441 }
 0x369   :  { %5216 = vmatprep.subr.msk.bf16.mxu1 %vm1737_vm0, %v6096_v35  ;;  %vm6450_vm6 = vcmp.ge.s32.totalorder %v2539_v56, %v2544_v61 }
 0x36a   :  { %vm6454_vm7 = vcmp.ge.s32.totalorder %v2542_v11, %v2544_v61 }
 0x36f   :  { %4896 = vmatmul.mubr.msk.bf16.gmra.mrb[96].mxu1 %vm1737_vm0, %v2343_v16  ;;  %v2540_v16 = vadd.s32 40, %v2535_v46 }
 0x370   :  { %4902 = vmatpush3.bf16.xpose.msra.mxu1 %v2461_v22  ;;  %4907 = vmatprep.mubr.msk.bf16.mxu1 %vm1737_vm0, %v2438_v25 }
 0x371   :  { %5217 = vmatprep.subr.msk.bf16.mxu1 %vm1737_vm0, %v6104_v40  ;;  %vm6463_vm8 = vcmp.ge.s32.totalorder %v2540_v16, %v2544_v61 }
 0x378   :  { %4904 = vmatpush3.bf16.xpose.msra.mxu1 %v2464_v14 }
 0x379   :  { %5218 = vmatprep.subr.msk.bf16.mxu1 %vm1737_vm0, %v6112_v45  ;;  %v2440_v45 = vpop.permute.xlu1 %2439 }
 0x37a   :  { %v4797_v35 = vpop.f32.mrb[44].mxu1 }
 0x37b   :  { %v6409_v59 = vsel %vm6397_vm1, %v4797_v35, -inf  ;;  %v1796_v40 = vpop.f32.mrb[45].mxu1 }
 0x37c   :  { %v4798_v31 = vpop.f32.mrb[46].mxu1  ;;  %v2639_v19 = vsel %vm1737_vm0, %v6409_v59, -inf  ;;  %v6419_v50 = vsel %vm6403_vm2, %v1796_v40, -inf }
 0x37d   :  { %v1799_v42 = vpop.f32.mrb[47].mxu1  ;;  %2640 = vmax.xlane.f32.xlu0 %v2639_v19  ;;  %v2633_v58 = vsel %vm1737_vm0, %v6419_v50, -inf  ;;  %v6437_v47 = vsel %vm6421_vm4, %v4798_v31, -inf }
 0x37e   :  { %v6427_v57 = vsel %vm6411_vm3, %v1799_v42, -inf  ;;  %v2642_v43 = vsel %vm1737_vm0, %v6437_v47, -inf }
 0x37f   :  { %v2636_v3 = vsel %vm1737_vm0, %v6427_v57, -inf }
 0x380   :  { %4906 = vmatpush3.bf16.xpose.msra.mxu1 %v2467_v54  ;;  %2637 = vmax.xlane.f32.xlu1 %v2636_v3 }
 0x381   :  { %4915 = vmatprep.subr.bf16.mxu1 %v6116_v23  ;;  %2634 = vmax.xlane.f32.xlu0 %v2633_v58 }
 0x385   :  { %2643 = vmax.xlane.f32.xlu0 %v2642_v43 }
 0x387   :  { %4908 = vmatmul.mubr.msk.bf16.vlgmr.msra.gmra.mrb[100].mxu1 %vm1737_vm0, %v2440_v45 }
 0x388   :  { %4911 = vmatprep.mubr.msk.bf16.mxu1 %vm1737_vm0, %v2442_v29  ;;  %4916 = vmatpush3.bf16.msra.mxu1 %v6116_v23 }
 0x389   :  { %4917 = vmatprep.subr.bf16.mxu1 %v6121_v10 }
 0x38a   :  { %v4801_v25 = vpop.f32.mrb[48].mxu1 }
 0x38b   :  { %v6460_v14 = vsel %vm6445_vm5, %v4801_v25, -inf  ;;  %v1812_v23 = vpop.f32.mrb[49].mxu1 }
 0x38c   :  { %4918 = vmatpush3.bf16.msra.mxu1 %v6121_v10  ;;  %v4802_v32 = vpop.f32.mrb[50].mxu1  ;;  %v2651_v35 = vsel %vm1737_vm0, %v6460_v14, -inf  ;;  %v6471_v53 = vsel %vm6450_vm6, %v1812_v23, -inf  ;;  %v2444_v10 = vpop.permute.xlu1 %2443 }
 0x38d   :  { %v6475_v40 = vsel %vm6454_vm7, %v4802_v32, -inf  ;;  %4919 = vmatprep.subr.bf16.mxu1 %v6126_v52  ;;  %v1815_v31 = vpop.f32.mrb[51].mxu1  ;;  %2652 = vmax.xlane.f32.xlu1 %v2651_v35  ;;  %v2645_v42 = vsel %vm1737_vm0, %v6471_v53, -inf }
 0x38e   :  { %v2654_v61 = vsel %vm1737_vm0, %v6475_v40, -inf  ;;  %v6482_v19 = vsel %vm6463_vm8, %v1815_v31, -inf }
 0x38f   :  { %4912 = vmatmul.mubr.msk.bf16.gmra.mrb[104].mxu1 %vm1737_vm0, %v2444_v10  ;;  %2655 = vmax.xlane.f32.xlu0 %v2654_v61  ;;  %v2648_v54 = vsel %vm1737_vm0, %v6482_v19, -inf }
 0x390   :  { %4920 = vmatpush3.bf16.msra.mxu1 %v6126_v52 }
 0x391   :  { %4921 = vmatprep.subr.bf16.mxu1 %v6131_v36  ;;  %2646 = vmax.xlane.f32.xlu1 %v2645_v42 }
 0x393   :  { %2649 = vmax.xlane.f32.xlu0 %v2648_v54 }
 0x394   :  { %4922 = vmatpush3.bf16.msra.mxu1 %v6131_v36 }
 0x395   :  { %4931 = vmatprep.subr.bf16.mxu1 %v6138_v17 }
 0x39a   :  { %v4813_v3 = vpop.f32.mrb[52].mxu1 }
 0x39b   :  { %v6495_v58 = vsel %vm6397_vm1, %v4813_v3, -inf  ;;  %v1897_v52 = vpop.f32.mrb[53].mxu1 }
 0x39c   :  { %v4814_v43 = vpop.f32.mrb[54].mxu1  ;;  %v2663_v60 = vsel %vm1737_vm0, %v6495_v58, -inf  ;;  %v6501_v45 = vsel %vm6403_vm2, %v1897_v52, -inf }
 0x39d   :  { %v6505_v56 = vsel %vm6421_vm4, %v4814_v43, -inf  ;;  %v1900_v36 = vpop.f32.mrb[55].mxu1  ;;  %2664 = vmax.xlane.f32.xlu1 %v2663_v60  ;;  %v2657_v16 = vsel %vm1737_vm0, %v6501_v45, -inf }
 0x39e   :  { %v2666_v11 = vsel %vm1737_vm0, %v6505_v56, -inf  ;;  %v6511_v29 = vsel %vm6411_vm3, %v1900_v36, -inf }
 0x39f   :  { %2667 = vmax.xlane.f32.xlu0 %v2666_v11  ;;  %v2660_v25 = vsel %vm1737_vm0, %v6511_v29, -inf }
 0x3a1   :  { %2658 = vmax.xlane.f32.xlu1 %v2657_v16 }
 0x3a3   :  { %2661 = vmax.xlane.f32.xlu0 %v2660_v25 }
 0x3aa   :  { %v4817_v23 = vpop.f32.mrb[56].mxu1 }
 0x3ab   :  { %v6519_v32 = vsel %vm6445_vm5, %v4817_v23, -inf  ;;  %v1913_v35 = vpop.f32.mrb[57].mxu1 }
 0x3ac   :  { %v4818_v31 = vpop.f32.mrb[58].mxu1  ;;  %v2675_v10 = vsel %vm1737_vm0, %v6519_v32, -inf  ;;  %v6525_v61 = vsel %vm6450_vm6, %v1913_v35, -inf }
 0x3ad   :  { %v6529_v42 = vsel %vm6454_vm7, %v4818_v31, -inf  ;;  %v1916_v54 = vpop.f32.mrb[59].mxu1  ;;  %2676 = vmax.xlane.f32.xlu1 %v2675_v10  ;;  %v2669_v43 = vsel %vm1737_vm0, %v6525_v61, -inf }
 0x3ae   :  { %v2678_v3 = vsel %vm1737_vm0, %v6529_v42, -inf  ;;  %v6535_v52 = vsel %vm6463_vm8, %v1916_v54, -inf }
 0x3af   :  { %2679 = vmax.xlane.f32.xlu0 %v2678_v3  ;;  %v2672_v60 = vsel %vm1737_vm0, %v6535_v52, -inf }
 0x3b1   :  { %2670 = vmax.xlane.f32.xlu1 %v2669_v43 }
 0x3b3   :  { %2673 = vmax.xlane.f32.xlu0 %v2672_v60 }
 0x3ba   :  { %v4829_v36 = vpop.f32.mrb[60].mxu1 }
 0x3bb   :  { %v6543_v11 = vsel %vm6397_vm1, %v4829_v36, -inf  ;;  %v1998_v16 = vpop.f32.mrb[61].mxu1 }
 0x3bc   :  { %v4830_v25 = vpop.f32.mrb[62].mxu1  ;;  %v2687_v23 = vsel %vm1737_vm0, %v6543_v11, -inf  ;;  %v6549_v35 = vsel %vm6403_vm2, %v1998_v16, -inf }
 0x3bd   :  { %v6553_v31 = vsel %vm6421_vm4, %v4830_v25, -inf  ;;  %v2001_v10 = vpop.f32.mrb[63].mxu1  ;;  %2688 = vmax.xlane.f32.xlu1 %v2687_v23  ;;  %v2681_v43 = vsel %vm1737_vm0, %v6549_v35, -inf }
 0x3be   :  { %v2690_v54 = vsel %vm1737_vm0, %v6553_v31, -inf  ;;  %v6559_v3 = vsel %vm6411_vm3, %v2001_v10, -inf }
 0x3bf   :  { %2691 = vmax.xlane.f32.xlu0 %v2690_v54  ;;  %v2684_v60 = vsel %vm1737_vm0, %v6559_v3, -inf }
 0x3c1   :  { %2682 = vmax.xlane.f32.xlu1 %v2681_v43 }
 0x3c3   :  { %2685 = vmax.xlane.f32.xlu0 %v2684_v60 }
 0x3ca   :  { %v4833_v36 = vpop.f32.mrb[64].mxu1 }
 0x3cb   :  { %v6567_v16 = vsel %vm6445_vm5, %v4833_v36, -inf  ;;  %v2014_v25 = vpop.f32.mrb[65].mxu1 }
 0x3cc   :  { %v4834_v23 = vpop.f32.mrb[66].mxu1  ;;  %v2699_v10 = vsel %vm1737_vm0, %v6567_v16, -inf  ;;  %v6573_v54 = vsel %vm6450_vm6, %v2014_v25, -inf }
 0x3cd   :  { %v6577_v43 = vsel %vm6454_vm7, %v4834_v23, -inf  ;;  %v2017_v13 = vpop.f32.mrb[67].mxu1  ;;  %2700 = vmax.xlane.f32.xlu1 %v2699_v10  ;;  %v2693_v4 = vsel %vm1737_vm0, %v6573_v54, -inf }
 0x3ce   :  { %v2702_v60 = vsel %vm1737_vm0, %v6577_v43, -inf  ;;  %v6583_v36 = vsel %vm6463_vm8, %v2017_v13, -inf }
 0x3cf   :  { %2703 = vmax.xlane.f32.xlu0 %v2702_v60  ;;  %v2696_v25 = vsel %vm1737_vm0, %v6583_v36, -inf }
 0x3d1   :  { %2694 = vmax.xlane.f32.xlu1 %v2693_v4 }
 0x3d3   :  { %2697 = vmax.xlane.f32.xlu0 %v2696_v25 }
 0x3da   :  { %v4845_v23 = vpop.f32.mrb[68].mxu1 }
 0x3db   :  { %v6591_v10 = vsel %vm6397_vm1, %v4845_v23, -inf  ;;  %v2099_v1 = vpop.f32.mrb[69].mxu1 }
 0x3dc   :  { %v4846_v12 = vpop.f32.mrb[70].mxu1  ;;  %v2711_v13 = vsel %vm1737_vm0, %v6591_v10, -inf  ;;  %v6597_v60 = vsel %vm6403_vm2, %v2099_v1, -inf }
 0x3dd   :  { %v6601_v4 = vsel %vm6421_vm4, %v4846_v12, -inf  ;;  %v2102_v9 = vpop.f32.mrb[71].mxu1  ;;  %2712 = vmax.xlane.f32.xlu1 %v2711_v13  ;;  %v2705_v21 = vsel %vm1737_vm0, %v6597_v60, -inf }
 0x3de   :  { %v2714_v25 = vsel %vm1737_vm0, %v6601_v4, -inf  ;;  %v6607_v23 = vsel %vm6411_vm3, %v2102_v9, -inf }
 0x3df   :  { %2715 = vmax.xlane.f32.xlu0 %v2714_v25  ;;  %v2708_v1 = vsel %vm1737_vm0, %v6607_v23, -inf }
 0x3e1   :  { %2706 = vmax.xlane.f32.xlu1 %v2705_v21 }
 0x3e3   :  { %2709 = vmax.xlane.f32.xlu0 %v2708_v1 }
 0x3ea   :  { %v4849_v12 = vpop.f32.mrb[72].mxu1 }
 0x3eb   :  { %v6615_v13 = vsel %vm6445_vm5, %v4849_v12, -inf  ;;  %v2115_v2 = vpop.f32.mrb[73].mxu1 }
 0x3ec   :  { %v4850_v48 = vpop.f32.mrb[74].mxu1  ;;  %v2723_v9 = vsel %vm1737_vm0, %v6615_v13, -inf  ;;  %v6621_v25 = vsel %vm6450_vm6, %v2115_v2, -inf }
 0x3ed   :  { %v6625_v21 = vsel %vm6454_vm7, %v4850_v48, -inf  ;;  %v2118_v8 = vpop.f32.mrb[75].mxu1  ;;  %2724 = vmax.xlane.f32.xlu1 %v2723_v9  ;;  %v2717_v55 = vsel %vm1737_vm0, %v6621_v25, -inf }
 0x3ee   :  { %v2726_v1 = vsel %vm1737_vm0, %v6625_v21, -inf  ;;  %v6631_v12 = vsel %vm6463_vm8, %v2118_v8, -inf }
 0x3ef   :  { %2727 = vmax.xlane.f32.xlu0 %v2726_v1  ;;  %v2720_v2 = vsel %vm1737_vm0, %v6631_v12, -inf }
 0x3f1   :  { %2718 = vmax.xlane.f32.xlu1 %v2717_v55 }
 0x3f3   :  { %2721 = vmax.xlane.f32.xlu0 %v2720_v2 }
 0x3fa   :  { %v4861_v48 = vpop.f32.mrb[76].mxu1 }
 0x3fb   :  { %v6639_v9 = vsel %vm6397_vm1, %v4861_v48, -inf  ;;  %v2200_v33 = vpop.f32.mrb[77].mxu1 }
 0x3fc   :  { %v4862_v7 = vpop.f32.mrb[78].mxu1  ;;  %v2735_v8 = vsel %vm1737_vm0, %v6639_v9, -inf  ;;  %v6645_v1 = vsel %vm6403_vm2, %v2200_v33, -inf }
 0x3fd   :  { %v6649_v55 = vsel %vm6421_vm4, %v4862_v7, -inf  ;;  %2736 = vmax.xlane.f32.xlu1 %v2735_v8  ;;  %v2203_v2 = vpop.f32.mrb[79].mxu1  ;;  %v2729_v41 = vsel %vm1737_vm0, %v6645_v1, -inf }
 0x3fe   :  { %v2738_v20 = vsel %vm1737_vm0, %v6649_v55, -inf  ;;  %v6655_v48 = vsel %vm6411_vm3, %v2203_v2, -inf }
 0x3ff   :  { %2739 = vmax.xlane.f32.xlu0 %v2738_v20  ;;  %v2732_v33 = vsel %vm1737_vm0, %v6655_v48, -inf }
 0x401   :  { %2730 = vmax.xlane.f32.xlu1 %v2729_v41 }
 0x403   :  { %2733 = vmax.xlane.f32.xlu0 %v2732_v33 }
 0x40a   :  { %v4865_v7 = vpop.f32.mrb[80].mxu1  ;;  %v2641_v49 = vpop.xlane.xlu0 %2640 }
 0x40b   :  { %v6663_v8 = vsel %vm6445_vm5, %v4865_v7, -inf  ;;  %v2827_v15 = vsub.f32 %v6409_v59, %v2641_v49  ;;  %v2216_v24 = vpop.f32.mrb[81].mxu1 }
 0x40c   :  { %v4866_v2 = vpop.f32.mrb[82].mxu1  ;;  %v2747_v20 = vsel %vm1737_vm0, %v6663_v8, -inf  ;;  %v6670_v41 = vsel %vm6450_vm6, %v2216_v24, -inf }
 0x40d   :  { %v2893_v37 = vmul.f32 1.442695, %v2827_v15  ;;  %v6674_v33 = vsel %vm6454_vm7, %v4866_v2, -inf  ;;  %2748 = vmax.xlane.f32.xlu1 %v2747_v20  ;;  %v2219_v0 = vpop.f32.mrb[83].mxu1  ;;  %v2741_v24 = vsel %vm1737_vm0, %v6670_v41, -inf  ;;  %v2638_v2 = vpop.xlane.xlu1 %2637 }
 0x40e   :  { %v2635_v7 = vpop.xlane.xlu0 %2634  ;;  %v2750_v49 = vsel %vm1737_vm0, %v6674_v33, -inf  ;;  %v6680_v59 = vsel %vm6463_vm8, %v2219_v0, -inf }
 0x40f   :  { %5426 = vpow2.f32 %v2893_v37  ;;  %v2825_v15 = vsub.f32 %v6419_v50, %v2635_v7  ;;  %2751 = vmax.xlane.f32.xlu0 %v2750_v49  ;;  %v2744_v6 = vsel %vm1737_vm0, %v6680_v59, -inf  ;;  %v2826_v37 = vsub.f32 %v6427_v57, %v2638_v2 }
 0x411   :  { %v2889_v51 = vmul.f32 1.442695, %v2825_v15  ;;  %2742 = vmax.xlane.f32.xlu1 %v2741_v24  ;;  %v2891_v7 = vmul.f32 1.442695, %v2826_v37 }
 0x412   :  { %v2644_v20 = vpop.xlane.xlu0 %2643 }
 0x413   :  { %v2828_v39 = vsub.f32 %v6437_v47, %v2644_v20  ;;  %2745 = vmax.xlane.f32.xlu0 %v2744_v6  ;;  %5428 = vpow2.f32 %v2889_v51 }
 0x415   :  { %v2895_v0 = vmul.f32 1.442695, %v2828_v39 }
 0x417   :  { %5430 = vpow2.f32 %v2895_v0 }
 0x418   :  { %5432 = vpow2.f32 %v2891_v7 }
 0x419   :  { %v6689_v50 = vpop.eup %5426 }
 0x41a   :  { %7476 = vst [vmem:[#allocation36_spill] sm:$0xff] %v6689_v50  ;;  %v4877_v49 = vpop.f32.mrb[84].mxu1  ;;  %v2653_v34 = vpop.xlane.xlu1 %2652  ;;  %v3023_v15 = vsel %vm1737_vm0, %v6689_v50, 0.0 }
 0x41b   :  { %v6695_v24 = vsel %vm6397_vm1, %v4877_v49, -inf  ;;  %v2301_v63 = vpop.f32.mrb[85].mxu1  ;;  %3024 = vadd.xlane.f32.xlu1 %v3023_v15  ;;  %v2831_v51 = vsub.f32 %v6460_v14, %v2653_v34 }
 0x41c   :  { %v4878_v6 = vpop.f32.mrb[86].mxu1  ;;  %v2759_v47 = vsel %vm1737_vm0, %v6695_v24, -inf  ;;  %v2656_v20 = vpop.xlane.xlu0 %2655  ;;  %v6711_v14 = vsel %vm6403_vm2, %v2301_v63, -inf }
 0x41d   :  { %v2304_v39 = vpop.f32.mrb[87].mxu1  ;;  %v6700_v2 = vpop.eup %5428  ;;  %v2901_v0 = vmul.f32 1.442695, %v2831_v51  ;;  %v6715_v15 = vsel %vm6421_vm4, %v4878_v6, -inf  ;;  %v2753_v17 = vsel %vm1737_vm0, %v6711_v14, -inf }
 0x41e   :  { %v2647_v57 = vpop.xlane.xlu1 %2646  ;;  %7477 = vst [vmem:[#allocation37_spill] sm:$0xff] %v6700_v2  ;;  %v3017_v34 = vsel %vm1737_vm0, %v6700_v2, 0.0  ;;  %v2762_v63 = vsel %vm1737_vm0, %v6715_v15, -inf }
 0x41f   :  { %2760 = vmax.xlane.f32.xlu1 %v2759_v47  ;;  %v2829_v49 = vsub.f32 %v6471_v53, %v2647_v57  ;;  %5434 = vpow2.f32 %v2901_v0  ;;  %v2832_v53 = vsub.f32 %v6475_v40, %v2656_v20 }
 0x420   :  { %v2650_v62 = vpop.xlane.xlu0 %2649 }
 0x421   :  { %v6702_v37 = vpop.eup %5430  ;;  %v2897_v57 = vmul.f32 1.442695, %v2829_v49  ;;  %v2903_v0 = vmul.f32 1.442695, %v2832_v53  ;;  %v2830_v40 = vsub.f32 %v6482_v19, %v2650_v62 }
 0x422   :  { %v4881_v26 = vpop.f32.mrb[88].mxu1  ;;  %v3026_v7 = vsel %vm1737_vm0, %v6702_v37, 0.0  ;;  %v6722_v50 = vpop.eup %5432 }
 0x423   :  { %v2317_v47 = vpop.f32.mrb[89].mxu1  ;;  %3027 = vadd.xlane.f32.xlu0 %v3026_v7  ;;  %3018 = vadd.xlane.f32.xlu1 %v3017_v34  ;;  %7478 = vst [vmem:[#allocation38_spill] sm:$0xff] %v6722_v50  ;;  %v6726_v6 = vsel %vm6445_vm5, %v4881_v26, -inf  ;;  %5436 = vpow2.f32 %v2897_v57  ;;  %v3020_v49 = vsel %vm1737_vm0, %v6722_v50, 0.0  ;;  %v6735_v34 = vsel %vm6411_vm3, %v2304_v39, -inf }
 0x424   :  { %v4882_v51 = vpop.f32.mrb[90].mxu1  ;;  %v2771_v7 = vsel %vm1737_vm0, %v6726_v6, -inf  ;;  %v6739_v26 = vsel %vm6450_vm6, %v2317_v47, -inf  ;;  %5438 = vpow2.f32 %v2903_v0  ;;  %v2899_v19 = vmul.f32 1.442695, %v2830_v40 }
 0x425   :  { %v2320_v18 = vpop.f32.mrb[91].mxu1  ;;  %v2756_v50 = vsel %vm1737_vm0, %v6735_v34, -inf  ;;  %v2765_v39 = vsel %vm1737_vm0, %v6739_v26, -inf }
 0x427   :  { %2754 = vmax.xlane.f32.xlu1 %v2753_v17  ;;  %2763 = vmax.xlane.f32.xlu0 %v2762_v63 }
 0x429   :  { %v6747_v2 = vpop.eup %5434 }
 0x42a   :  { %v2665_v20 = vpop.xlane.xlu1 %2664  ;;  %7479 = vst [vmem:[#allocation39_spill] sm:$0xff] %v6747_v2 }
 0x42b   :  { %v2835_v17 = vsub.f32 %v6495_v58, %v2665_v20  ;;  %3021 = vadd.xlane.f32.xlu0 %v3020_v49  ;;  %2772 = vmax.xlane.f32.xlu1 %v2771_v7  ;;  %v6751_v58 = vsel %vm6454_vm7, %v4882_v51, -inf  ;;  %v3035_v20 = vsel %vm1737_vm0, %v6747_v2, 0.0  ;;  %v6762_v51 = vsel %vm6463_vm8, %v2320_v18, -inf }
 0x42c   :  { %v2668_v62 = vpop.xlane.xlu0 %2667  ;;  %v2774_v49 = vsel %vm1737_vm0, %v6751_v58, -inf }
 0x42d   :  { %v2909_v53 = vmul.f32 1.442695, %v2835_v17  ;;  %v2836_v57 = vsub.f32 %v6505_v56, %v2668_v62  ;;  %v6758_v7 = vpop.eup %5436  ;;  %v2768_v17 = vsel %vm1737_vm0, %v6762_v51, -inf }
 0x42e   :  { %v2659_v63 = vpop.xlane.xlu1 %2658  ;;  %7480 = vst [vmem:[#allocation40_spill] sm:$0xff] %v6758_v7  ;;  %v6769_v62 = vpop.eup %5438 }
 0x42f   :  { %5440 = vpow2.f32 %v2909_v53  ;;  %v2833_v47 = vsub.f32 %v6501_v45, %v2659_v63  ;;  %2757 = vmax.xlane.f32.xlu0 %v2756_v50  ;;  %2766 = vmax.xlane.f32.xlu1 %v2765_v39  ;;  %v2911_v0 = vmul.f32 1.442695, %v2836_v57  ;;  %v3029_v50 = vsel %vm1737_vm0, %v6758_v7, 0.0 }
 0x430   :  { %5442 = vpow2.f32 %v2899_v19  ;;  %v2662_v40 = vpop.xlane.xlu0 %2661 }
 0x431   :  { %v2905_v56 = vmul.f32 1.442695, %v2833_v47  ;;  %5444 = vpow2.f32 %v2911_v0  ;;  %v2834_v45 = vsub.f32 %v6511_v29, %v2662_v40  ;;  %v3038_v29 = vsel %vm1737_vm0, %v6769_v62, 0.0 }
 0x433   :  { %3036 = vadd.xlane.f32.xlu1 %v3035_v20  ;;  %2775 = vmax.xlane.f32.xlu0 %v2774_v49  ;;  %5446 = vpow2.f32 %v2905_v56  ;;  %v2907_v18 = vmul.f32 1.442695, %v2834_v45 }
 0x435   :  { %5448 = vpow2.f32 %v2907_v18 }
 0x437   :  { %3030 = vadd.xlane.f32.xlu1 %v3029_v50  ;;  %2769 = vmax.xlane.f32.xlu0 %v2768_v17 }
 0x439   :  { %v6771_v19 = vpop.eup %5440 }
 0x43a   :  { %7481 = vst [vmem:[#allocation41_spill] sm:$0xff] %v6771_v19  ;;  %v4893_v53 = vpop.f32.mrb[92].mxu1  ;;  %v2677_v57 = vpop.xlane.xlu1 %2676  ;;  %v3047_v63 = vsel %vm1737_vm0, %v6771_v19, 0.0 }
 0x43b   :  { %v6777_v39 = vpop.eup %5442  ;;  %v6781_v47 = vsel %vm6397_vm1, %v4893_v53, -inf  ;;  %v2402_v0 = vpop.f32.mrb[93].mxu1  ;;  %3048 = vadd.xlane.f32.xlu1 %v3047_v63  ;;  %3039 = vadd.xlane.f32.xlu0 %v3038_v29  ;;  %v2839_v40 = vsub.f32 %v6519_v32, %v2677_v57 }
 0x43c   :  { %7482 = vst [vmem:[#allocation42_spill] sm:$0xff] %v6777_v39  ;;  %v4894_v56 = vpop.f32.mrb[94].mxu1  ;;  %v6784_v49 = vpop.eup %5444  ;;  %v3032_v50 = vsel %vm1737_vm0, %v6777_v39, 0.0  ;;  %v2783_v17 = vsel %vm1737_vm0, %v6781_v47, -inf  ;;  %v6799_v2 = vsel %vm6403_vm2, %v2402_v0, -inf }
 0x43d   :  { %v2405_v20 = vpop.f32.mrb[95].mxu1  ;;  %7483 = vst [vmem:[#allocation43_spill] sm:$0xff] %v6784_v49  ;;  %v6790_v19 = vpop.eup %5446  ;;  %v2917_v63 = vmul.f32 1.442695, %v2839_v40  ;;  %v3050_v32 = vsel %vm1737_vm0, %v6784_v49, 0.0  ;;  %v6803_v39 = vsel %vm6421_vm4, %v4894_v56, -inf }
 0x43e   :  { %v2671_v45 = vpop.xlane.xlu1 %2670  ;;  %7484 = vst [vmem:[#allocation44_spill] sm:$0xff] %v6790_v19  ;;  %v2680_v53 = vpop.xlane.xlu0 %2679  ;;  %v3041_v57 = vsel %vm1737_vm0, %v6790_v19, 0.0  ;;  %v2777_v19 = vsel %vm1737_vm0, %v6799_v2, -inf  ;;  %v2786_v0 = vsel %vm1737_vm0, %v6803_v39, -inf }
 0x43f   :  { %3033 = vadd.xlane.f32.xlu0 %v3032_v50  ;;  %2784 = vmax.xlane.f32.xlu1 %v2783_v17  ;;  %v2837_v18 = vsub.f32 %v6525_v61, %v2671_v45  ;;  %5450 = vpow2.f32 %v2917_v63  ;;  %v2840_v61 = vsub.f32 %v6529_v42, %v2680_v53  ;;  %v6810_v7 = vpop.eup %5448 }
 0x440   :  { %7485 = vst [vmem:[#allocation45_spill] sm:$0xff] %v6810_v7 }
 0x441   :  { %v2913_v45 = vmul.f32 1.442695, %v2837_v18  ;;  %v2919_v63 = vmul.f32 1.442695, %v2840_v61  ;;  %v3044_v18 = vsel %vm1737_vm0, %v6810_v7, 0.0 }
 0x442   :  { %v4897_v29 = vpop.f32.mrb[96].mxu1  ;;  %v2674_v49 = vpop.xlane.xlu0 %2673 }
 0x443   :  { %v2418_v50 = vpop.f32.mrb[97].mxu1  ;;  %3051 = vadd.xlane.f32.xlu0 %v3050_v32  ;;  %3042 = vadd.xlane.f32.xlu1 %v3041_v57  ;;  %v6814_v56 = vsel %vm6445_vm5, %v4897_v29, -inf  ;;  %5452 = vpow2.f32 %v2913_v45  ;;  %v2838_v42 = vsub.f32 %v6535_v52, %v2674_v49  ;;  %v6823_v57 = vsel %vm6411_vm3, %v2405_v20, -inf }
 0x444   :  { %v4898_v40 = vpop.f32.mrb[98].mxu1  ;;  %v2795_v32 = vsel %vm1737_vm0, %v6814_v56, -inf  ;;  %v6827_v29 = vsel %vm6450_vm6, %v2418_v50, -inf  ;;  %5454 = vpow2.f32 %v2919_v63  ;;  %v2780_v61 = vsel %vm1737_vm0, %v6823_v57, -inf }
 0x445   :  { %v2421_v17 = vpop.f32.mrb[99].mxu1  ;;  %7486 = vst [vmem:[#allocation46_spill] sm:$0xff] %v6827_v29  ;;  %v2915_v52 = vmul.f32 1.442695, %v2838_v42  ;;  %v2789_v45 = vsel %vm1737_vm0, %v6827_v29, -inf  ;;  %v6839_v20 = vsel %vm6454_vm7, %v4898_v40, -inf }
 0x446   :  { %v6851_v40 = vsel %vm6463_vm8, %v2421_v17, -inf }
 0x447   :  { %2778 = vmax.xlane.f32.xlu1 %v2777_v19  ;;  %2787 = vmax.xlane.f32.xlu0 %v2786_v0  ;;  %5456 = vpow2.f32 %v2915_v52  ;;  %v2792_v52 = vsel %vm1737_vm0, %v6851_v40, -inf }
 0x449   :  { %v6835_v0 = vpop.eup %5450 }
 0x44a   :  { %v2689_v53 = vpop.xlane.xlu1 %2688  ;;  %7487 = vst [vmem:[#allocation47_spill] sm:$0xff] %v6835_v0  ;;  %v3059_v7 = vsel %vm1737_vm0, %v6835_v0, 0.0 }
 0x44b   :  { %3045 = vadd.xlane.f32.xlu0 %v3044_v18  ;;  %2796 = vmax.xlane.f32.xlu1 %v2795_v32  ;;  %v2798_v32 = vsel %vm1737_vm0, %v6839_v20, -inf }
 0x44c   :  { %v6829_v19 = vpop.xlane.xlu0 %2691 }
 0x44d   :  { %v6847_v29 = vpop.eup %5452 }
 0x44e   :  { %v2683_v49 = vpop.xlane.xlu1 %2682  ;;  %7488 = vst [vmem:[#allocation48_spill] sm:$0xff] %v6847_v29 }
 0x44f   :  { %v2841_v50 = vsub.f32 %v6549_v35, %v2683_v49  ;;  %2781 = vmax.xlane.f32.xlu0 %v2780_v61  ;;  %2790 = vmax.xlane.f32.xlu1 %v2789_v45  ;;  %v6857_v49 = vpop.eup %5454 }
 0x450   :  { %v2686_v18 = vpop.xlane.xlu0 %2685  ;;  %7489 = vst [vmem:[#allocation49_spill] sm:$0xff] %v6857_v49  ;;  %v3062_v17 = vsel %vm1737_vm0, %v6857_v49, 0.0 }
 0x451   :  { %v2921_v63 = vmul.f32 1.442695, %v2841_v50  ;;  %v2842_v42 = vsub.f32 %v6559_v3, %v2686_v18  ;;  %v3053_v3 = vsel %vm1737_vm0, %v6847_v29, 0.0  ;;  %v6861_v50 = vpop.eup %5456 }
 0x452   :  { %7490 = vst [vmem:[#allocation50_spill] sm:$0xff] %v6861_v50  ;;  %v3056_v29 = vsel %vm1737_vm0, %v6861_v50, 0.0 }
 0x453   :  { %5458 = vpow2.f32 %v2921_v63  ;;  %3060 = vadd.xlane.f32.xlu1 %v3059_v7  ;;  %2799 = vmax.xlane.f32.xlu0 %v2798_v32  ;;  %v2923_v35 = vmul.f32 1.442695, %v2842_v42  ;;  %v2843_v7 = vsub.f32 %v6543_v11, %v2689_v53 }
 0x455   :  { %5460 = vpow2.f32 %v2923_v35  ;;  %v2925_v11 = vmul.f32 1.442695, %v2843_v7 }
 0x457   :  { %3054 = vadd.xlane.f32.xlu1 %v3053_v3  ;;  %2793 = vmax.xlane.f32.xlu0 %v2792_v52  ;;  %5462 = vpow2.f32 %v2925_v11 }
 0x45a   :  { %v4909_v61 = vpop.f32.mrb[100].mxu1  ;;  %v2701_v45 = vpop.xlane.xlu1 %2700 }
 0x45b   :  { %v6866_v18 = vsel %vm6397_vm1, %v4909_v61, -inf  ;;  %v2503_v63 = vpop.f32.mrb[101].mxu1  ;;  %3063 = vadd.xlane.f32.xlu0 %v3062_v17  ;;  %v2844_v17 = vsub.f32 %v6553_v31, %v6829_v19  ;;  %v2847_v28 = vsub.f32 %v6567_v16, %v2701_v45 }
 0x45c   :  { %v2807_v42 = vsel %vm1737_vm0, %v6866_v18, -inf  ;;  %v4910_v32 = vpop.f32.mrb[102].mxu1  ;;  %v2704_v35 = vpop.xlane.xlu0 %2703 }
 0x45d   :  { %v6870_v52 = vpop.eup %5458  ;;  %2808 = vmax.xlane.f32.xlu1 %v2807_v42  ;;  %v2506_v3 = vpop.f32.mrb[103].mxu1  ;;  %v6878_v53 = vsel %vm6421_vm4, %v4910_v32, -inf  ;;  %v6885_v42 = vsel %vm6403_vm2, %v2503_v63, -inf  ;;  %v2927_v19 = vmul.f32 1.442695, %v2844_v17  ;;  %v2848_v5 = vsub.f32 %v6577_v43, %v2704_v35 }
 0x45e   :  { %7491 = vst [vmem:[#allocation51_spill] sm:$0xff] %v6870_v52  ;;  %v2695_v0 = vpop.xlane.xlu1 %2694  ;;  %v3065_v27 = vsel %vm1737_vm0, %v6870_v52, 0.0  ;;  %v2810_v50 = vsel %vm1737_vm0, %v6878_v53, -inf  ;;  %v2801_v31 = vsel %vm1737_vm0, %v6885_v42, -inf  ;;  %v2933_v16 = vmul.f32 1.442695, %v2847_v28 }
 0x45f   :  { %v2845_v61 = vsub.f32 %v6573_v54, %v2695_v0  ;;  %3057 = vadd.xlane.f32.xlu0 %v3056_v29  ;;  %v6889_v49 = vpop.eup %5460  ;;  %v6903_v45 = vsel %vm6411_vm3, %v2506_v3, -inf  ;;  %v2935_v17 = vmul.f32 1.442695, %v2848_v5 }
 0x460   :  { %v2698_v52 = vpop.xlane.xlu0 %2697  ;;  %v2804_v11 = vsel %vm1737_vm0, %v6903_v45, -inf }
 0x461   :  { %3066 = vadd.xlane.f32.xlu1 %v3065_v27  ;;  %v2929_v54 = vmul.f32 1.442695, %v2845_v61  ;;  %v2846_v0 = vsub.f32 %v6583_v36, %v2698_v52  ;;  %v3068_v27 = vsel %vm1737_vm0, %v6889_v49, 0.0  ;;  %v6921_v22 = vpop.eup %5462 }
 0x462   :  { %v4913_v7 = vpop.f32.mrb[104].mxu1 }
 0x463   :  { %v2519_v29 = vpop.f32.mrb[105].mxu1  ;;  %2811 = vmax.xlane.f32.xlu0 %v2810_v50  ;;  %v6897_v63 = vsel %vm6445_vm5, %v4913_v7, -inf  ;;  %5464 = vpow2.f32 %v2929_v54  ;;  %v2931_v36 = vmul.f32 1.442695, %v2846_v0 }
 0x464   :  { %v4914_v44 = vpop.f32.mrb[106].mxu1  ;;  %v2819_v50 = vsel %vm1737_vm0, %v6897_v63, -inf  ;;  %5466 = vpow2.f32 %v2927_v19  ;;  %v6910_v52 = vsel %vm6450_vm6, %v2519_v29, -inf }
 0x465   :  { %2802 = vmax.xlane.f32.xlu1 %v2801_v31  ;;  %v2522_v32 = vpop.f32.mrb[107].mxu1  ;;  %5468 = vpow2.f32 %v2933_v16  ;;  %v6916_v3 = vsel %vm6454_vm7, %v4914_v44, -inf  ;;  %v2813_v61 = vsel %vm1737_vm0, %v6910_v52, -inf }
 0x466   :  { %5470 = vpow2.f32 %v2931_v36  ;;  %v2822_v7 = vsel %vm1737_vm0, %v6916_v3, -inf  ;;  %v6927_v30 = vsel %vm6463_vm8, %v2522_v32, -inf }
 0x467   :  { %3069 = vadd.xlane.f32.xlu0 %v3068_v27  ;;  %5472 = vpow2.f32 %v2935_v17  ;;  %v2816_v46 = vsel %vm1737_vm0, %v6927_v30, -inf }
 0x469   :  { %2820 = vmax.xlane.f32.xlu1 %v2819_v50 }
 0x46a   :  { %v2713_v38 = vpop.xlane.xlu1 %2712 }
 0x46b   :  { %2805 = vmax.xlane.f32.xlu0 %v2804_v11  ;;  %v2851_v43 = vsub.f32 %v6591_v10, %v2713_v38  ;;  %v3071_v10 = vsel %vm1737_vm0, %v6921_v22, 0.0 }
 0x46c   :  { %v2716_v35 = vpop.xlane.xlu0 %2715 }
 0x46d   :  { %2814 = vmax.xlane.f32.xlu1 %v2813_v61  ;;  %v2941_v29 = vmul.f32 1.442695, %v2851_v43  ;;  %v6932_v44 = vpop.eup %5464  ;;  %v2852_v19 = vsub.f32 %v6601_v4, %v2716_v35 }
 0x46e   :  { %v2707_v28 = vpop.xlane.xlu1 %2706  ;;  %v6938_v32 = vpop.eup %5466  ;;  %v3077_v16 = vsel %vm1737_vm0, %v6932_v44, 0.0 }
 0x46f   :  { %v2849_v54 = vsub.f32 %v6597_v60, %v2707_v28  ;;  %2823 = vmax.xlane.f32.xlu0 %v2822_v7  ;;  %v6942_v50 = vpop.eup %5468  ;;  %v2943_v5 = vmul.f32 1.442695, %v2852_v19  ;;  %v3074_v4 = vsel %vm1737_vm0, %v6938_v32, 0.0 }
 0x470   :  { %v2710_v31 = vpop.xlane.xlu0 %2709  ;;  %v3083_v36 = vsel %vm1737_vm0, %v6942_v50, 0.0 }
 0x471   :  { %v2937_v0 = vmul.f32 1.442695, %v2849_v54  ;;  %v2850_v27 = vsub.f32 %v6607_v23, %v2710_v31  ;;  %3072 = vadd.xlane.f32.xlu1 %v3071_v10  ;;  %v6946_v23 = vpop.eup %5470 }
 0x472   :  { %v3080_v38 = vsel %vm1737_vm0, %v6946_v23, 0.0  ;;  %v6952_v61 = vpop.eup %5472 }
 0x473   :  { %5474 = vpow2.f32 %v2937_v0  ;;  %v2939_v60 = vmul.f32 1.442695, %v2850_v27  ;;  %2817 = vmax.xlane.f32.xlu0 %v2816_v46 }
 0x474   :  { %5476 = vpow2.f32 %v2941_v29  ;;  %v3086_v29 = vsel %vm1737_vm0, %v6952_v61, 0.0 }
 0x475   :  { %5478 = vpow2.f32 %v2939_v60  ;;  %3078 = vadd.xlane.f32.xlu1 %v3077_v16 }
 0x476   :  { %5480 = vpow2.f32 %v2943_v5 }
 0x477   :  { %3075 = vadd.xlane.f32.xlu0 %v3074_v4 }
 0x479   :  { %3084 = vadd.xlane.f32.xlu1 %v3083_v36 }
 0x47a   :  { %v2725_v11 = vpop.xlane.xlu1 %2724 }
 0x47b   :  { %3081 = vadd.xlane.f32.xlu0 %v3080_v38  ;;  %v2855_v43 = vsub.f32 %v6615_v13, %v2725_v11 }
 0x47c   :  { %v2728_v35 = vpop.xlane.xlu0 %2727 }
 0x47d   :  { %v6955_v17 = vpop.eup %5474  ;;  %v2856_v10 = vsub.f32 %v6625_v21, %v2728_v35  ;;  %v2949_v13 = vmul.f32 1.442695, %v2855_v43 }
 0x47e   :  { %v6957_v7 = vpop.eup %5476  ;;  %v2719_v28 = vpop.xlane.xlu1 %2718  ;;  %v3089_v54 = vsel %vm1737_vm0, %v6955_v17, 0.0 }
 0x47f   :  { %v6963_v31 = vpop.eup %5478  ;;  %v2853_v19 = vsub.f32 %v6621_v25, %v2719_v28  ;;  %3090 = vadd.xlane.f32.xlu1 %v3089_v54  ;;  %3087 = vadd.xlane.f32.xlu0 %v3086_v29  ;;  %v3095_v60 = vsel %vm1737_vm0, %v6957_v7, 0.0  ;;  %v2951_v4 = vmul.f32 1.442695, %v2856_v10 }
 0x480   :  { %v2722_v0 = vpop.xlane.xlu0 %2721  ;;  %v3092_v16 = vsel %vm1737_vm0, %v6963_v31, 0.0  ;;  %v6972_v5 = vpop.eup %5480 }
 0x481   :  { %v2945_v27 = vmul.f32 1.442695, %v2853_v19  ;;  %v2854_v46 = vsub.f32 %v6631_v12, %v2722_v0  ;;  %v3098_v25 = vsel %vm1737_vm0, %v6972_v5, 0.0 }
 0x483   :  { %5482 = vpow2.f32 %v2945_v27  ;;  %v2947_v21 = vmul.f32 1.442695, %v2854_v46  ;;  %3096 = vadd.xlane.f32.xlu1 %v3095_v60  ;;  %3093 = vadd.xlane.f32.xlu0 %v3092_v16 }
 0x484   :  { %5484 = vpow2.f32 %v2949_v13 }
 0x485   :  { %5486 = vpow2.f32 %v2947_v21 }
 0x486   :  { %5488 = vpow2.f32 %v2951_v4 }
 0x487   :  { %3099 = vadd.xlane.f32.xlu0 %v3098_v25 }
 0x48a   :  { %v2737_v12 = vpop.xlane.xlu1 %2736 }
 0x48b   :  { %v2859_v36 = vsub.f32 %v6639_v9, %v2737_v12 }
 0x48c   :  { %v2740_v11 = vpop.xlane.xlu0 %2739 }
 0x48d   :  { %v6977_v38 = vpop.eup %5482  ;;  %v2860_v29 = vsub.f32 %v6649_v55, %v2740_v11  ;;  %v2957_v19 = vmul.f32 1.442695, %v2859_v36 }
 0x48e   :  { %v6979_v43 = vpop.eup %5484  ;;  %v2731_v35 = vpop.xlane.xlu1 %2730  ;;  %v3101_v28 = vsel %vm1737_vm0, %v6977_v38, 0.0 }
 0x48f   :  { %v6983_v54 = vpop.eup %5486  ;;  %v2857_v10 = vsub.f32 %v6645_v1, %v2731_v35  ;;  %3102 = vadd.xlane.f32.xlu1 %v3101_v28  ;;  %v3107_v60 = vsel %vm1737_vm0, %v6979_v43, 0.0  ;;  %v2959_v16 = vmul.f32 1.442695, %v2860_v29 }
 0x490   :  { %v2734_v13 = vpop.xlane.xlu0 %2733  ;;  %v3104_v9 = vsel %vm1737_vm0, %v6983_v54, 0.0  ;;  %v6989_v0 = vpop.eup %5488 }
 0x491   :  { %v2953_v27 = vmul.f32 1.442695, %v2857_v10  ;;  %v2858_v46 = vsub.f32 %v6655_v48, %v2734_v13  ;;  %3105 = vadd.xlane.f32.xlu0 %v3104_v9  ;;  %v3110_v1 = vsel %vm1737_vm0, %v6989_v0, 0.0 }
 0x493   :  { %5490 = vpow2.f32 %v2953_v27  ;;  %v2955_v55 = vmul.f32 1.442695, %v2858_v46  ;;  %3108 = vadd.xlane.f32.xlu1 %v3107_v60 }
 0x494   :  { %5492 = vpow2.f32 %v2957_v19 }
 0x495   :  { %5494 = vpow2.f32 %v2955_v55  ;;  %3111 = vadd.xlane.f32.xlu0 %v3110_v1 }
 0x496   :  { %5496 = vpow2.f32 %v2959_v16 }
 0x49a   :  { %v2749_v4 = vpop.xlane.xlu1 %2748 }
 0x49b   :  { %v2863_v21 = vsub.f32 %v6663_v8, %v2749_v4 }
 0x49c   :  { %v2752_v25 = vpop.xlane.xlu0 %2751 }
 0x49d   :  { %v6997_v48 = vpop.eup %5490  ;;  %v2864_v28 = vsub.f32 %v6674_v33, %v2752_v25  ;;  %v2965_v10 = vmul.f32 1.442695, %v2863_v21 }
 0x49e   :  { %v6999_v12 = vpop.eup %5492  ;;  %v2743_v36 = vpop.xlane.xlu1 %2742  ;;  %v3113_v11 = vsel %vm1737_vm0, %v6997_v48, 0.0 }
 0x49f   :  { %v7003_v35 = vpop.eup %5494  ;;  %v2861_v29 = vsub.f32 %v6670_v41, %v2743_v36  ;;  %3114 = vadd.xlane.f32.xlu1 %v3113_v11  ;;  %v3119_v46 = vsel %vm1737_vm0, %v6999_v12, 0.0  ;;  %v2967_v60 = vmul.f32 1.442695, %v2864_v28 }
 0x4a0   :  { %v2746_v19 = vpop.xlane.xlu0 %2745  ;;  %v3116_v8 = vsel %vm1737_vm0, %v7003_v35, 0.0  ;;  %v7009_v13 = vpop.eup %5496 }
 0x4a1   :  { %v2961_v9 = vmul.f32 1.442695, %v2861_v29  ;;  %v2862_v27 = vsub.f32 %v6680_v59, %v2746_v19  ;;  %3117 = vadd.xlane.f32.xlu0 %v3116_v8  ;;  %v3122_v41 = vsel %vm1737_vm0, %v7009_v13, 0.0 }
 0x4a3   :  { %5498 = vpow2.f32 %v2961_v9  ;;  %v2963_v33 = vmul.f32 1.442695, %v2862_v27  ;;  %3120 = vadd.xlane.f32.xlu1 %v3119_v46 }
 0x4a4   :  { %5500 = vpow2.f32 %v2965_v10 }
 0x4a5   :  { %5502 = vpow2.f32 %v2963_v33  ;;  %3123 = vadd.xlane.f32.xlu0 %v3122_v41 }
 0x4a6   :  { %5504 = vpow2.f32 %v2967_v60 }
 0x4a8   :  { %v3025_v16 = vpop.xlane.xlu1 %3024 }
 0x4a9   :  { %5506 = vrcp.f32 %v3025_v16 }
 0x4ac   :  { %v2761_v55 = vpop.xlane.xlu1 %2760 }
 0x4ad   :  { %v7016_v1 = vpop.eup %5498  ;;  %v2867_v29 = vsub.f32 %v6695_v24, %v2761_v55 }
 0x4ae   :  { %v7018_v59 = vpop.eup %5500  ;;  %v3125_v4 = vsel %vm1737_vm0, %v7016_v1, 0.0 }
 0x4af   :  { %v7022_v21 = vpop.eup %5502  ;;  %3126 = vadd.xlane.f32.xlu1 %v3125_v4  ;;  %v3131_v10 = vsel %vm1737_vm0, %v7018_v59, 0.0  ;;  %v2973_v46 = vmul.f32 1.442695, %v2867_v29 }
 0x4b0   :  { %v3028_v25 = vpop.xlane.xlu0 %3027  ;;  %v3019_v36 = vpop.xlane.xlu1 %3018  ;;  %v3128_v11 = vsel %vm1737_vm0, %v7022_v21, 0.0 }
 0x4b1   :  { %v7026_v28 = vpop.eup %5504  ;;  %3129 = vadd.xlane.f32.xlu0 %v3128_v11  ;;  %5508 = vrcp.f32 %v3028_v25 }
 0x4b2   :  { %7492 = vst [vmem:[#allocation52_spill] sm:$0xff] %v7026_v28  ;;  %v3134_v9 = vsel %vm1737_vm0, %v7026_v28, 0.0  ;;  %5510 = vrcp.f32 %v3019_v36 }
 0x4b3   :  { %3132 = vadd.xlane.f32.xlu1 %v3131_v10 }
 0x4b4   :  { %v2755_v19 = vpop.xlane.xlu1 %2754  ;;  %v2764_v8 = vpop.xlane.xlu0 %2763 }
 0x4b5   :  { %v2865_v27 = vsub.f32 %v6711_v14, %v2755_v19  ;;  %3135 = vadd.xlane.f32.xlu0 %v3134_v9  ;;  %v2868_v24 = vsub.f32 %v6715_v15, %v2764_v8  ;;  %v5507_v19 = vpop.eup %5506 }
 0x4b7   :  { %v2969_v60 = vmul.f32 1.442695, %v2865_v27  ;;  %v2975_v16 = vmul.f32 1.442695, %v2868_v24 }
 0x4b8   :  { %v3022_v33 = vpop.xlane.xlu0 %3021  ;;  %v2773_v41 = vpop.xlane.xlu1 %2772 }
 0x4b9   :  { %5512 = vpow2.f32 %v2969_v60  ;;  %v2871_v55 = vsub.f32 %v6726_v6, %v2773_v41 }
 0x4ba   :  { %5514 = vpow2.f32 %v2973_v46 }
 0x4bb   :  { %5516 = vrcp.f32 %v3022_v33  ;;  %v2981_v36 = vmul.f32 1.442695, %v2871_v55  ;;  %v5509_v60 = vpop.eup %5508 }
 0x4bc   :  { %v2758_v4 = vpop.xlane.xlu0 %2757  ;;  %v2767_v11 = vpop.xlane.xlu1 %2766  ;;  %v3276_v55 = vmul.f32 %v5509_v60, %v6702_v37 }
 0x4bd   :  { %v2866_v10 = vsub.f32 %v6735_v34, %v2758_v4  ;;  %v2869_v14 = vsub.f32 %v6739_v26, %v2767_v11  ;;  %v5511_v8 = vpop.eup %5510 }
 0x4bf   :  { %v2971_v29 = vmul.f32 1.442695, %v2866_v10  ;;  %v2977_v25 = vmul.f32 1.442695, %v2869_v14  ;;  %v7495_v10 = vld [vmem:[#allocation38_spill] sm:$0xff] }
 0x4c0   :  { %v3037_v9 = vpop.xlane.xlu1 %3036  ;;  %v2776_v27 = vpop.xlane.xlu0 %2775 }
 0x4c1   :  { %5518 = vpow2.f32 %v2971_v29  ;;  %v2872_v15 = vsub.f32 %v6751_v58, %v2776_v27  ;;  %v7494_v58 = vld [vmem:[#allocation37_spill] sm:$0xff] }
 0x4c2   :  { %5520 = vpow2.f32 %v2977_v25  ;;  %v3273_v11 = vmul.f32 %v5511_v8, %v7494_v58 }
 0x4c3   :  { %v7039_v6 = vpop.eup %5512  ;;  %5522 = vpow2.f32 %v2975_v16  ;;  %v2983_v34 = vmul.f32 1.442695, %v2872_v15  ;;  %v7496_v16 = vld [vmem:[#allocation36_spill] sm:$0xff] }
 0x4c4   :  { %7493 = vst [vmem:[#allocation53_spill] sm:$0xff] %v7039_v6  ;;  %v7041_v46 = vpop.eup %5514  ;;  %5524 = vpow2.f32 %v2981_v36  ;;  %v3031_v26 = vpop.xlane.xlu1 %3030  ;;  %v3137_v41 = vsel %vm1737_vm0, %v7039_v6, 0.0  ;;  %v3275_v29 = vmul.f32 %v5507_v19, %v7496_v16  ;;  %v7497_v19 = vld [vmem:[#allocation19_spill] sm:$0xff] }
 0x4c5   :  { %v2770_v33 = vpop.xlane.xlu0 %2769  ;;  %v5517_v24 = vpop.eup %5516  ;;  %3138 = vadd.xlane.f32.xlu1 %v3137_v41  ;;  %5526 = vpow2.f32 %v2983_v34  ;;  %v3143_v6 = vsel %vm1737_vm0, %v7041_v46, 0.0 }
 0x4c6   :  { %v2870_v4 = vsub.f32 %v6762_v51, %v2770_v33  ;;  %v3274_v14 = vmul.f32 %v5517_v24, %v7495_v10  ;;  %v3338_v28 = vpack.c.bf16 %v3276_v55, %v3275_v29  ;;  %v7500_v55 = vld [vmem:[#allocation21_spill] sm:$0xff] }
 0x4c8   :  { %v2979_v25 = vmul.f32 1.442695, %v2870_v4  ;;  %v3337_v36 = vpack.c.bf16 %v3274_v14, %v3273_v11  ;;  %v3049_v27 = vpop.xlane.xlu1 %3048 }
 0x4c9   :  { %v3040_v15 = vpop.xlane.xlu0 %3039  ;;  %3144 = vadd.xlane.f32.xlu1 %v3143_v6  ;;  %v7498_v6 = vld [vmem:[#allocation20_spill] sm:$0xff] }
 0x4ca   :  { %5528 = vpow2.f32 %v2979_v25  ;;  %4923 = vmatprep.mubr.msk.bf16.mxu1 %vm1737_vm0, %v3337_v36 }
 0x4cb   :  { %5530 = vrcp.f32 %v3031_v26  ;;  %v7053_v37 = vpop.eup %5518  ;;  %4924 = vmatmul.mubr.msk.bf16.vlgmr.msra.gmra.mrb[108].mxu1 %vm1737_vm0, %v3338_v28 }
 0x4cc   :  { %5532 = vrcp.f32 %v3040_v15  ;;  %v7056_v51 = vpop.eup %5520  ;;  %4932 = vmatpush3.bf16.msra.mxu1 %v7497_v19  ;;  %v2785_v8 = vpop.xlane.xlu1 %2784  ;;  %v3140_v34 = vsel %vm1737_vm0, %v7053_v37, 0.0  ;;  %v7501_v15 = vld [vmem:[#allocation22_spill] sm:$0xff] }
 0x4cd   :  { %5534 = vrcp.f32 %v3037_v9  ;;  %v3034_v60 = vpop.xlane.xlu0 %3033  ;;  %v7061_v33 = vpop.eup %5522  ;;  %4933 = vmatprep.subr.bf16.mxu1 %v7498_v6  ;;  %v3149_v26 = vsel %vm1737_vm0, %v7056_v51, 0.0  ;;  %3141 = vadd.xlane.f32.xlu0 %v3140_v34  ;;  %v2875_v11 = vsub.f32 %v6781_v47, %v2785_v8 }
 0x4ce   :  { %5536 = vrcp.f32 %v3034_v60  ;;  %v7066_v28 = vpop.eup %5524  ;;  %3150 = vadd.xlane.f32.xlu1 %v3149_v26  ;;  %v3146_v24 = vsel %vm1737_vm0, %v7061_v33, 0.0 }
 0x4cf   :  { %7499 = vst [vmem:[#allocation37_spill] sm:$0xff] %v7066_v28  ;;  %v3155_v4 = vsel %vm1737_vm0, %v7066_v28, 0.0  ;;  %v7074_v58 = vpop.eup %5526  ;;  %5538 = vrcp.f32 %v3049_v27  ;;  %v2989_v47 = vmul.f32 1.442695, %v2875_v11  ;;  %v7504_v27 = vld [vmem:[#allocation23_spill] sm:$0xff] }
 0x4d0   :  { %4934 = vmatpush3.bf16.msra.mxu1 %v7498_v6  ;;  %v3043_v41 = vpop.xlane.xlu1 %3042 }
 0x4d1   :  { %v3052_v9 = vpop.xlane.xlu0 %3051  ;;  %4935 = vmatprep.subr.bf16.mxu1 %v7500_v55  ;;  %3147 = vadd.xlane.f32.xlu0 %v3146_v24 }
 0x4d2   :  { %3156 = vadd.xlane.f32.xlu1 %v3155_v4  ;;  %5540 = vrcp.f32 %v3052_v9  ;;  %v7502_v4 = vld [vmem:[#allocation40_spill] sm:$0xff]  ;;  %v7505_v9 = vld [vmem:[#allocation39_spill] sm:$0xff] }
 0x4d3   :  { %5542 = vrcp.f32 %v3043_v41 }
 0x4d4   :  { %v7077_v10 = vpop.eup %5528  ;;  %4936 = vmatpush3.bf16.msra.mxu1 %v7500_v55  ;;  %v2779_v16 = vpop.xlane.xlu1 %2778  ;;  %v3158_v55 = vsel %vm1737_vm0, %v7074_v58, 0.0 }
 0x4d5   :  { %v5531_v14 = vpop.eup %5530  ;;  %v2788_v29 = vpop.xlane.xlu0 %2787  ;;  %v3152_v25 = vsel %vm1737_vm0, %v7077_v10, 0.0  ;;  %4937 = vmatprep.subr.bf16.mxu1 %v7501_v15  ;;  %v2873_v19 = vsub.f32 %v6799_v2, %v2779_v16  ;;  %v7503_v2 = vld [vmem:[#allocation42_spill] sm:$0xff] }
 0x4d6   :  { %v5533_v36 = vpop.eup %5532  ;;  %3153 = vadd.xlane.f32.xlu0 %v3152_v25  ;;  %v3277_v28 = vmul.f32 %v5531_v14, %v7502_v4  ;;  %v2876_v41 = vsub.f32 %v6803_v39, %v2788_v29 }
 0x4d7   :  { %v5535_v60 = vpop.eup %5534  ;;  %v2985_v34 = vmul.f32 1.442695, %v2873_v19  ;;  %v3280_v6 = vmul.f32 %v5533_v36, %v6769_v62 }
 0x4d8   :  { %v5537_v8 = vpop.eup %5536  ;;  %4938 = vmatpush3.bf16.msra.mxu1 %v7501_v15  ;;  %v2797_v24 = vpop.xlane.xlu1 %2796  ;;  %v3279_v11 = vmul.f32 %v5535_v60, %v7505_v9 }
 0x4d9   :  { %v3046_v26 = vpop.xlane.xlu0 %3045  ;;  %v3278_v16 = vmul.f32 %v5537_v8, %v7503_v2  ;;  %5544 = vpow2.f32 %v2985_v34  ;;  %4947 = vmatprep.subr.bf16.mxu1 %v7504_v27  ;;  %v2879_v36 = vsub.f32 %v6814_v56, %v2797_v24  ;;  %v7506_v8 = vld [vmem:[#allocation46_spill] sm:$0xff] }
 0x4da   :  { %3159 = vadd.xlane.f32.xlu0 %v3158_v55  ;;  %5546 = vpow2.f32 %v2989_v47  ;;  %v3340_v25 = vpack.c.bf16 %v3280_v6, %v3279_v11  ;;  %v2991_v55 = vmul.f32 1.442695, %v2876_v41  ;;  %v7507_v41 = vld [vmem:[#allocation43_spill] sm:$0xff] }
 0x4db   :  { %v3339_v62 = vpack.c.bf16 %v3278_v16, %v3277_v28  ;;  %5548 = vrcp.f32 %v3046_v26  ;;  %v5539_v28 = vpop.eup %5538  ;;  %v2997_v4 = vmul.f32 1.442695, %v2879_v36 }
 0x4dc   :  { %v2791_v14 = vpop.xlane.xlu1 %2790  ;;  %v5541_v6 = vpop.eup %5540 }
 0x4dd   :  { %4927 = vmatprep.mubr.msk.bf16.mxu1 %vm1737_vm0, %v3339_v62  ;;  %v2782_v15 = vpop.xlane.xlu0 %2781  ;;  %v2877_v34 = vsub.f32 %v7506_v8, %v2791_v14  ;;  %v5543_v26 = vpop.eup %5542  ;;  %v7509_v14 = vld [vmem:[#allocation45_spill] sm:$0xff] }
 0x4de   :  { %v2874_v19 = vsub.f32 %v6823_v57, %v2782_v15  ;;  %4928 = vmatmul.mubr.msk.bf16.gmra.mrb[112].mxu1 %vm1737_vm0, %v3340_v25  ;;  %v3284_v25 = vmul.f32 %v5541_v6, %v7507_v41  ;;  %v7510_v8 = vld [vmem:[#allocation41_spill] sm:$0xff] }
 0x4df   :  { %v2993_v47 = vmul.f32 1.442695, %v2877_v34  ;;  %v3283_v34 = vmul.f32 %v5539_v28, %v7510_v8 }
 0x4e0   :  { %v2987_v60 = vmul.f32 1.442695, %v2874_v19  ;;  %v3061_v39 = vpop.xlane.xlu1 %3060 }
 0x4e1   :  { %v2800_v29 = vpop.xlane.xlu0 %2799 }
 0x4e2   :  { %5550 = vpow2.f32 %v2987_v60  ;;  %v2880_v56 = vsub.f32 %v6839_v20, %v2800_v29  ;;  %v7508_v20 = vld [vmem:[#allocation44_spill] sm:$0xff]  ;;  %v3342_v29 = vpack.c.bf16 %v3284_v25, %v3283_v34  ;;  %v7512_v25 = vld [vmem:[#allocation25_spill] sm:$0xff] }
 0x4e3   :  { %5552 = vpow2.f32 %v2993_v47  ;;  %v7099_v24 = vpop.eup %5544  ;;  %v3281_v15 = vmul.f32 %v5543_v26, %v7508_v20 }
 0x4e4   :  { %5554 = vpow2.f32 %v2991_v55  ;;  %v7101_v57 = vpop.eup %5546  ;;  %v2999_v2 = vmul.f32 1.442695, %v2880_v56  ;;  %v3055_v16 = vpop.xlane.xlu1 %3054  ;;  %v3161_v11 = vsel %vm1737_vm0, %v7099_v24, 0.0 }
 0x4e5   :  { %5556 = vpow2.f32 %v2997_v4  ;;  %v2794_v9 = vpop.xlane.xlu0 %2793  ;;  %v5549_v62 = vpop.eup %5548  ;;  %3162 = vadd.xlane.f32.xlu1 %v3161_v11  ;;  %v3167_v4 = vsel %vm1737_vm0, %v7101_v57, 0.0 }
 0x4e6   :  { %v2878_v36 = vsub.f32 %v6851_v40, %v2794_v9  ;;  %v3282_v19 = vmul.f32 %v5549_v62, %v7509_v14  ;;  %5558 = vpow2.f32 %v2999_v2  ;;  %v7511_v9 = vld [vmem:[#allocation24_spill] sm:$0xff] }
 0x4e8   :  { %v2995_v55 = vmul.f32 1.442695, %v2878_v36  ;;  %v3341_v60 = vpack.c.bf16 %v3282_v19, %v3281_v15 }
 0x4e9   :  { %v3064_v47 = vpop.xlane.xlu0 %3063  ;;  %3168 = vadd.xlane.f32.xlu1 %v3167_v4  ;;  %v7514_v4 = vld [vmem:[#allocation26_spill] sm:$0xff] }
 0x4ea   :  { %5560 = vpow2.f32 %v2995_v55  ;;  %4939 = vmatprep.mubr.msk.bf16.mxu1 %vm1737_vm0, %v3341_v60  ;;  %v2809_v40 = vpop.xlane.xlu1 %2808 }
 0x4eb   :  { %5562 = vrcp.f32 %v3064_v47  ;;  %4940 = vmatmul.mubr.msk.bf16.vlgmr.msra.gmra.mrb[116].mxu1 %vm1737_vm0, %v3342_v29  ;;  %v2883_v41 = vsub.f32 %v6866_v18, %v2809_v40 }
 0x4ec   :  { %v7113_v6 = vpop.eup %5550  ;;  %5564 = vrcp.f32 %v3055_v16  ;;  %4948 = vmatpush3.bf16.msra.mxu1 %v7504_v27 }
 0x4ed   :  { %v7116_v28 = vpop.eup %5552  ;;  %5566 = vrcp.f32 %v3061_v39  ;;  %v3058_v56 = vpop.xlane.xlu0 %3057  ;;  %v3164_v26 = vsel %vm1737_vm0, %v7113_v6, 0.0  ;;  %4949 = vmatprep.subr.bf16.mxu1 %v7511_v9  ;;  %v3005_v60 = vmul.f32 1.442695, %v2883_v41 }
 0x4ee   :  { %v7121_v2 = vpop.eup %5554  ;;  %5568 = vrcp.f32 %v3058_v56  ;;  %v3173_v11 = vsel %vm1737_vm0, %v7116_v28, 0.0  ;;  %3165 = vadd.xlane.f32.xlu0 %v3164_v26  ;;  %v3067_v62 = vpop.xlane.xlu1 %3066  ;;  %v7515_v26 = vld [vmem:[#allocation49_spill] sm:$0xff] }
 0x4ef   :  { %v7126_v16 = vpop.eup %5556  ;;  %3174 = vadd.xlane.f32.xlu1 %v3173_v11  ;;  %v3170_v39 = vsel %vm1737_vm0, %v7121_v2, 0.0  ;;  %5570 = vrcp.f32 %v3067_v62 }
 0x4f0   :  { %4950 = vmatpush3.bf16.msra.mxu1 %v7511_v9  ;;  %v3179_v36 = vsel %vm1737_vm0, %v7126_v16, 0.0  ;;  %v7135_v20 = vpop.eup %5558 }
 0x4f1   :  { %v2812_v27 = vpop.xlane.xlu0 %2811  ;;  %4951 = vmatprep.subr.bf16.mxu1 %v7512_v25  ;;  %7513 = vst [vmem:[#allocation38_spill] sm:$0xff] %v7135_v20  ;;  %v3182_v62 = vsel %vm1737_vm0, %v7135_v20, 0.0 }
 0x4f2   :  { %3171 = vadd.xlane.f32.xlu0 %v3170_v39  ;;  %v2803_v15 = vpop.xlane.xlu1 %2802  ;;  %v2884_v40 = vsub.f32 %v6878_v53, %v2812_v27  ;;  %v7516_v39 = vld [vmem:[#allocation48_spill] sm:$0xff]  ;;  %v7518_v53 = vld [vmem:[#allocation27_spill] sm:$0xff] }
 0x4f3   :  { %3180 = vadd.xlane.f32.xlu1 %v3179_v36  ;;  %v2881_v19 = vsub.f32 %v6885_v42, %v2803_v15 }
 0x4f4   :  { %v7137_v14 = vpop.eup %5560  ;;  %4952 = vmatpush3.bf16.msra.mxu1 %v7512_v25  ;;  %v7517_v25 = vld [vmem:[#allocation50_spill] sm:$0xff] }
 0x4f5   :  { %v5563_v8 = vpop.eup %5562  ;;  %v3070_v34 = vpop.xlane.xlu0 %3069  ;;  %v3176_v18 = vsel %vm1737_vm0, %v7137_v14, 0.0  ;;  %v3001_v47 = vmul.f32 1.442695, %v2881_v19  ;;  %4953 = vmatprep.subr.bf16.mxu1 %v7514_v4  ;;  %v7519_v19 = vld [vmem:[#allocation47_spill] sm:$0xff] }
 0x4f6   :  { %v5565_v55 = vpop.eup %5564  ;;  %3177 = vadd.xlane.f32.xlu0 %v3176_v18  ;;  %5572 = vrcp.f32 %v3070_v34  ;;  %v2821_v56 = vpop.xlane.xlu1 %2820  ;;  %v3288_v9 = vmul.f32 %v5563_v8, %v7515_v26  ;;  %v3007_v34 = vmul.f32 1.442695, %v2884_v40 }
 0x4f7   :  { %v5567_v29 = vpop.eup %5566  ;;  %5574 = vpow2.f32 %v3001_v47  ;;  %v3285_v41 = vmul.f32 %v5565_v55, %v7516_v39  ;;  %v2887_v15 = vsub.f32 %v6897_v63, %v2821_v56 }
 0x4f8   :  { %v5569_v42 = vpop.eup %5568  ;;  %4954 = vmatpush3.bf16.msra.mxu1 %v7514_v4  ;;  %5576 = vpow2.f32 %v3005_v60  ;;  %v3287_v8 = vmul.f32 %v5567_v29, %v7519_v19 }
 0x4f9   :  { %v2806_v11 = vpop.xlane.xlu0 %2805  ;;  %v3286_v36 = vmul.f32 %v5569_v42, %v7517_v25  ;;  %4963 = vmatprep.subr.bf16.mxu1 %v7518_v53  ;;  %v3013_v60 = vmul.f32 1.442695, %v2887_v15 }
 0x4fa   :  { %v2882_v27 = vsub.f32 %v6903_v45, %v2806_v11  ;;  %3183 = vadd.xlane.f32.xlu0 %v3182_v62  ;;  %v2815_v18 = vpop.xlane.xlu1 %2814  ;;  %v3344_v20 = vpack.c.bf16 %v3288_v9, %v3287_v8  ;;  %v5571_v45 = vpop.eup %5570  ;;  %v7520_v9 = vld [vmem:[#allocation51_spill] sm:$0xff] }
 0x4fb   :  { %v3343_v47 = vpack.c.bf16 %v3286_v36, %v3285_v41  ;;  %v2885_v26 = vsub.f32 %v6910_v52, %v2815_v18  ;;  %v3289_v39 = vmul.f32 %v5571_v45, %v7520_v9 }
 0x4fc   :  { %v3003_v4 = vmul.f32 1.442695, %v2882_v27 }
 0x4fd   :  { %4943 = vmatprep.mubr.msk.bf16.mxu1 %vm1737_vm0, %v3343_v47  ;;  %v2824_v55 = vpop.xlane.xlu0 %2823  ;;  %v3009_v63 = vmul.f32 1.442695, %v2885_v26 }
 0x4fe   :  { %5578 = vpow2.f32 %v3003_v4  ;;  %v2888_v56 = vsub.f32 %v6916_v3, %v2824_v55  ;;  %4944 = vmatmul.mubr.msk.bf16.gmra.mrb[120].mxu1 %vm1737_vm0, %v3344_v20  ;;  %v3073_v29 = vpop.xlane.xlu1 %3072 }
 0x4ff   :  { %5580 = vpow2.f32 %v3007_v34 }
 0x500   :  { %5582 = vpow2.f32 %v3009_v63  ;;  %v5573_v40 = vpop.eup %5572  ;;  %v3015_v42 = vmul.f32 1.442695, %v2888_v56 }
 0x501   :  { %v2818_v11 = vpop.xlane.xlu0 %2817  ;;  %v7159_v62 = vpop.eup %5574  ;;  %5584 = vpow2.f32 %v3013_v60  ;;  %v3290_v41 = vmul.f32 %v5573_v40, %v6889_v49 }
 0x502   :  { %v2886_v52 = vsub.f32 %v6927_v30, %v2818_v11  ;;  %v3079_v25 = vpop.xlane.xlu1 %3078  ;;  %v3185_v3 = vsel %vm1737_vm0, %v7159_v62, 0.0  ;;  %v7166_v20 = vpop.eup %5576  ;;  %5586 = vrcp.f32 %v3073_v29 }
 0x503   :  { %3186 = vadd.xlane.f32.xlu1 %v3185_v3  ;;  %v3345_v15 = vpack.c.bf16 %v3290_v41, %v3289_v39  ;;  %5588 = vpow2.f32 %v3015_v42  ;;  %v3191_v30 = vsel %vm1737_vm0, %v7166_v20, 0.0 }
 0x504   :  { %v3011_v36 = vmul.f32 1.442695, %v2886_v52 }
 0x505   :  { %v3076_v27 = vpop.xlane.xlu0 %3075  ;;  %4955 = vmatprep.mubr.msk.bf16.mxu1 %vm1737_vm0, %v3345_v15 }
 0x506   :  { %5590 = vpow2.f32 %v3011_v36  ;;  %v3085_v8 = vpop.xlane.xlu1 %3084 }
 0x507   :  { %5592 = vrcp.f32 %v3076_v27  ;;  %3192 = vadd.xlane.f32.xlu1 %v3191_v30 }
 0x508   :  { %v7171_v49 = vpop.eup %5578  ;;  %5594 = vrcp.f32 %v3079_v25 }
 0x509   :  { %v7173_v19 = vpop.eup %5580  ;;  %v3082_v34 = vpop.xlane.xlu0 %3081  ;;  %v3188_v18 = vsel %vm1737_vm0, %v7171_v49, 0.0 }
 0x50a   :  { %v7177_v47 = vpop.eup %5582  ;;  %5596 = vrcp.f32 %v3082_v34  ;;  %3189 = vadd.xlane.f32.xlu0 %v3188_v18  ;;  %v3194_v63 = vsel %vm1737_vm0, %v7173_v19, 0.0  ;;  %v7521_v34 = vld [vmem:[#allocation28_spill] sm:$0xff] }
 0x50b   :  { %v3197_v4 = vsel %vm1737_vm0, %v7177_v47, 0.0  ;;  %v7181_v26 = vpop.eup %5584  ;;  %5598 = vrcp.f32 %v3085_v8 }
 0x50c   :  { %3198 = vadd.xlane.f32.xlu1 %v3197_v4  ;;  %v3091_v55 = vpop.xlane.xlu1 %3090  ;;  %v5587_v56 = vpop.eup %5586  ;;  %v3203_v29 = vsel %vm1737_vm0, %v7181_v26, 0.0 }
 0x50d   :  { %v3088_v60 = vpop.xlane.xlu0 %3087  ;;  %v7185_v45 = vpop.eup %5588  ;;  %v3291_v41 = vmul.f32 %v5587_v56, %v6921_v22 }
 0x50e   :  { %3195 = vadd.xlane.f32.xlu0 %v3194_v63  ;;  %5600 = vrcp.f32 %v3088_v60  ;;  %v3206_v27 = vsel %vm1737_vm0, %v7185_v45, 0.0 }
 0x50f   :  { %5602 = vrcp.f32 %v3091_v55 }
 0x510   :  { %v7189_v40 = vpop.eup %5590  ;;  %3204 = vadd.xlane.f32.xlu1 %v3203_v29  ;;  %v3097_v11 = vpop.xlane.xlu1 %3096 }
 0x511   :  { %v5593_v42 = vpop.eup %5592  ;;  %v3094_v52 = vpop.xlane.xlu0 %3093  ;;  %v3200_v9 = vsel %vm1737_vm0, %v7189_v40, 0.0 }
 0x512   :  { %v5595_v39 = vpop.eup %5594  ;;  %v3292_v25 = vmul.f32 %v5593_v42, %v6938_v32  ;;  %3201 = vadd.xlane.f32.xlu0 %v3200_v9  ;;  %5604 = vrcp.f32 %v3094_v52 }
 0x513   :  { %5606 = vrcp.f32 %v3097_v11  ;;  %v3293_v30 = vmul.f32 %v5595_v39, %v6932_v44  ;;  %v7523_v11 = vld [vmem:[#allocation30_spill] sm:$0xff] }
 0x514   :  { %v5597_v3 = vpop.eup %5596  ;;  %v3346_v36 = vpack.c.bf16 %v3292_v25, %v3291_v41 }
 0x515   :  { %v3100_v15 = vpop.xlane.xlu0 %3099  ;;  %v3294_v8 = vmul.f32 %v5597_v3, %v6946_v23  ;;  %v5599_v22 = vpop.eup %5598  ;;  %v7522_v23 = vld [vmem:[#allocation29_spill] sm:$0xff] }
 0x516   :  { %4956 = vmatmul.mubr.msk.bf16.vlgmr.msra.gmra.mrb[124].mxu1 %vm1737_vm0, %v3346_v36  ;;  %5608 = vrcp.f32 %v3100_v15  ;;  %3207 = vadd.xlane.f32.xlu0 %v3206_v27  ;;  %v3295_v4 = vmul.f32 %v5599_v22, %v6942_v50  ;;  %v7525_v36 = vld [vmem:[#allocation32_spill] sm:$0xff] }
 0x517   :  { %4964 = vmatpush3.bf16.msra.mxu1 %v7518_v53  ;;  %v3347_v32 = vpack.c.bf16 %v3294_v8, %v3293_v30  ;;  %v7526_v30 = vld [vmem:[#allocation33_spill] sm:$0xff] }
 0x518   :  { %4965 = vmatprep.subr.bf16.mxu1 %v7521_v34  ;;  %v5601_v18 = vpop.eup %5600 }
 0x519   :  { %4959 = vmatprep.mubr.msk.bf16.mxu1 %vm1737_vm0, %v3347_v32  ;;  %v3296_v55 = vmul.f32 %v5601_v18, %v6952_v61  ;;  %v5603_v44 = vpop.eup %5602 }
 0x51a   :  { %v3297_v53 = vmul.f32 %v5603_v44, %v6955_v17 }
 0x51b   :  { %4966 = vmatpush3.bf16.msra.mxu1 %v7521_v34  ;;  %v3348_v60 = vpack.c.bf16 %v3296_v55, %v3295_v4  ;;  %v7527_v55 = vld [vmem:[#allocation34_spill] sm:$0xff] }
 0x51c   :  { %4967 = vmatprep.subr.bf16.mxu1 %v7522_v23  ;;  %v5605_v63 = vpop.eup %5604  ;;  %v3103_v56 = vpop.xlane.xlu1 %3102 }
 0x51d   :  { %v5607_v29 = vpop.eup %5606  ;;  %5610 = vrcp.f32 %v3103_v56  ;;  %v3298_v42 = vmul.f32 %v5605_v63, %v6963_v31  ;;  %v7524_v31 = vld [vmem:[#allocation31_spill] sm:$0xff] }
 0x51e   :  { %4960 = vmatmul.mubr.msk.bf16.gmra.mrb[128].mxu1 %vm1737_vm0, %v3348_v60  ;;  %v3106_v50 = vpop.xlane.xlu0 %3105  ;;  %v3299_v9 = vmul.f32 %v5607_v29, %v6957_v7 }
 0x51f   :  { %4968 = vmatpush3.bf16.msra.mxu1 %v7522_v23  ;;  %5612 = vrcp.f32 %v3106_v50  ;;  %v3349_v52 = vpack.c.bf16 %v3298_v42, %v3297_v53  ;;  %v7528_v23 = vld [vmem:[#allocation35_spill] sm:$0xff] }
 0x520   :  { %v5609_v61 = vpop.eup %5608  ;;  %4969 = vmatprep.subr.bf16.mxu1 %v7523_v11  ;;  %v3109_v41 = vpop.xlane.xlu1 %3108 }
 0x521   :  { %v3300_v39 = vmul.f32 %v5609_v61, %v6972_v5  ;;  %5614 = vrcp.f32 %v3109_v41  ;;  %4971 = vmatprep.mubr.msk.bf16.mxu1 %vm1737_vm0, %v3349_v52 }
 0x522   :  { %v3112_v17 = vpop.xlane.xlu0 %3111 }
 0x523   :  { %v3350_v25 = vpack.c.bf16 %v3300_v39, %v3299_v9  ;;  %4970 = vmatpush3.bf16.msra.mxu1 %v7523_v11  ;;  %5616 = vrcp.f32 %v3112_v17 }
 0x524   :  { %4979 = vmatprep.subr.bf16.mxu1 %v7524_v31 }
 0x526   :  { %4972 = vmatmul.mubr.msk.bf16.vlgmr.msra.gmra.mrb[132].mxu1 %vm1737_vm0, %v3350_v25 }
 0x527   :  { %4980 = vmatpush3.bf16.msra.mxu1 %v7524_v31  ;;  %v5611_v3 = vpop.eup %5610  ;;  %v7531_v31 = vld [vmem:[#allocation10_spill] sm:$0xff] }
 0x528   :  { %4981 = vmatprep.subr.bf16.mxu1 %v7525_v36  ;;  %v3301_v5 = vmul.f32 %v5611_v3, %v6977_v38 }
 0x529   :  { %v5613_v7 = vpop.eup %5612 }
 0x52a   :  { %v3302_v15 = vmul.f32 %v5613_v7, %v6983_v54 }
 0x52b   :  { %4982 = vmatpush3.bf16.msra.mxu1 %v7525_v36  ;;  %v5615_v27 = vpop.eup %5614 }
 0x52c   :  { %4983 = vmatprep.subr.bf16.mxu1 %v7526_v30  ;;  %v3115_v8 = vpop.xlane.xlu1 %3114  ;;  %v3351_v22 = vpack.c.bf16 %v3302_v15, %v3301_v5  ;;  %v3303_v18 = vmul.f32 %v5615_v27, %v6979_v43  ;;  %v7532_v5 = vld [vmem:[#allocation52_spill] sm:$0xff]  ;;  %v7533_v27 = vld [vmem:[#allocation11_spill] sm:$0xff] }
 0x52d   :  { %v5617_v32 = vpop.eup %5616  ;;  %5618 = vrcp.f32 %v3115_v8 }
 0x52e   :  { %4975 = vmatprep.mubr.msk.bf16.mxu1 %vm1737_vm0, %v3351_v22  ;;  %v3118_v34 = vpop.xlane.xlu0 %3117  ;;  %v3304_v4 = vmul.f32 %v5617_v32, %v6989_v0 }
 0x52f   :  { %4984 = vmatpush3.bf16.msra.mxu1 %v7526_v30  ;;  %5620 = vrcp.f32 %v3118_v34 }
 0x530   :  { %4985 = vmatprep.subr.bf16.mxu1 %v7527_v55  ;;  %v3121_v38 = vpop.xlane.xlu1 %3120  ;;  %v3352_v54 = vpack.c.bf16 %v3304_v4, %v3303_v18 }
 0x531   :  { %5622 = vrcp.f32 %v3121_v38  ;;  %v7534_v38 = vld [vmem:[#allocation53_spill] sm:$0xff] }
 0x532   :  { %v3124_v44 = vpop.xlane.xlu0 %3123  ;;  %4976 = vmatmul.mubr.msk.bf16.gmra.mrb[136].mxu1 %vm1737_vm0, %v3352_v54 }
 0x533   :  { %4986 = vmatpush3.bf16.msra.mxu1 %v7527_v55  ;;  %5624 = vrcp.f32 %v3124_v44 }
 0x534   :  { %4995 = vmatprep.subr.bf16.mxu1 %v7528_v23 }
 0x537   :  { %v5619_v60 = vpop.eup %5618 }
 0x538   :  { %v3305_v43 = vmul.f32 %v5619_v60, %v6997_v48 }
 0x539   :  { %v5621_v63 = vpop.eup %5620 }
 0x53a   :  { %v3306_v0 = vmul.f32 %v5621_v63, %v7003_v35  ;;  %v7529_v35 = vld [vmem:[#allocation8_spill] sm:$0xff] }
 0x53b   :  { %v5623_v56 = vpop.eup %5622 }
 0x53c   :  { %v3127_v29 = vpop.xlane.xlu1 %3126  ;;  %v3353_v53 = vpack.c.bf16 %v3306_v0, %v3305_v43  ;;  %v3307_v50 = vmul.f32 %v5623_v56, %v6999_v12  ;;  %v7530_v12 = vld [vmem:[#allocation9_spill] sm:$0xff] }
 0x53d   :  { %v5625_v42 = vpop.eup %5624  ;;  %5626 = vrcp.f32 %v3127_v29 }
 0x53e   :  { %v3308_v61 = vmul.f32 %v5625_v42, %v7009_v13  ;;  %4987 = vmatprep.mubr.msk.bf16.mxu1 %vm1737_vm0, %v3353_v53  ;;  %v3130_v11 = vpop.xlane.xlu0 %3129 }
 0x53f   :  { %5628 = vrcp.f32 %v3130_v11 }
 0x540   :  { %v3354_v52 = vpack.c.bf16 %v3308_v61, %v3307_v50  ;;  %v3133_v9 = vpop.xlane.xlu1 %3132  ;;  %v7535_v61 = vld [vmem:[#allocation12_spill] sm:$0xff] }
 0x541   :  { %5630 = vrcp.f32 %v3133_v9 }
 0x542   :  { %4988 = vmatmul.mubr.msk.bf16.vlgmr.msra.gmra.mrb[140].mxu1 %vm1737_vm0, %v3354_v52  ;;  %v3136_v48 = vpop.xlane.xlu0 %3135 }
 0x543   :  { %5632 = vrcp.f32 %v3136_v48  ;;  %4996 = vmatpush3.bf16.msra.mxu1 %v7528_v23 }
 0x544   :  { %4997 = vmatprep.subr.bf16.mxu1 %v7529_v35 }
 0x547   :  { %v5627_v39 = vpop.eup %5626  ;;  %4998 = vmatpush3.bf16.msra.mxu1 %v7529_v35  ;;  %v7537_v35 = vld [vmem:[#allocation13_spill] sm:$0xff] }
 0x548   :  { %4999 = vmatprep.subr.bf16.mxu1 %v7530_v12  ;;  %v3309_v41 = vmul.f32 %v5627_v39, %v7016_v1  ;;  %v7538_v39 = vld [vmem:[#allocation14_spill] sm:$0xff] }
 0x549   :  { %v5629_v13 = vpop.eup %5628 }
 0x54a   :  { %v3310_v25 = vmul.f32 %v5629_v13, %v7022_v21 }
 0x54b   :  { %v5631_v17 = vpop.eup %5630  ;;  %5000 = vmatpush3.bf16.msra.mxu1 %v7530_v12 }
 0x54c   :  { %5001 = vmatprep.subr.bf16.mxu1 %v7531_v31  ;;  %v3355_v3 = vpack.c.bf16 %v3310_v25, %v3309_v41  ;;  %v3311_v7 = vmul.f32 %v5631_v17, %v7018_v59  ;;  %v7539_v41 = vld [vmem:[#allocation15_spill] sm:$0xff] }
 0x54d   :  { %v5633_v36 = vpop.eup %5632 }
 0x54e   :  { %4991 = vmatprep.mubr.msk.bf16.mxu1 %vm1737_vm0, %v3355_v3  ;;  %v3312_v15 = vmul.f32 %v5633_v36, %v7532_v5 }
 0x54f   :  { %5002 = vmatpush3.bf16.msra.mxu1 %v7531_v31 }
 0x550   :  { %5011 = vmatprep.subr.bf16.mxu1 %v7533_v27  ;;  %v3356_v1 = vpack.c.bf16 %v3312_v15, %v3311_v7 }
 0x552   :  { %v3139_v30 = vpop.xlane.xlu1 %3138  ;;  %4992 = vmatmul.mubr.msk.bf16.gmra.mrb[144].mxu1 %vm1737_vm0, %v3356_v1 }
 0x553   :  { %5634 = vrcp.f32 %v3139_v30 }
 0x556   :  { %v3145_v21 = vpop.xlane.xlu1 %3144 }
 0x55a   :  { %v3142_v8 = vpop.xlane.xlu0 %3141 }
 0x55b   :  { %5636 = vrcp.f32 %v3142_v8  ;;  %v3151_v22 = vpop.xlane.xlu1 %3150 }
 0x55c   :  { %5638 = vrcp.f32 %v3145_v21 }
 0x55d   :  { %v5635_v18 = vpop.eup %5634 }
 0x55e   :  { %v3148_v32 = vpop.xlane.xlu0 %3147  ;;  %v3313_v54 = vmul.f32 %v5635_v18, %v7534_v38  ;;  %v7540_v18 = vld [vmem:[#allocation16_spill] sm:$0xff] }
 0x55f   :  { %5640 = vrcp.f32 %v3148_v32  ;;  %v3157_v59 = vpop.xlane.xlu1 %3156 }
 0x560   :  { %5642 = vrcp.f32 %v3151_v22 }
 0x563   :  { %v3154_v34 = vpop.xlane.xlu0 %3153 }
 0x564   :  { %5644 = vrcp.f32 %v3154_v34 }
 0x565   :  { %v5637_v4 = vpop.eup %5636  ;;  %5646 = vrcp.f32 %v3157_v59 }
 0x566   :  { %v3314_v44 = vmul.f32 %v5637_v4, %v7053_v37  ;;  %v5639_v23 = vpop.eup %5638 }
 0x567   :  { %v3160_v55 = vpop.xlane.xlu0 %3159  ;;  %v3315_v43 = vmul.f32 %v5639_v23, %v7041_v46 }
 0x568   :  { %5648 = vrcp.f32 %v3160_v55  ;;  %v3357_v60 = vpack.c.bf16 %v3314_v44, %v3313_v54  ;;  %v7541_v55 = vld [vmem:[#allocation38_spill] sm:$0xff] }
 0x569   :  { %v5641_v63 = vpop.eup %5640 }
 0x56a   :  { %v3316_v0 = vmul.f32 %v5641_v63, %v7061_v33  ;;  %5003 = vmatprep.mubr.msk.bf16.mxu1 %vm1737_vm0, %v3357_v60  ;;  %v5643_v56 = vpop.eup %5642  ;;  %v7536_v33 = vld [vmem:[#allocation37_spill] sm:$0xff]  ;;  %v7543_v60 = vld [vmem:[#allocation18_spill] sm:$0xff] }
 0x56b   :  { %v3317_v42 = vmul.f32 %v5643_v56, %v7056_v51 }
 0x56c   :  { %v3358_v29 = vpack.c.bf16 %v3316_v0, %v3315_v43 }
 0x56e   :  { %v5645_v53 = vpop.eup %5644  ;;  %5004 = vmatmul.mubr.msk.bf16.vlgmr.msra.gmra.mrb[148].mxu1 %vm1737_vm0, %v3358_v29 }
 0x56f   :  { %v3318_v50 = vmul.f32 %v5645_v53, %v7077_v10  ;;  %v5647_v37 = vpop.eup %5646  ;;  %5012 = vmatpush3.bf16.msra.mxu1 %v7533_v27 }
 0x570   :  { %5013 = vmatprep.subr.bf16.mxu1 %v7535_v61  ;;  %v3319_v9 = vmul.f32 %v5647_v37, %v7536_v33 }
 0x571   :  { %v3359_v11 = vpack.c.bf16 %v3318_v50, %v3317_v42 }
 0x572   :  { %v5649_v46 = vpop.eup %5648  ;;  %v3163_v52 = vpop.xlane.xlu1 %3162 }
 0x573   :  { %5007 = vmatprep.mubr.msk.bf16.mxu1 %vm1737_vm0, %v3359_v11  ;;  %v3320_v48 = vmul.f32 %v5649_v46, %v7074_v58  ;;  %5014 = vmatpush3.bf16.msra.mxu1 %v7535_v61  ;;  %5650 = vrcp.f32 %v3163_v52 }
 0x574   :  { %5015 = vmatprep.subr.bf16.mxu1 %v7537_v35 }
 0x575   :  { %v3360_v51 = vpack.c.bf16 %v3320_v48, %v3319_v9 }
 0x576   :  { %v3169_v10 = vpop.xlane.xlu1 %3168 }
 0x577   :  { %5008 = vmatmul.mubr.msk.bf16.gmra.mrb[152].mxu1 %vm1737_vm0, %v3360_v51 }
 0x578   :  { %5016 = vmatpush3.bf16.msra.mxu1 %v7537_v35 }
 0x579   :  { %5017 = vmatprep.subr.bf16.mxu1 %v7538_v39 }
 0x57b   :  { %v3166_v12 = vpop.xlane.xlu0 %3165 }
 0x57c   :  { %5652 = vrcp.f32 %v3166_v12  ;;  %5018 = vmatpush3.bf16.msra.mxu1 %v7538_v39  ;;  %v3175_v13 = vpop.xlane.xlu1 %3174 }
 0x57d   :  { %5027 = vmatprep.subr.bf16.mxu1 %v7539_v41  ;;  %5654 = vrcp.f32 %v3169_v10  ;;  %v5651_v31 = vpop.eup %5650 }
 0x57e   :  { %v3321_v7 = vmul.f32 %v5651_v31, %v7099_v24 }
 0x57f   :  { %v3172_v58 = vpop.xlane.xlu0 %3171 }
 0x580   :  { %5656 = vrcp.f32 %v3172_v58  ;;  %v3181_v25 = vpop.xlane.xlu1 %3180 }
 0x581   :  { %5658 = vrcp.f32 %v3175_v13 }
 0x583   :  { %v3178_v17 = vpop.xlane.xlu0 %3177 }
 0x584   :  { %5660 = vrcp.f32 %v3178_v17 }
 0x585   :  { %5662 = vrcp.f32 %v3181_v25 }
 0x586   :  { %v5653_v3 = vpop.eup %5652 }
 0x587   :  { %v3184_v36 = vpop.xlane.xlu0 %3183  ;;  %v3322_v5 = vmul.f32 %v5653_v3, %v7113_v6  ;;  %v5655_v15 = vpop.eup %5654 }
 0x588   :  { %5664 = vrcp.f32 %v3184_v36  ;;  %v3323_v30 = vmul.f32 %v5655_v15, %v7101_v57 }
 0x589   :  { %v3361_v27 = vpack.c.bf16 %v3322_v5, %v3321_v7 }
 0x58a   :  { %v5657_v1 = vpop.eup %5656 }
 0x58b   :  { %v3324_v21 = vmul.f32 %v5657_v1, %v7121_v2  ;;  %5019 = vmatprep.mubr.msk.bf16.mxu1 %vm1737_vm0, %v3361_v27  ;;  %v5659_v8 = vpop.eup %5658 }
 0x58c   :  { %v3325_v59 = vmul.f32 %v5659_v8, %v7116_v28  ;;  %v7542_v28 = vld [vmem:[#allocation17_spill] sm:$0xff] }
 0x58d   :  { %v3362_v22 = vpack.c.bf16 %v3324_v21, %v3323_v30 }
 0x58e   :  { %v5661_v32 = vpop.eup %5660 }
 0x58f   :  { %5020 = vmatmul.mubr.msk.bf16.vlgmr.msra.gmra.mrb[156].mxu1 %vm1737_vm0, %v3362_v22  ;;  %v3326_v24 = vmul.f32 %v5661_v32, %v7137_v14  ;;  %v5663_v6 = vpop.eup %5662 }
 0x590   :  { %5028 = vmatpush3.bf16.msra.mxu1 %v7539_v41  ;;  %v3187_v34 = vpop.xlane.xlu1 %3186  ;;  %v3327_v2 = vmul.f32 %v5663_v6, %v7126_v16 }
 0x591   :  { %5029 = vmatprep.subr.bf16.mxu1 %v7540_v18  ;;  %v3363_v57 = vpack.c.bf16 %v3326_v24, %v3325_v59  ;;  %5666 = vrcp.f32 %v3187_v34 }
 0x592   :  { %v5665_v4 = vpop.eup %5664 }
 0x593   :  { %5023 = vmatprep.mubr.msk.bf16.mxu1 %vm1737_vm0, %v3363_v57  ;;  %v3328_v38 = vmul.f32 %v5665_v4, %v7541_v55 }
 0x594   :  { %5030 = vmatpush3.bf16.msra.mxu1 %v7540_v18  ;;  %v3193_v54 = vpop.xlane.xlu1 %3192 }
 0x595   :  { %5031 = vmatprep.subr.bf16.mxu1 %v7542_v28  ;;  %v3364_v14 = vpack.c.bf16 %v3328_v38, %v3327_v2 }
 0x597   :  { %v3190_v44 = vpop.xlane.xlu0 %3189  ;;  %5024 = vmatmul.mubr.msk.bf16.gmra.mrb[160].mxu1 %vm1737_vm0, %v3364_v14 }
 0x598   :  { %5668 = vrcp.f32 %v3190_v44  ;;  %5032 = vmatpush3.bf16.msra.mxu1 %v7542_v28 }
 0x599   :  { %v3199_v23 = vpop.xlane.xlu1 %3198  ;;  %5033 = vmatprep.subr.bf16.mxu1 %v7543_v60  ;;  %5670 = vrcp.f32 %v3193_v54 }
 0x59b   :  { %v3196_v16 = vpop.xlane.xlu0 %3195  ;;  %v5667_v56 = vpop.eup %5666 }
 0x59c   :  { %5672 = vrcp.f32 %v3196_v16  ;;  %5034 = vmatpush3.bf16.msra.mxu1 %v7543_v60  ;;  %v3329_v33 = vmul.f32 %v5667_v56, %v7159_v62 }
 0x59d   :  { %5674 = vrcp.f32 %v3199_v23  ;;  %v3205_v63 = vpop.xlane.xlu1 %3204 }
 0x59e   :  { %v4925_v43 = vpop.f32.mrb[108].mxu1 }
 0x59f   :  { %v3202_v0 = vpop.xlane.xlu0 %3201  ;;  %v4597_v29 = vpack.c.bf16 %v4925_v43, %v4925_v43  ;;  %v3415_v53 = vpop.f32.mrb[109].mxu1 }
 0x5a0   :  { %5676 = vrcp.f32 %v3202_v0  ;;  %v4595_v42 = vpack.c.bf16 %v3415_v53, %v3415_v53  ;;  %v4926_v50 = vpop.f32.mrb[110].mxu1 }
 0x5a1   :  { %5678 = vrcp.f32 %v3205_v63  ;;  %4244 = vst.msk [vmem:[#allocation5 + $0x8] sm:$0xf] %vm4241_vm9, %v4597_v29  ;;  %v4598_v61 = vpack.c.bf16 %v4926_v50, %v4926_v50  ;;  %v3418_v11 = vpop.f32.mrb[111].mxu1 }
 0x5a2   :  { %v5669_v37 = vpop.eup %5668  ;;  %4242 = vst.msk [vmem:[#allocation5] sm:$0xf] %vm4241_vm9, %v4595_v42  ;;  %v4596_v46 = vpack.c.bf16 %v3418_v11, %v3418_v11 }
 0x5a3   :  { %v3208_v52 = vpop.xlane.xlu0 %3207  ;;  %v3330_v9 = vmul.f32 %v5669_v37, %v7171_v49  ;;  %v5671_v48 = vpop.eup %5670  ;;  %4245 = vst.msk [vmem:[#allocation5 + $0xc] sm:$0xf] %vm4241_vm9, %v4598_v61 }
 0x5a4   :  { %5680 = vrcp.f32 %v3208_v52  ;;  %4243 = vst.msk [vmem:[#allocation5 + $0x4] sm:$0xf] %vm4241_vm9, %v4596_v46  ;;  %v3331_v10 = vmul.f32 %v5671_v48, %v7166_v20 }
 0x5a5   :  { %v3365_v35 = vpack.c.bf16 %v3330_v9, %v3329_v33 }
 0x5a6   :  { %v5673_v51 = vpop.eup %5672 }
 0x5a7   :  { %v3332_v39 = vmul.f32 %v5673_v51, %v7173_v19  ;;  %5035 = vmatprep.mubr.msk.bf16.mxu1 %vm1737_vm0, %v3365_v35  ;;  %v5675_v12 = vpop.eup %5674 }
 0x5a8   :  { %v3333_v62 = vmul.f32 %v5675_v12, %v7177_v47 }
 0x5a9   :  { %v3366_v13 = vpack.c.bf16 %v3332_v39, %v3331_v10 }
 0x5aa   :  { %v5677_v41 = vpop.eup %5676 }
 0x5ab   :  { %5036 = vmatmul.mubr.msk.bf16.vlgmr.msra.gmra.mrb[164].mxu1 %vm1737_vm0, %v3366_v13  ;;  %v3334_v49 = vmul.f32 %v5677_v41, %v7189_v40  ;;  %v5679_v58 = vpop.eup %5678 }
 0x5ac   :  { %v3335_v20 = vmul.f32 %v5679_v58, %v7181_v26 }
 0x5ad   :  { %v3367_v25 = vpack.c.bf16 %v3334_v49, %v3333_v62 }
 0x5ae   :  { %v5681_v17 = vpop.eup %5680 }
 0x5af   :  { %5039 = vmatprep.mubr.msk.bf16.mxu1 %vm1737_vm0, %v3367_v25  ;;  %v3336_v19 = vmul.f32 %v5681_v17, %v7185_v45 }
 0x5b1   :  { %v4929_v31 = vpop.f32.mrb[112].mxu1  ;;  %v3368_v3 = vpack.c.bf16 %v3336_v19, %v3335_v20 }
 0x5b2   :  { %v4601_v36 = vpack.c.bf16 %v4929_v31, %v4929_v31  ;;  %v3431_v7 = vpop.f32.mrb[113].mxu1 }
 0x5b3   :  { %v4599_v5 = vpack.c.bf16 %v3431_v7, %v3431_v7  ;;  %v4930_v15 = vpop.f32.mrb[114].mxu1  ;;  %5040 = vmatmul.mubr.msk.bf16.gmra.mrb[168].mxu1 %vm1737_vm0, %v3368_v3 }
 0x5b4   :  { %4248 = vst.msk [vmem:[#allocation5 + $0x18] sm:$0xf] %vm4241_vm9, %v4601_v36  ;;  %v4602_v47 = vpack.c.bf16 %v4930_v15, %v4930_v15  ;;  %v3434_v40 = vpop.f32.mrb[115].mxu1 }
 0x5b5   :  { %4246 = vst.msk [vmem:[#allocation5 + $0x10] sm:$0xf] %vm4241_vm9, %v4599_v5  ;;  %v4600_v27 = vpack.c.bf16 %v3434_v40, %v3434_v40 }
 0x5b6   :  { %4249 = vst.msk [vmem:[#allocation5 + $0x1c] sm:$0xf] %vm4241_vm9, %v4602_v47 }
 0x5b7   :  { %4247 = vst.msk [vmem:[#allocation5 + $0x14] sm:$0xf] %vm4241_vm9, %v4600_v27 }
 0x5be   :  { %v4941_v26 = vpop.f32.mrb[116].mxu1 }
 0x5bf   :  { %v4605_v45 = vpack.c.bf16 %v4941_v26, %v4941_v26  ;;  %v3492_v1 = vpop.f32.mrb[117].mxu1 }
 0x5c0   :  { %v4603_v30 = vpack.c.bf16 %v3492_v1, %v3492_v1  ;;  %v4942_v21 = vpop.f32.mrb[118].mxu1 }
 0x5c1   :  { %4252 = vst.msk [vmem:[#allocation5 + $0x28] sm:$0xf] %vm4241_vm9, %v4605_v45  ;;  %v4606_v8 = vpack.c.bf16 %v4942_v21, %v4942_v21  ;;  %v3495_v22 = vpop.f32.mrb[119].mxu1 }
 0x5c2   :  { %4250 = vst.msk [vmem:[#allocation5 + $0x20] sm:$0xf] %vm4241_vm9, %v4603_v30  ;;  %v4604_v32 = vpack.c.bf16 %v3495_v22, %v3495_v22 }
 0x5c3   :  { %4253 = vst.msk [vmem:[#allocation5 + $0x2c] sm:$0xf] %vm4241_vm9, %v4606_v8 }
 0x5c4   :  { %4251 = vst.msk [vmem:[#allocation5 + $0x24] sm:$0xf] %vm4241_vm9, %v4604_v32 }
 0x5d1   :  { %v4945_v59 = vpop.f32.mrb[120].mxu1 }
 0x5d2   :  { %v4609_v24 = vpack.c.bf16 %v4945_v59, %v4945_v59  ;;  %v3508_v6 = vpop.f32.mrb[121].mxu1 }
 0x5d3   :  { %v4607_v34 = vpack.c.bf16 %v3508_v6, %v3508_v6  ;;  %v4946_v18 = vpop.f32.mrb[122].mxu1 }
 0x5d4   :  { %4256 = vst.msk [vmem:[#allocation5 + $0x38] sm:$0xf] %vm4241_vm9, %v4609_v24  ;;  %v4610_v57 = vpack.c.bf16 %v4946_v18, %v4946_v18  ;;  %v3511_v4 = vpop.f32.mrb[123].mxu1 }
 0x5d5   :  { %4254 = vst.msk [vmem:[#allocation5 + $0x30] sm:$0xf] %vm4241_vm9, %v4607_v34  ;;  %v4608_v2 = vpack.c.bf16 %v3511_v4, %v3511_v4 }
 0x5d6   :  { %4257 = vst.msk [vmem:[#allocation5 + $0x3c] sm:$0xf] %vm4241_vm9, %v4610_v57 }
 0x5d7   :  { %4255 = vst.msk [vmem:[#allocation5 + $0x34] sm:$0xf] %vm4241_vm9, %v4608_v2 }
 0x5e9   :  { %v4957_v55 = vpop.f32.mrb[124].mxu1 }
 0x5ea   :  { %v4613_v38 = vpack.c.bf16 %v4957_v55, %v4957_v55  ;;  %v3569_v54 = vpop.f32.mrb[125].mxu1 }
 0x5eb   :  { %v4611_v28 = vpack.c.bf16 %v3569_v54, %v3569_v54  ;;  %v4958_v14 = vpop.f32.mrb[126].mxu1 }
 0x5ec   :  { %4260 = vst.msk [vmem:[#allocation5 + $0x48] sm:$0xf] %vm4241_vm9, %v4613_v38  ;;  %v4614_v44 = vpack.c.bf16 %v4958_v14, %v4958_v14  ;;  %v3572_v23 = vpop.f32.mrb[127].mxu1 }
 0x5ed   :  { %4258 = vst.msk [vmem:[#allocation5 + $0x40] sm:$0xf] %vm4241_vm9, %v4611_v28  ;;  %v4612_v60 = vpack.c.bf16 %v3572_v23, %v3572_v23 }
 0x5ee   :  { %4261 = vst.msk [vmem:[#allocation5 + $0x4c] sm:$0xf] %vm4241_vm9, %v4614_v44 }
 0x5ef   :  { %4259 = vst.msk [vmem:[#allocation5 + $0x44] sm:$0xf] %vm4241_vm9, %v4612_v60 }
 0x5f1   :  { %v4961_v16 = vpop.f32.mrb[128].mxu1 }
 0x5f2   :  { %v4617_v63 = vpack.c.bf16 %v4961_v16, %v4961_v16  ;;  %v3585_v43 = vpop.f32.mrb[129].mxu1 }
 0x5f3   :  { %v4615_v0 = vpack.c.bf16 %v3585_v43, %v3585_v43  ;;  %v4962_v56 = vpop.f32.mrb[130].mxu1 }
 0x5f4   :  { %4264 = vst.msk [vmem:[#allocation5 + $0x58] sm:$0xf] %vm4241_vm9, %v4617_v63  ;;  %v4618_v29 = vpack.c.bf16 %v4962_v56, %v4962_v56  ;;  %v3588_v53 = vpop.f32.mrb[131].mxu1 }
 0x5f5   :  { %4262 = vst.msk [vmem:[#allocation5 + $0x50] sm:$0xf] %vm4241_vm9, %v4615_v0  ;;  %v4616_v42 = vpack.c.bf16 %v3588_v53, %v3588_v53 }
 0x5f6   :  { %4265 = vst.msk [vmem:[#allocation5 + $0x5c] sm:$0xf] %vm4241_vm9, %v4618_v29 }
 0x5f7   :  { %4263 = vst.msk [vmem:[#allocation5 + $0x54] sm:$0xf] %vm4241_vm9, %v4616_v42 }
 0x5f9   :  { %v4973_v50 = vpop.f32.mrb[132].mxu1 }
 0x5fa   :  { %v4621_v37 = vpack.c.bf16 %v4973_v50, %v4973_v50  ;;  %v3646_v61 = vpop.f32.mrb[133].mxu1 }
 0x5fb   :  { %v4619_v11 = vpack.c.bf16 %v3646_v61, %v3646_v61  ;;  %v4974_v46 = vpop.f32.mrb[134].mxu1 }
 0x5fc   :  { %4268 = vst.msk [vmem:[#allocation5 + $0x68] sm:$0xf] %vm4241_vm9, %v4621_v37  ;;  %v4622_v52 = vpack.c.bf16 %v4974_v46, %v4974_v46  ;;  %v3649_v33 = vpop.f32.mrb[135].mxu1 }
 0x5fd   :  { %4266 = vst.msk [vmem:[#allocation5 + $0x60] sm:$0xf] %vm4241_vm9, %v4619_v11  ;;  %v4620_v9 = vpack.c.bf16 %v3649_v33, %v3649_v33 }
 0x5fe   :  { %4269 = vst.msk [vmem:[#allocation5 + $0x6c] sm:$0xf] %vm4241_vm9, %v4622_v52 }
 0x5ff   :  { %4267 = vst.msk [vmem:[#allocation5 + $0x64] sm:$0xf] %vm4241_vm9, %v4620_v9 }
 0x605   :  { %v4977_v48 = vpop.f32.mrb[136].mxu1 }
 0x606   :  { %v4625_v35 = vpack.c.bf16 %v4977_v48, %v4977_v48  ;;  %v3662_v51 = vpop.f32.mrb[137].mxu1 }
 0x607   :  { %v4623_v10 = vpack.c.bf16 %v3662_v51, %v3662_v51  ;;  %v4978_v39 = vpop.f32.mrb[138].mxu1 }
 0x608   :  { %4272 = vst.msk [vmem:[#allocation5 + $0x78] sm:$0xf] %vm4241_vm9, %v4625_v35  ;;  %v4626_v12 = vpack.c.bf16 %v4978_v39, %v4978_v39  ;;  %v3665_v13 = vpop.f32.mrb[139].mxu1 }
 0x609   :  { %4270 = vst.msk [vmem:[#allocation5 + $0x70] sm:$0xf] %vm4241_vm9, %v4623_v10  ;;  %v4624_v41 = vpack.c.bf16 %v3665_v13, %v3665_v13 }
 0x60a   :  { %4273 = vst.msk [vmem:[#allocation5 + $0x7c] sm:$0xf] %vm4241_vm9, %v4626_v12 }
 0x60b   :  { %4271 = vst.msk [vmem:[#allocation5 + $0x74] sm:$0xf] %vm4241_vm9, %v4624_v41 }
 0x615   :  { %v4989_v62 = vpop.f32.mrb[140].mxu1 }
 0x616   :  { %v4629_v49 = vpack.c.bf16 %v4989_v62, %v4989_v62  ;;  %v3723_v58 = vpop.f32.mrb[141].mxu1 }
 0x617   :  { %v4627_v25 = vpack.c.bf16 %v3723_v58, %v3723_v58  ;;  %v4990_v17 = vpop.f32.mrb[142].mxu1 }
 0x618   :  { %4276 = vst.msk [vmem:[#allocation5 + $0x88] sm:$0xf] %vm4241_vm9, %v4629_v49  ;;  %v4630_v20 = vpack.c.bf16 %v4990_v17, %v4990_v17  ;;  %v3726_v19 = vpop.f32.mrb[143].mxu1 }
 0x619   :  { %4274 = vst.msk [vmem:[#allocation5 + $0x80] sm:$0xf] %vm4241_vm9, %v4627_v25  ;;  %v4628_v31 = vpack.c.bf16 %v3726_v19, %v3726_v19 }
 0x61a   :  { %4277 = vst.msk [vmem:[#allocation5 + $0x8c] sm:$0xf] %vm4241_vm9, %v4630_v20 }
 0x61b   :  { %4275 = vst.msk [vmem:[#allocation5 + $0x84] sm:$0xf] %vm4241_vm9, %v4628_v31 }
 0x625   :  { %v4993_v3 = vpop.f32.mrb[144].mxu1 }
 0x626   :  { %v4633_v36 = vpack.c.bf16 %v4993_v3, %v4993_v3  ;;  %v3739_v7 = vpop.f32.mrb[145].mxu1 }
 0x627   :  { %v4631_v5 = vpack.c.bf16 %v3739_v7, %v3739_v7  ;;  %v4994_v15 = vpop.f32.mrb[146].mxu1 }
 0x628   :  { %4280 = vst.msk [vmem:[#allocation5 + $0x98] sm:$0xf] %vm4241_vm9, %v4633_v36  ;;  %v4634_v47 = vpack.c.bf16 %v4994_v15, %v4994_v15  ;;  %v3742_v40 = vpop.f32.mrb[147].mxu1 }
 0x629   :  { %4278 = vst.msk [vmem:[#allocation5 + $0x90] sm:$0xf] %vm4241_vm9, %v4631_v5  ;;  %v4632_v27 = vpack.c.bf16 %v3742_v40, %v3742_v40 }
 0x62a   :  { %4281 = vst.msk [vmem:[#allocation5 + $0x9c] sm:$0xf] %vm4241_vm9, %v4634_v47 }
 0x62b   :  { %4279 = vst.msk [vmem:[#allocation5 + $0x94] sm:$0xf] %vm4241_vm9, %v4632_v27 }
 0x641   :  { %v5005_v26 = vpop.f32.mrb[148].mxu1 }
 0x642   :  { %v4637_v45 = vpack.c.bf16 %v5005_v26, %v5005_v26  ;;  %v3800_v1 = vpop.f32.mrb[149].mxu1 }
 0x643   :  { %v4635_v30 = vpack.c.bf16 %v3800_v1, %v3800_v1  ;;  %v5006_v21 = vpop.f32.mrb[150].mxu1 }
 0x644   :  { %4284 = vst.msk [vmem:[#allocation5 + $0xa8] sm:$0xf] %vm4241_vm9, %v4637_v45  ;;  %v4638_v8 = vpack.c.bf16 %v5006_v21, %v5006_v21  ;;  %v3803_v22 = vpop.f32.mrb[151].mxu1 }
 0x645   :  { %4282 = vst.msk [vmem:[#allocation5 + $0xa0] sm:$0xf] %vm4241_vm9, %v4635_v30  ;;  %v4636_v32 = vpack.c.bf16 %v3803_v22, %v3803_v22 }
 0x646   :  { %4285 = vst.msk [vmem:[#allocation5 + $0xac] sm:$0xf] %vm4241_vm9, %v4638_v8 }
 0x647   :  { %4283 = vst.msk [vmem:[#allocation5 + $0xa4] sm:$0xf] %vm4241_vm9, %v4636_v32 }
 0x64a   :  { %v5009_v59 = vpop.f32.mrb[152].mxu1 }
 0x64b   :  { %v4641_v24 = vpack.c.bf16 %v5009_v59, %v5009_v59  ;;  %v3816_v6 = vpop.f32.mrb[153].mxu1 }
 0x64c   :  { %v4639_v34 = vpack.c.bf16 %v3816_v6, %v3816_v6  ;;  %v5010_v18 = vpop.f32.mrb[154].mxu1 }
 0x64d   :  { %4288 = vst.msk [vmem:[#allocation5 + $0xb8] sm:$0xf] %vm4241_vm9, %v4641_v24  ;;  %v4642_v57 = vpack.c.bf16 %v5010_v18, %v5010_v18  ;;  %v3819_v4 = vpop.f32.mrb[155].mxu1 }
 0x64e   :  { %4286 = vst.msk [vmem:[#allocation5 + $0xb0] sm:$0xf] %vm4241_vm9, %v4639_v34  ;;  %v4640_v2 = vpack.c.bf16 %v3819_v4, %v3819_v4 }
 0x64f   :  { %4289 = vst.msk [vmem:[#allocation5 + $0xbc] sm:$0xf] %vm4241_vm9, %v4642_v57 }
 0x650   :  { %4287 = vst.msk [vmem:[#allocation5 + $0xb4] sm:$0xf] %vm4241_vm9, %v4640_v2 }
 0x662   :  { %v5021_v55 = vpop.f32.mrb[156].mxu1 }
 0x663   :  { %v4645_v38 = vpack.c.bf16 %v5021_v55, %v5021_v55  ;;  %v3877_v54 = vpop.f32.mrb[157].mxu1 }
 0x664   :  { %v4643_v28 = vpack.c.bf16 %v3877_v54, %v3877_v54  ;;  %v5022_v14 = vpop.f32.mrb[158].mxu1 }
 0x665   :  { %4292 = vst.msk [vmem:[#allocation5 + $0xc8] sm:$0xf] %vm4241_vm9, %v4645_v38  ;;  %v4646_v44 = vpack.c.bf16 %v5022_v14, %v5022_v14  ;;  %v3880_v23 = vpop.f32.mrb[159].mxu1 }
 0x666   :  { %4290 = vst.msk [vmem:[#allocation5 + $0xc0] sm:$0xf] %vm4241_vm9, %v4643_v28  ;;  %v4644_v60 = vpack.c.bf16 %v3880_v23, %v3880_v23 }
 0x667   :  { %4293 = vst.msk [vmem:[#allocation5 + $0xcc] sm:$0xf] %vm4241_vm9, %v4646_v44 }
 0x668   :  { %4291 = vst.msk [vmem:[#allocation5 + $0xc4] sm:$0xf] %vm4241_vm9, %v4644_v60 }
 0x66a   :  { %v5025_v16 = vpop.f32.mrb[160].mxu1 }
 0x66b   :  { %v4649_v63 = vpack.c.bf16 %v5025_v16, %v5025_v16  ;;  %v3893_v43 = vpop.f32.mrb[161].mxu1 }
 0x66c   :  { %v4647_v0 = vpack.c.bf16 %v3893_v43, %v3893_v43  ;;  %v5026_v56 = vpop.f32.mrb[162].mxu1 }
 0x66d   :  { %4296 = vst.msk [vmem:[#allocation5 + $0xd8] sm:$0xf] %vm4241_vm9, %v4649_v63  ;;  %v4650_v29 = vpack.c.bf16 %v5026_v56, %v5026_v56  ;;  %v3896_v53 = vpop.f32.mrb[163].mxu1 }
 0x66e   :  { %4294 = vst.msk [vmem:[#allocation5 + $0xd0] sm:$0xf] %vm4241_vm9, %v4647_v0  ;;  %v4648_v42 = vpack.c.bf16 %v3896_v53, %v3896_v53 }
 0x66f   :  { %4297 = vst.msk [vmem:[#allocation5 + $0xdc] sm:$0xf] %vm4241_vm9, %v4650_v29 }
 0x670   :  { %4295 = vst.msk [vmem:[#allocation5 + $0xd4] sm:$0xf] %vm4241_vm9, %v4648_v42 }
 0x67e   :  { %v5037_v50 = vpop.f32.mrb[164].mxu1 }
 0x67f   :  { %v4653_v37 = vpack.c.bf16 %v5037_v50, %v5037_v50  ;;  %v3954_v61 = vpop.f32.mrb[165].mxu1 }
 0x680   :  { %v4651_v11 = vpack.c.bf16 %v3954_v61, %v3954_v61  ;;  %v5038_v46 = vpop.f32.mrb[166].mxu1 }
 0x681   :  { %4300 = vst.msk [vmem:[#allocation5 + $0xe8] sm:$0xf] %vm4241_vm9, %v4653_v37  ;;  %v4654_v52 = vpack.c.bf16 %v5038_v46, %v5038_v46  ;;  %v3957_v33 = vpop.f32.mrb[167].mxu1 }
 0x682   :  { %4298 = vst.msk [vmem:[#allocation5 + $0xe0] sm:$0xf] %vm4241_vm9, %v4651_v11  ;;  %v4652_v9 = vpack.c.bf16 %v3957_v33, %v3957_v33 }
 0x683   :  { %4301 = vst.msk [vmem:[#allocation5 + $0xec] sm:$0xf] %vm4241_vm9, %v4654_v52 }
 0x684   :  { %4299 = vst.msk [vmem:[#allocation5 + $0xe4] sm:$0xf] %vm4241_vm9, %v4652_v9 }
 0x686   :  { %v5041_v48 = vpop.f32.mrb[168].mxu1 }
 0x687   :  { %v4657_v35 = vpack.c.bf16 %v5041_v48, %v5041_v48  ;;  %v3970_v51 = vpop.f32.mrb[169].mxu1 }
 0x688   :  { %v4655_v10 = vpack.c.bf16 %v3970_v51, %v3970_v51  ;;  %v5042_v39 = vpop.f32.mrb[170].mxu1 }
 0x689   :  { %4304 = vst.msk [vmem:[#allocation5 + $0xf8] sm:$0xf] %vm4241_vm9, %v4657_v35  ;;  %v4658_v12 = vpack.c.bf16 %v5042_v39, %v5042_v39  ;;  %v3973_v13 = vpop.f32.mrb[171].mxu1 }
 0x68a   :  { %4302 = vst.msk [vmem:[#allocation5 + $0xf0] sm:$0xf] %vm4241_vm9, %v4655_v10  ;;  %v4656_v41 = vpack.c.bf16 %v3973_v13, %v3973_v13 }
 0x68b   :  { %4305 = vst.msk [vmem:[#allocation5 + $0xfc] sm:$0xf] %vm4241_vm9, %v4658_v12 }
 0x68c   :  { %4303 = vst.msk [vmem:[#allocation5 + $0xf4] sm:$0xf] %vm4241_vm9, %v4656_v41 }
 0x68d   :  { %5715 = shalt.err (!%p5712_p12)
}
 0x68e   :  { %s5716_s8 = scalar_lea.hbm %s7383_s2, 4096 }
 0x68f   :  { %p5717_p13 = scmp.ne.s32.totalorder %s7383_s2, %s5716_s8  ;;  %p5720_p0 = scmp.lt.u32.totalorder %s5716_s8, %s7383_s2 }
 0x691   :  { %p5722_p1 = pnand %p5720_p0, %p5717_p13 }
 0x693   :  { %5725 = shalt.err (!%p5722_p1)
}
 0x694   :  { %s5736_s13 = smov 4  }
 0x695   :  { %4317 = dma.vmem_to_hbm [thread:$0]  %s4312_s4, 4096, %s7383_s2, [#allocation4], %s5734_s1, %s5734_s1, %s5736_s13  }
 0x696   :  { %5728 = dma.done.wait [#allocation4], 4096  }
 0x697   :  { %5729 = vsyncadd [#allocation4], 4294963200 }
 0x698   :  { %4321 = vsyncpa [#allocation3], 1 }
 0x699   :  { %4322 = vsyncpa [#allocation4], 1 }

</bundles_post_ra>
